<compile_context>
chip_gen: v6e
topology: v6e:2x2x1
jax: 0.10.0
libtpu: 0.0.40
codegen_flags: <defaults>
</compile_context>

<pallas_src>
import functools
import math

import jax
import jax.numpy as jnp
from jax.experimental import pallas as pl
from jax.experimental.pallas import tpu as pltpu


def _round_up(x, m):
    return ((x + m - 1) // m) * m


# fc1 K-stream configuration, shared by prepare_params and fused_fc so the
# hoisted weight padding matches the kernel tiling exactly.
FC1_TK_PREF = 4096       # ~2 MiB bf16 weight block; x2 buffers fits every VMEM
FC1_N_SPLIT = 2          # leading "parallel" axis -> both v7x TensorCores


def _fc1_tiling(K):
    per_split = pl.cdiv(K, FC1_N_SPLIT)
    if per_split <= FC1_TK_PREF:
        tk = _round_up(per_split, 256)     # single K step per split
        k_steps = 1
    else:
        tk = FC1_TK_PREF
        k_steps = pl.cdiv(per_split, tk)
    Kp = tk * k_steps * FC1_N_SPLIT
    return tk, k_steps, Kp


# ----------------------------------------------------------------------------
# Pallas kernel 1: conv-as-matmul,  out = relu(A @ B + bias)  with a single
# K step (K = IC*KH*KW <= 1024 for both conv layers).  bf16 in, bf16 out,
# f32 accumulation inside the dot.
# ----------------------------------------------------------------------------
def _conv_matmul_kernel(a_ref, b_ref, bias_ref, o_ref, *, relu):
    out = jnp.dot(a_ref[...], b_ref[...], preferred_element_type=jnp.float32)
    out = out + bias_ref[...]                     # bias broadcasts (1, tn)
    if relu:
        out = jnp.maximum(out, 0.0)
    o_ref[...] = out.astype(o_ref.dtype)


def conv_matmul_bias_relu(a, w_pad, bias_pad, *, relu=True, tm_pref=1024):
    """a: (M, K) bf16 im2col patches.  w_pad: (K, Np) bf16, Np % 128 == 0.
    bias_pad: (1, Np) f32.  Returns (M, Np) bf16 of relu(a @ w + bias)."""
    M, K = a.shape
    Kw, Np = w_pad.shape
    assert Kw == K and K <= 1024, (K, Kw)   # conv1: 192, conv2: 1024 -> single K step
    assert Np % 128 == 0

    # Np is 128 for both convs -> tn = 128.  The layers are memory-bound, so
    # the half-width MXU feed on v6e/v7x is hidden behind HBM time.
    tn = 128
    tm = tm_pref if M > tm_pref else M       # full-dim block when M is small
    grid = (pl.cdiv(M, tm), Np // tn)

    return pl.pallas_call(
        functools.partial(_conv_matmul_kernel, relu=relu),
        out_shape=jax.ShapeDtypeStruct((M, Np), jnp.bfloat16),
        grid_spec=pltpu.PrefetchScalarGridSpec(
            num_scalar_prefetch=0,
            grid=grid,
            in_specs=[
                pl.BlockSpec((tm, K), lambda i, j: (i, 0)),
                pl.BlockSpec((K, tn), lambda i, j: (0, j)),   # constant over i -> resident
                pl.BlockSpec((1, tn), lambda i, j: (0, j)),
            ],
            out_specs=pl.BlockSpec((tm, tn), lambda i, j: (i, j)),
        ),
        compiler_params=pltpu.CompilerParams(
            dimension_semantics=("parallel", "parallel")),
    )(a.astype(jnp.bfloat16), w_pad, bias_pad)


# ----------------------------------------------------------------------------
# Pallas kernels 2+3: fc1 (K-split weight stream, f32 partial accumulation)
# followed by a tiny combine kernel doing relu(sum + b1) @ W2 + b2.
# ----------------------------------------------------------------------------
def _fc1_partial_kernel(x_ref, w1_ref, o_ref):
    k = pl.program_id(1)

    @pl.when(k == 0)
    def _():
        o_ref[...] = jnp.zeros_like(o_ref)

    o_ref[...] += jnp.dot(x_ref[...], w1_ref[...],
                          preferred_element_type=jnp.float32)


def _fc_combine_kernel(part_ref, b1_ref, w2_ref, b2_ref, o_ref):
    h = part_ref[...].sum(axis=0) + b1_ref[...]          # fc1 bias, f32
    h = jnp.maximum(h, 0.0).astype(jnp.bfloat16)         # ReLU
    o_ref[...] = jnp.dot(h, w2_ref[...],
                         preferred_element_type=jnp.float32) + b2_ref[...]


def fused_fc(flat, w1_pad, b1, w2_pad, b2):
    """flat: (M, K) bf16; w1_pad: (Kp, 256) bf16; b1: (1, 256) f32;
    w2_pad: (256, N2p) bf16; b2: (1, N2p) f32.
    Returns (M, N2p) f32 of relu(flat @ w1 + b1) @ w2 + b2."""
    M, K = flat.shape
    Kp, H = w1_pad.shape
    _, N2p = w2_pad.shape
    tk, k_steps, Kp_expected = _fc1_tiling(K)
    assert Kp == Kp_expected, (Kp, Kp_expected)

    x = flat.astype(jnp.bfloat16)
    if Kp != K:
        x = jnp.pad(x, ((0, 0), (0, Kp - K)))   # exact zero K-pad (tiny vs. weight stream)

    # Stage 1: partial hiddens, K split over a leading "parallel" axis so both
    # v7x TensorCores stream/accumulate concurrently; default double buffering
    # (the stream is HBM-BW bound at the large tk, deeper buffering adds nothing).
    partials = pl.pallas_call(
        _fc1_partial_kernel,
        out_shape=jax.ShapeDtypeStruct((FC1_N_SPLIT, M, H), jnp.float32),
        grid_spec=pltpu.PrefetchScalarGridSpec(
            num_scalar_prefetch=0,
            grid=(FC1_N_SPLIT, k_steps),
            in_specs=[
                pl.BlockSpec((M, tk), lambda p, k: (0, p * k_steps + k)),
                pl.BlockSpec((tk, H), lambda p, k: (p * k_steps + k, 0)),
            ],
            out_specs=pl.BlockSpec((pl.Squeezed(), M, H),
                                   lambda p, k: (p, 0, 0)),
        ),
        compiler_params=pltpu.CompilerParams(
            dimension_semantics=("parallel", "arbitrary")),
    )(x, w1_pad)

    # Stage 2: combine partials + fc1 bias + ReLU + fc_output.  All operands
    # are tiny (<0.5 MiB) -> whole-array VMEM blocks, no grid.
    out = pl.pallas_call(
        _fc_combine_kernel,
        out_shape=jax.ShapeDtypeStruct((M, N2p), jnp.float32),
    )(partials, b1, w2_pad, b2)
    return out


# ----------------------------------------------------------------------------
# Parameter init (mirrors WzryNet.__init__ shapes / init schemes)
# ----------------------------------------------------------------------------
def xavier_uniform(key, shape, fan_in, fan_out):
    bound = math.sqrt(6.0 / (fan_in + fan_out))
    return jax.random.uniform(key, shape, jnp.float32, -bound, bound)


def linear_init(key, out_f, in_f):
    kw_, kb_ = jax.random.split(key)
    bound = 1.0 / math.sqrt(in_f)
    w = jax.random.uniform(kw_, (out_f, in_f), jnp.float32, -bound, bound)
    b = jax.random.uniform(kb_, (out_f,), jnp.float32, -bound, bound)
    return w, b


def conv_out_hw(height, width):
    oh1 = (height - 8) // 4 + 1
    ow1 = (width - 8) // 4 + 1
    oh2 = (oh1 - 4) // 2 + 1
    ow2 = (ow1 - 4) // 2 + 1
    return oh2, ow2


def init_params(key, height, width):
    k1, k2, k3, k4 = jax.random.split(key, 4)
    conv1_w = xavier_uniform(k1, (64, 3, 8, 8), 3 * 8 * 8, 64 * 8 * 8)
    conv1_b = jnp.zeros((64,), jnp.float32)
    conv2_w = xavier_uniform(k2, (128, 64, 4, 4), 64 * 4 * 4, 128 * 4 * 4)
    conv2_b = jnp.zeros((128,), jnp.float32)
    oh2, ow2 = conv_out_hw(height, width)
    conv_out = 128 * oh2 * ow2
    fc1_w, fc1_b = linear_init(k3, 256, conv_out)
    fco_w, fco_b = linear_init(k4, 747, 256)
    return dict(conv1_w=conv1_w, conv1_b=conv1_b,
                conv2_w=conv2_w, conv2_b=conv2_b,
                fc1_w=fc1_w, fc1_b=fc1_b,
                fco_w=fco_w, fco_b=fco_b)


# ----------------------------------------------------------------------------
# One-time weight preparation: reshape/transpose/pad/bf16-cast hoisted out of
# the per-forward path.
# ----------------------------------------------------------------------------
def prepare_params(params, height, width):
    def prep_conv(w, b):
        oc, ic, kh, kw = w.shape
        K = ic * kh * kw
        Np = _round_up(oc, 128)
        wm = w.reshape(oc, K).T.astype(jnp.bfloat16)      # rows ordered (c, ki, kj)
        wm = jnp.pad(wm, ((0, 0), (0, Np - oc)))
        bm = jnp.pad(b.astype(jnp.float32), (0, Np - oc)).reshape(1, Np)
        return wm, bm

    w1, b1 = prep_conv(params["conv1_w"], params["conv1_b"])
    w2, b2 = prep_conv(params["conv2_w"], params["conv2_b"])

    # fc1: PyTorch flattens NCHW; our activations stay NHWC -> permute fc1's
    # input columns ONCE so no per-forward activation transpose is needed.
    # (conv_general_dilated_patches orders its feature dim channel-major
    #  (c, ki, kj), matching torch weight.reshape(OC, IC*KH*KW) above.)
    oh2, ow2 = conv_out_hw(height, width)
    fc1_w = params["fc1_w"]                               # (256, 128*oh2*ow2), NCHW cols
    fc1_w = fc1_w.reshape(256, 128, oh2, ow2).transpose(0, 2, 3, 1).reshape(256, -1)
    w_fc1 = fc1_w.T.astype(jnp.bfloat16)                  # (K, 256), NHWC-ordered rows
    K = w_fc1.shape[0]
    _, _, Kp = _fc1_tiling(K)
    if Kp != K:
        w_fc1 = jnp.pad(w_fc1, ((0, Kp - K), (0, 0)))
    b_fc1 = params["fc1_b"].astype(jnp.float32).reshape(1, 256)

    n_out = params["fco_w"].shape[0]                      # 747
    nop = _round_up(n_out, 128)                           # 768
    w_fco = jnp.pad(params["fco_w"].T.astype(jnp.bfloat16),
                    ((0, 0), (0, nop - n_out)))
    b_fco = jnp.pad(params["fco_b"].astype(jnp.float32),
                    (0, nop - n_out)).reshape(1, nop)

    return dict(w1=w1, b1=b1, w2=w2, b2=b2,
                w_fc1=w_fc1, b_fc1=b_fc1, w_fco=w_fco, b_fco=b_fco)


# ----------------------------------------------------------------------------
# Forward pass (WzryNet.forward)
# ----------------------------------------------------------------------------
def wzrynet_forward(prep, x):
    n = x.shape[0]
    # NCHW -> NHWC (lane-dense channels) and bf16, once at the top.
    x = jnp.transpose(x, (0, 2, 3, 1)).astype(jnp.bfloat16)

    # conv1 (8x8, stride 4) + ReLU: patch extraction then single-K matmul kernel
    p = jax.lax.conv_general_dilated_patches(
        x, (8, 8), (4, 4), "VALID",
        dimension_numbers=("NHWC", "HWIO", "NHWC"))       # (N,OH,OW, 3*8*8), (c,ki,kj)
    nb, oh, ow, kdim = p.shape
    y = conv_matmul_bias_relu(p.reshape(nb * oh * ow, kdim), prep["w1"], prep["b1"])
    x = y[:, :64].reshape(nb, oh, ow, 64)                 # drop OC padding; stays NHWC bf16

    # conv2 (4x4, stride 2) + ReLU
    # TODO(synk): fuse the 4x4/stride-2 patch extraction into the Pallas kernel
    # (BlockSpec the NHWC tile and form patch rows in-kernel) to avoid the ~4x
    # im2col expansion hitting HBM at the real 640x640 size.
    p = jax.lax.conv_general_dilated_patches(
        x, (4, 4), (2, 2), "VALID",
        dimension_numbers=("NHWC", "HWIO", "NHWC"))       # (N,OH,OW, 64*4*4)
    nb, oh, ow, kdim = p.shape
    y = conv_matmul_bias_relu(p.reshape(nb * oh * ow, kdim), prep["w2"], prep["b2"])
    x = y.reshape(nb, oh, ow, 128)                        # OC=128, no padding to drop

    # flatten in NHWC order (fc1 columns were pre-permuted to match torch's
    # NCHW x.view() order, so this is semantically identical)
    flat = x.reshape(n, -1)

    # fc1 + ReLU + fc_output (two Pallas calls: K-split stream + tiny combine)
    out = fused_fc(flat, prep["w_fc1"], prep["b_fc1"], prep["w_fco"], prep["b_fco"])
    return out[:, :747]


# ----------------------------------------------------------------------------
if __name__ == "__main__":
    H = W = 64          # small spatial size (module's size formula applied here)
    key = jax.random.PRNGKey(0)
    kp, kx = jax.random.split(key)

    params = init_params(kp, H, W)
    prep = prepare_params(params, H, W)                   # one-time weight prep
    x = jax.random.normal(kx, (2, 3, H, W), jnp.float32)  # NCHW, batch=2

    fwd = jax.jit(wzrynet_forward)
    out = jax.block_until_ready(fwd(prep, x))
    assert out.shape == (2, 747), out.shape
    assert out.dtype == jnp.float32
    print("KERNEL_OK")
</pallas_src>

<mosaic_0001>
module attributes {stable_mosaic.version = 11 : i64} {
  func.func @_conv_matmul_kernel(%arg0: i32, %arg1: i32, %arg2: memref<450x192xbf16, #tpu.memory_space<vmem>>, %arg3: memref<192x128xbf16, #tpu.memory_space<vmem>>, %arg4: memref<1x128xf32, #tpu.memory_space<vmem>>, %arg5: memref<450x128xbf16, #tpu.memory_space<vmem>>) attributes {dimension_semantics = [#tpu.dimension_semantics<parallel>, #tpu.dimension_semantics<parallel>], iteration_bounds = array<i64: 1, 1>, scalar_prefetch = 0 : i64, scratch_operands = 0 : i64, tpu.core_type = #tpu.core_type<tc>, window_params = [{transform_indices = @transform_0, window_bounds = array<i64: 450, 192>}, {transform_indices = @transform_1, window_bounds = array<i64: 192, 128>}, {transform_indices = @transform_2, window_bounds = array<i64: 1, 128>}, {transform_indices = @transform_3, window_bounds = array<i64: 450, 128>}]} {
    %c0 = arith.constant 0 : index
    %c0_0 = arith.constant 0 : index
    %0 = vector.load %arg2[%c0, %c0_0] : memref<450x192xbf16, #tpu.memory_space<vmem>>, vector<450x192xbf16>
    %c0_1 = arith.constant 0 : index
    %c0_2 = arith.constant 0 : index
    %1 = vector.load %arg3[%c0_1, %c0_2] : memref<192x128xbf16, #tpu.memory_space<vmem>>, vector<192x128xbf16>
    %cst = arith.constant dense<0.000000e+00> : vector<450x128xf32>
    %2 = tpu.matmul %0, %1, %cst {dimension_numbers = #tpu.dot_dimension_numbers<[1], [0], [0], [1], [0, 0, 1, 1], [], []>} : vector<450x192xbf16>, vector<192x128xbf16>, vector<450x128xf32> -> vector<450x128xf32>
    %c0_3 = arith.constant 0 : index
    %c0_4 = arith.constant 0 : index
    %3 = vector.load %arg4[%c0_3, %c0_4] : memref<1x128xf32, #tpu.memory_space<vmem>>, vector<1x128xf32>
    %4 = vector.broadcast %3 : vector<1x128xf32> to vector<450x128xf32>
    %5 = arith.addf %2, %4 : vector<450x128xf32>
    %cst_5 = arith.constant 0.000000e+00 : f32
    %6 = vector.broadcast %cst_5 : f32 to vector<450x128xf32>
    %7 = arith.maximumf %5, %6 : vector<450x128xf32>
    %8 = arith.truncf %7 : vector<450x128xf32> to vector<450x128xbf16>
    %c0_6 = arith.constant 0 : index
    %c0_7 = arith.constant 0 : index
    %9 = vector.load %arg5[%c0_6, %c0_7] : memref<450x128xbf16, #tpu.memory_space<vmem>>, vector<450x128xbf16>
    tpu.vector_store %arg5[%c0_6, %c0_7], %8 {strides = array<i32>} : memref<450x128xbf16, #tpu.memory_space<vmem>>, vector<450x128xbf16>,
    return
  }
  func.func @transform_0(%arg0: i32, %arg1: i32) -> (i32, i32) {
    %c0_i32 = arith.constant 0 : i32
    %c0_i32_0 = arith.constant 0 : i32
    return %arg0, %c0_i32 : i32, i32
  }
  func.func @transform_1(%arg0: i32, %arg1: i32) -> (i32, i32) {
    %c0_i32 = arith.constant 0 : i32
    %c0_i32_0 = arith.constant 0 : i32
    return %c0_i32, %arg1 : i32, i32
  }
  func.func @transform_2(%arg0: i32, %arg1: i32) -> (i32, i32) {
    %c0_i32 = arith.constant 0 : i32
    %c0_i32_0 = arith.constant 0 : i32
    return %c0_i32, %arg1 : i32, i32
  }
  func.func @transform_3(%arg0: i32, %arg1: i32) -> (i32, i32) {
    %c0_i32 = arith.constant 0 : i32
    return %arg0, %arg1 : i32, i32
  }
}

module attributes {stable_mosaic.version = 11 : i64} {
  func.func @_conv_matmul_kernel(%arg0: i32, %arg1: i32, %arg2: memref<72x1024xbf16, #tpu.memory_space<vmem>>, %arg3: memref<1024x128xbf16, #tpu.memory_space<vmem>>, %arg4: memref<1x128xf32, #tpu.memory_space<vmem>>, %arg5: memref<72x128xbf16, #tpu.memory_space<vmem>>) attributes {dimension_semantics = [#tpu.dimension_semantics<parallel>, #tpu.dimension_semantics<parallel>], iteration_bounds = array<i64: 1, 1>, scalar_prefetch = 0 : i64, scratch_operands = 0 : i64, tpu.core_type = #tpu.core_type<tc>, window_params = [{transform_indices = @transform_0, window_bounds = array<i64: 72, 1024>}, {transform_indices = @transform_1, window_bounds = array<i64: 1024, 128>}, {transform_indices = @transform_2, window_bounds = array<i64: 1, 128>}, {transform_indices = @transform_3, window_bounds = array<i64: 72, 128>}]} {
    %c0 = arith.constant 0 : index
    %c0_0 = arith.constant 0 : index
    %0 = vector.load %arg2[%c0, %c0_0] : memref<72x1024xbf16, #tpu.memory_space<vmem>>, vector<72x1024xbf16>
    %c0_1 = arith.constant 0 : index
    %c0_2 = arith.constant 0 : index
    %1 = vector.load %arg3[%c0_1, %c0_2] : memref<1024x128xbf16, #tpu.memory_space<vmem>>, vector<1024x128xbf16>
    %cst = arith.constant dense<0.000000e+00> : vector<72x128xf32>
    %2 = tpu.matmul %0, %1, %cst {dimension_numbers = #tpu.dot_dimension_numbers<[1], [0], [0], [1], [0, 0, 1, 1], [], []>} : vector<72x1024xbf16>, vector<1024x128xbf16>, vector<72x128xf32> -> vector<72x128xf32>
    %c0_3 = arith.constant 0 : index
    %c0_4 = arith.constant 0 : index
    %3 = vector.load %arg4[%c0_3, %c0_4] : memref<1x128xf32, #tpu.memory_space<vmem>>, vector<1x128xf32>
    %4 = vector.broadcast %3 : vector<1x128xf32> to vector<72x128xf32>
    %5 = arith.addf %2, %4 : vector<72x128xf32>
    %cst_5 = arith.constant 0.000000e+00 : f32
    %6 = vector.broadcast %cst_5 : f32 to vector<72x128xf32>
    %7 = arith.maximumf %5, %6 : vector<72x128xf32>
    %8 = arith.truncf %7 : vector<72x128xf32> to vector<72x128xbf16>
    %c0_6 = arith.constant 0 : index
    %c0_7 = arith.constant 0 : index
    %9 = vector.load %arg5[%c0_6, %c0_7] : memref<72x128xbf16, #tpu.memory_space<vmem>>, vector<72x128xbf16>
    tpu.vector_store %arg5[%c0_6, %c0_7], %8 {strides = array<i32>} : memref<72x128xbf16, #tpu.memory_space<vmem>>, vector<72x128xbf16>,
    return
  }
  func.func @transform_0(%arg0: i32, %arg1: i32) -> (i32, i32) {
    %c0_i32 = arith.constant 0 : i32
    %c0_i32_0 = arith.constant 0 : i32
    return %arg0, %c0_i32 : i32, i32
  }
  func.func @transform_1(%arg0: i32, %arg1: i32) -> (i32, i32) {
    %c0_i32 = arith.constant 0 : i32
    %c0_i32_0 = arith.constant 0 : i32
    return %c0_i32, %arg1 : i32, i32
  }
  func.func @transform_2(%arg0: i32, %arg1: i32) -> (i32, i32) {
    %c0_i32 = arith.constant 0 : i32
    %c0_i32_0 = arith.constant 0 : i32
    return %c0_i32, %arg1 : i32, i32
  }
  func.func @transform_3(%arg0: i32, %arg1: i32) -> (i32, i32) {
    %c0_i32 = arith.constant 0 : i32
    return %arg0, %arg1 : i32, i32
  }
}

module attributes {stable_mosaic.version = 11 : i64} {
  func.func @_fc1_partial_kernel(%arg0: i32, %arg1: i32, %arg2: memref<2x2304xbf16, #tpu.memory_space<vmem>>, %arg3: memref<2304x256xbf16, #tpu.memory_space<vmem>>, %arg4: memref<1x2x256xf32, #tpu.memory_space<vmem>>) attributes {dimension_semantics = [#tpu.dimension_semantics<parallel>, #tpu.dimension_semantics<arbitrary>], iteration_bounds = array<i64: 2, 1>, scalar_prefetch = 0 : i64, scratch_operands = 0 : i64, tpu.core_type = #tpu.core_type<tc>, window_params = [{transform_indices = @transform_0, window_bounds = array<i64: 2, 2304>}, {transform_indices = @transform_1, window_bounds = array<i64: 2304, 256>}, {transform_indices = @transform_2, window_bounds = array<i64: 1, 2, 256>}]} {
    %c0_i32 = arith.constant 0 : i32
    %0 = arith.cmpi eq, %arg1, %c0_i32 : i32
    %1 = arith.extui %0 : i1 to i32
    %c0_i32_0 = arith.constant 0 : i32
    %2 = arith.cmpi ne, %1, %c0_i32_0 : i32
    scf.if %2 {
      %cst_10 = arith.constant 0.000000e+00 : f32
      %12 = vector.broadcast %cst_10 : f32 to vector<2x256xf32>
      %c0_11 = arith.constant 0 : index
      %c0_12 = arith.constant 0 : index
      %c0_13 = arith.constant 0 : index
      %13 = vector.load %arg4[%c0_11, %c0_12, %c0_13] : memref<1x2x256xf32, #tpu.memory_space<vmem>>, vector<1x2x256xf32>
      %14 = vector.shape_cast %13 : vector<1x2x256xf32> to vector<2x256xf32>
      %15 = vector.shape_cast %12 : vector<2x256xf32> to vector<1x2x256xf32>
      tpu.vector_store %arg4[%c0_11, %c0_12, %c0_13], %15 {strides = array<i32>} : memref<1x2x256xf32, #tpu.memory_space<vmem>>, vector<1x2x256xf32>,
    } else {
    }
    %c0 = arith.constant 0 : index
    %c0_1 = arith.constant 0 : index
    %c0_2 = arith.constant 0 : index
    %3 = vector.load %arg4[%c0, %c0_1, %c0_2] : memref<1x2x256xf32, #tpu.memory_space<vmem>>, vector<1x2x256xf32>
    %4 = vector.shape_cast %3 : vector<1x2x256xf32> to vector<2x256xf32>
    %c0_3 = arith.constant 0 : index
    %c0_4 = arith.constant 0 : index
    %5 = vector.load %arg2[%c0_3, %c0_4] : memref<2x2304xbf16, #tpu.memory_space<vmem>>, vector<2x2304xbf16>
    %c0_5 = arith.constant 0 : index
    %c0_6 = arith.constant 0 : index
    %6 = vector.load %arg3[%c0_5, %c0_6] : memref<2304x256xbf16, #tpu.memory_space<vmem>>, vector<2304x256xbf16>
    %cst = arith.constant dense<0.000000e+00> : vector<2x256xf32>
    %7 = tpu.matmul %5, %6, %cst {dimension_numbers = #tpu.dot_dimension_numbers<[1], [0], [0], [1], [0, 0, 1, 1], [], []>} : vector<2x2304xbf16>, vector<2304x256xbf16>, vector<2x256xf32> -> vector<2x256xf32>
    %8 = arith.addf %4, %7 : vector<2x256xf32>
    %c0_7 = arith.constant 0 : index
    %c0_8 = arith.constant 0 : index
    %c0_9 = arith.constant 0 : index
    %9 = vector.load %arg4[%c0_7, %c0_8, %c0_9] : memref<1x2x256xf32, #tpu.memory_space<vmem>>, vector<1x2x256xf32>
    %10 = vector.shape_cast %9 : vector<1x2x256xf32> to vector<2x256xf32>
    %11 = vector.shape_cast %8 : vector<2x256xf32> to vector<1x2x256xf32>
    tpu.vector_store %arg4[%c0_7, %c0_8, %c0_9], %11 {strides = array<i32>} : memref<1x2x256xf32, #tpu.memory_space<vmem>>, vector<1x2x256xf32>,
    return
  }
  func.func @transform_0(%arg0: i32, %arg1: i32) -> (i32, i32) {
    %c1_i32 = arith.constant 1 : i32
    %0 = arith.muli %arg0, %c1_i32 : i32
    %1 = arith.addi %0, %arg1 : i32
    %c0_i32 = arith.constant 0 : i32
    %c0_i32_0 = arith.constant 0 : i32
    return %c0_i32, %1 : i32, i32
  }
  func.func @transform_1(%arg0: i32, %arg1: i32) -> (i32, i32) {
    %c1_i32 = arith.constant 1 : i32
    %0 = arith.muli %arg0, %c1_i32 : i32
    %1 = arith.addi %0, %arg1 : i32
    %c0_i32 = arith.constant 0 : i32
    %c0_i32_0 = arith.constant 0 : i32
    return %1, %c0_i32 : i32, i32
  }
  func.func @transform_2(%arg0: i32, %arg1: i32) -> (i32, i32, i32) {
    %c0_i32 = arith.constant 0 : i32
    %c0_i32_0 = arith.constant 0 : i32
    %c0_i32_1 = arith.constant 0 : i32
    return %arg0, %c0_i32, %c0_i32_0 : i32, i32, i32
  }
}

module attributes {stable_mosaic.version = 11 : i64} {
  func.func @_fc_combine_kernel(%arg0: memref<2x2x256xf32, #tpu.memory_space<vmem>>, %arg1: memref<1x256xf32, #tpu.memory_space<vmem>>, %arg2: memref<256x768xbf16, #tpu.memory_space<vmem>>, %arg3: memref<1x768xf32, #tpu.memory_space<vmem>>, %arg4: memref<2x768xf32, #tpu.memory_space<vmem>>) attributes {dimension_semantics = [], scalar_prefetch = 0 : i64, scratch_operands = 0 : i64, tpu.core_type = #tpu.core_type<tc>} {
    %c0 = arith.constant 0 : index
    %c0_0 = arith.constant 0 : index
    %c0_1 = arith.constant 0 : index
    %0 = vector.load %arg0[%c0, %c0_0, %c0_1] : memref<2x2x256xf32, #tpu.memory_space<vmem>>, vector<2x2x256xf32>
    %cst = arith.constant dense<0.000000e+00> : vector<2x256xf32>
    %1 = vector.multi_reduction <add>, %0, %cst [0] : vector<2x2x256xf32> to vector<2x256xf32>
    %c0_2 = arith.constant 0 : index
    %c0_3 = arith.constant 0 : index
    %2 = vector.load %arg1[%c0_2, %c0_3] : memref<1x256xf32, #tpu.memory_space<vmem>>, vector<1x256xf32>
    %3 = vector.broadcast %2 : vector<1x256xf32> to vector<2x256xf32>
    %4 = arith.addf %1, %3 : vector<2x256xf32>
    %cst_4 = arith.constant 0.000000e+00 : f32
    %5 = vector.broadcast %cst_4 : f32 to vector<2x256xf32>
    %6 = arith.maximumf %4, %5 : vector<2x256xf32>
    %7 = arith.truncf %6 : vector<2x256xf32> to vector<2x256xbf16>
    %c0_5 = arith.constant 0 : index
    %c0_6 = arith.constant 0 : index
    %8 = vector.load %arg2[%c0_5, %c0_6] : memref<256x768xbf16, #tpu.memory_space<vmem>>, vector<256x768xbf16>
    %cst_7 = arith.constant dense<0.000000e+00> : vector<2x768xf32>
    %9 = tpu.matmul %7, %8, %cst_7 {dimension_numbers = #tpu.dot_dimension_numbers<[1], [0], [0], [1], [0, 0, 1, 1], [], []>} : vector<2x256xbf16>, vector<256x768xbf16>, vector<2x768xf32> -> vector<2x768xf32>
    %c0_8 = arith.constant 0 : index
    %c0_9 = arith.constant 0 : index
    %10 = vector.load %arg3[%c0_8, %c0_9] : memref<1x768xf32, #tpu.memory_space<vmem>>, vector<1x768xf32>
    %11 = vector.broadcast %10 : vector<1x768xf32> to vector<2x768xf32>
    %12 = arith.addf %9, %11 : vector<2x768xf32>
    %c0_10 = arith.constant 0 : index
    %c0_11 = arith.constant 0 : index
    %13 = vector.load %arg4[%c0_10, %c0_11] : memref<2x768xf32, #tpu.memory_space<vmem>>, vector<2x768xf32>
    tpu.vector_store %arg4[%c0_10, %c0_11], %12 {strides = array<i32>} : memref<2x768xf32, #tpu.memory_space<vmem>>, vector<2x768xf32>,
    return
  }
}

</mosaic_0001>

<bundles_post_ra>
// kernel: wzrynet_forward.4
= control target key start
LH: loop header
LB: loop body
LE: loop exit
PB: predicated region body
PF: predicated region fallthrough
CT: control target
= control target key end

     0   :  { %v1636_v0 = vmov 0   ;;  %vm433_vm0 = vcmask 523264   ;;  %s2066_s1 = inlined_call_operand.vmem [shape: bf16[192,128], index: 1, kind: input, shape index: {}]   ;;  %s2067_s0 = inlined_call_operand.vmem [shape: bf16[450,192], index: 0, kind: input, shape index: {}]   ;;  %s2068_s2 = inlined_call_operand.vmem [shape: f32[1,128], index: 2, kind: input, shape index: {}]   ;;  %s2069_s3 = inlined_call_operand.vmem [shape: bf16[450,128], index: 3, kind: output, shape index: {}]  }
   0x1   :  { %521 = vmatprep.subr.bf16.mxu0 %v1636_v0  ;;  %v1538_v1 = vld [vmem:[%s2066_s1 + $0x38] sm:$0xff]   ;;  %1513 = vmatprep.subr.bf16.mxu1 %v1636_v0  ;;  %v1539_v2 = vld [vmem:[%s2066_s1 + $0x30] sm:$0xff]   ;;  %v1540_v3 = vld [vmem:[%s2066_s1 + $0x28] sm:$0xff]  }
   0x2   :  { %522 = vmatpush1.bf16.msra.mxu0 %v1538_v1  ;;  %1525 = vmatpush1.bf16.msra.mxu1 %v1538_v1  ;;  %v1541_v4 = vld [vmem:[%s2066_s1 + $0x20] sm:$0xff]   ;;  %v1542_v6 = vld [vmem:[%s2066_s1 + $0x18] sm:$0xff]   ;;  %v1543_v8 = vld [vmem:[%s2066_s1 + $0x10] sm:$0xff]  }
   0x3   :  { %523 = vmatprep.subr.bf16.mxu0 %v1636_v0  ;;  %1514 = vmatprep.subr.bf16.mxu1 %v1636_v0  ;;  %v1552_v5 = vld [vmem:[%s2067_s0 + $0x4] ss:$8 sps:$4 sm:$0xff]   ;;  %v1555_v7 = vld [vmem:[%s2067_s0 + $0xf4] ss:$8 sps:$4 sm:$0xff]   ;;  %v1550_v15 = vld [vmem:[%s2067_s0] ss:$8 sps:$4 sm:$0xff]  }
   0x4   :  { %1203 = vmatprep.mubr.msk.bf16.mxu0 %vm433_vm0, %v1552_v5  ;;  %1218 = vmatprep.mubr.msk.bf16.mxu1 %vm433_vm0, %v1555_v7  ;;  %v1544_v9 = vld [vmem:[%s2066_s1 + $0x8] sm:$0xff]   ;;  %v1545_v10 = vld [vmem:[%s2066_s1] sm:$0xff]   ;;  %v1546_v11 = vld [vmem:[%s2066_s1 + $0x58] sm:$0xff]  }
   0x5   :  { %v1547_v12 = vld [vmem:[%s2066_s1 + $0x50] sm:$0xff]   ;;  %v1548_v13 = vld [vmem:[%s2066_s1 + $0x48] sm:$0xff]   ;;  %v1549_v14 = vld [vmem:[%s2066_s1 + $0x40] sm:$0xff]  }
   0x6   :  { %524 = vmatpush1.bf16.msra.mxu0 %v1539_v2  ;;  %1526 = vmatpush1.bf16.msra.mxu1 %v1539_v2  ;;  %v1553_v16 = vld [vmem:[%s2067_s0 + $0xf0] ss:$8 sps:$4 sm:$0xff]   ;;  %v1556_v17 = vld [vmem:[%s2067_s0 + $0x14] ss:$8 sps:$4 sm:$0xff]   ;;  %v1559_v18 = vld [vmem:[%s2067_s0 + $0x104] ss:$8 sps:$4 sm:$0xff]  }
   0x7   :  { %525 = vmatprep.subr.bf16.mxu0 %v1636_v0  ;;  %1515 = vmatprep.subr.bf16.mxu1 %v1636_v0  ;;  %v1558_v19 = vld [vmem:[%s2067_s0 + $0x10] ss:$8 sps:$4 sm:$0xff]   ;;  %v1561_v20 = vld [vmem:[%s2067_s0 + $0x100] ss:$8 sps:$4 sm:$0xff]   ;;  %v1562_v21 = vld [vmem:[%s2067_s0 + $0x24] ss:$8 sps:$4 sm:$0xff]  }
   0x8   :  { %v1565_v22 = vld [vmem:[%s2067_s0 + $0x114] ss:$8 sps:$4 sm:$0xff]   ;;  %v1564_v23 = vld [vmem:[%s2067_s0 + $0x20] ss:$8 sps:$4 sm:$0xff]   ;;  %v1567_v24 = vld [vmem:[%s2067_s0 + $0x110] ss:$8 sps:$4 sm:$0xff]  }
   0x9   :  { %v1568_v25 = vld [vmem:[%s2067_s0 + $0x34] ss:$8 sps:$4 sm:$0xff]   ;;  %v1571_v26 = vld [vmem:[%s2067_s0 + $0x124] ss:$8 sps:$4 sm:$0xff]   ;;  %v1570_v27 = vld [vmem:[%s2067_s0 + $0x30] ss:$8 sps:$4 sm:$0xff]  }
   0xa   :  { %526 = vmatpush1.bf16.msra.mxu0 %v1540_v3  ;;  %1527 = vmatpush1.bf16.msra.mxu1 %v1540_v3  ;;  %v1573_v28 = vld [vmem:[%s2067_s0 + $0x120] ss:$8 sps:$4 sm:$0xff]   ;;  %v1574_v29 = vld [vmem:[%s2067_s0 + $0x44] ss:$8 sps:$4 sm:$0xff]   ;;  %v1577_v30 = vld [vmem:[%s2067_s0 + $0x134] ss:$8 sps:$4 sm:$0xff]  }
   0xb   :  { %527 = vmatprep.subr.bf16.mxu0 %v1636_v0  ;;  %1516 = vmatprep.subr.bf16.mxu1 %v1636_v0  ;;  %v1576_v31 = vld [vmem:[%s2067_s0 + $0x40] ss:$8 sps:$4 sm:$0xff]   ;;  %v1579_v32 = vld [vmem:[%s2067_s0 + $0x130] ss:$8 sps:$4 sm:$0xff]   ;;  %v1580_v33 = vld [vmem:[%s2067_s0 + $0x54] ss:$8 sps:$4 sm:$0xff]  }
   0xc   :  { %v1583_v34 = vld [vmem:[%s2067_s0 + $0x144] ss:$8 sps:$4 sm:$0xff]   ;;  %v1582_v35 = vld [vmem:[%s2067_s0 + $0x50] ss:$8 sps:$4 sm:$0xff]   ;;  %v1585_v36 = vld [vmem:[%s2067_s0 + $0x140] ss:$8 sps:$4 sm:$0xff]  }
   0xd   :  { %v1586_v37 = vld [vmem:[%s2067_s0 + $0x64] ss:$8 sps:$4 sm:$0xff]   ;;  %v1589_v38 = vld [vmem:[%s2067_s0 + $0x154] ss:$8 sps:$4 sm:$0xff]   ;;  %v1588_v39 = vld [vmem:[%s2067_s0 + $0x60] ss:$8 sps:$4 sm:$0xff]  }
   0xe   :  { %528 = vmatpush1.bf16.msra.mxu0 %v1541_v4  ;;  %1528 = vmatpush1.bf16.msra.mxu1 %v1541_v4  ;;  %v1591_v40 = vld [vmem:[%s2067_s0 + $0x150] ss:$8 sps:$4 sm:$0xff]   ;;  %v1592_v41 = vld [vmem:[%s2067_s0 + $0x74] ss:$8 sps:$4 sm:$0xff]   ;;  %v1595_v42 = vld [vmem:[%s2067_s0 + $0x164] ss:$8 sps:$4 sm:$0xff]  }
   0xf   :  { %529 = vmatprep.subr.bf16.mxu0 %v1636_v0  ;;  %1517 = vmatprep.subr.bf16.mxu1 %v1636_v0  ;;  %v1594_v43 = vld [vmem:[%s2067_s0 + $0x70] ss:$8 sps:$4 sm:$0xff]   ;;  %v1597_v44 = vld [vmem:[%s2067_s0 + $0x160] ss:$8 sps:$4 sm:$0xff]   ;;  %v1598_v45 = vld [vmem:[%s2067_s0 + $0x84] ss:$8 sps:$4 sm:$0xff]  }
  0x10   :  { %v1601_v46 = vld [vmem:[%s2067_s0 + $0x174] ss:$8 sps:$4 sm:$0xff]   ;;  %v1600_v47 = vld [vmem:[%s2067_s0 + $0x80] ss:$8 sps:$4 sm:$0xff]   ;;  %v1603_v48 = vld [vmem:[%s2067_s0 + $0x170] ss:$8 sps:$4 sm:$0xff]  }
  0x11   :  { %v1604_v49 = vld [vmem:[%s2067_s0 + $0x94] ss:$8 sps:$4 sm:$0xff]   ;;  %v1607_v50 = vld [vmem:[%s2067_s0 + $0x184] ss:$8 sps:$4 sm:$0xff]   ;;  %v1606_v51 = vld [vmem:[%s2067_s0 + $0x90] ss:$8 sps:$4 sm:$0xff]  }
  0x12   :  { %530 = vmatpush1.bf16.msra.mxu0 %v1542_v6  ;;  %1529 = vmatpush1.bf16.msra.mxu1 %v1542_v6  ;;  %v1609_v52 = vld [vmem:[%s2067_s0 + $0x180] ss:$8 sps:$4 sm:$0xff]   ;;  %v1610_v53 = vld [vmem:[%s2067_s0 + $0xa4] ss:$8 sps:$4 sm:$0xff]   ;;  %v1613_v54 = vld [vmem:[%s2067_s0 + $0x194] ss:$8 sps:$4 sm:$0xff]  }
  0x13   :  { %531 = vmatprep.subr.bf16.mxu0 %v1636_v0  ;;  %1518 = vmatprep.subr.bf16.mxu1 %v1636_v0  ;;  %v1612_v55 = vld [vmem:[%s2067_s0 + $0xa0] ss:$8 sps:$4 sm:$0xff]   ;;  %v1615_v56 = vld [vmem:[%s2067_s0 + $0x190] ss:$8 sps:$4 sm:$0xff]   ;;  %v1616_v57 = vld [vmem:[%s2067_s0 + $0xb4] ss:$8 sps:$4 sm:$0xff]  }
  0x14   :  { %v1619_v58 = vld [vmem:[%s2067_s0 + $0x1a4] ss:$8 sps:$4 sm:$0xff]   ;;  %v1618_v59 = vld [vmem:[%s2067_s0 + $0xb0] ss:$8 sps:$4 sm:$0xff]   ;;  %v1621_v60 = vld [vmem:[%s2067_s0 + $0x1a0] ss:$8 sps:$4 sm:$0xff]  }
  0x15   :  { %v1622_v61 = vld [vmem:[%s2067_s0 + $0xc4] ss:$8 sps:$4 sm:$0xff]   ;;  %v1625_v62 = vld [vmem:[%s2067_s0 + $0x1b4] ss:$8 sps:$4 sm:$0xff]   ;;  %v1627_v1 = vld [vmem:[%s2067_s0 + $0x1b0] ss:$8 sps:$4 sm:$0xff]  }
  0x16   :  { %532 = vmatpush1.bf16.msra.mxu0 %v1543_v8  ;;  %1530 = vmatpush1.bf16.msra.mxu1 %v1543_v8  ;;  %v71_v63 = vld [vmem:[%s2067_s0 + $0x1c0] sm:$0x11]  ;;  %v1628_v2 = vld [vmem:[%s2067_s0 + $0xd4] ss:$8 sps:$4 sm:$0xff]   ;;  %v1630_v4 = vld [vmem:[%s2067_s0 + $0xd0] ss:$8 sps:$4 sm:$0xff]  }
  0x17   :  { %533 = vmatprep.subr.bf16.mxu0 %v1636_v0  ;;  %1519 = vmatprep.subr.bf16.mxu1 %v1636_v0  ;;  %v1190_v3 = vcombine.high %v71_v63, %v71_v63  ;;  %v1189_v5 = vcombine.low %v71_v63, %v71_v63  ;;  %v1633_v6 = vld [vmem:[%s2067_s0 + $0xe4] ss:$8 sps:$4 sm:$0xff]   ;;  %v1635_v7 = vld [vmem:[%s2067_s0 + $0xe0] ss:$8 sps:$4 sm:$0xff]  }
  0x18   :  { %v1920_v8 = vld [vmem:[%s2068_s2] ss:$0 sm:$0xff] }
  0x1a   :  { %534 = vmatpush1.bf16.msra.mxu0 %v1544_v9  ;;  %1531 = vmatpush1.bf16.msra.mxu1 %v1544_v9 }
  0x1b   :  { %535 = vmatprep.subr.bf16.mxu0 %v1636_v0  ;;  %1520 = vmatprep.subr.bf16.mxu1 %v1636_v0 }
  0x1e   :  { %536 = vmatpush1.bf16.msra.mxu0 %v1545_v10  ;;  %1532 = vmatpush1.bf16.msra.mxu1 %v1545_v10 }
  0x1f   :  { %545 = vmatprep.subr.bf16.mxu0 %v1636_v0  ;;  %1521 = vmatprep.subr.bf16.mxu1 %v1636_v0 }
  0x22   :  { %546 = vmatpush2.bf16.msra.mxu0 %v1546_v11  ;;  %1533 = vmatpush2.bf16.msra.mxu1 %v1546_v11 }
  0x23   :  { %547 = vmatprep.subr.bf16.mxu0 %v1636_v0  ;;  %1522 = vmatprep.subr.bf16.mxu1 %v1636_v0 }
  0x26   :  { %548 = vmatpush2.bf16.msra.mxu0 %v1547_v12  ;;  %1534 = vmatpush2.bf16.msra.mxu1 %v1547_v12 }
  0x27   :  { %549 = vmatprep.subr.bf16.mxu0 %v1636_v0  ;;  %1523 = vmatprep.subr.bf16.mxu1 %v1636_v0 }
  0x2a   :  { %550 = vmatpush2.bf16.msra.mxu0 %v1548_v13  ;;  %1535 = vmatpush2.bf16.msra.mxu1 %v1548_v13 }
  0x2b   :  { %551 = vmatprep.subr.bf16.mxu0 %v1636_v0  ;;  %1524 = vmatprep.subr.bf16.mxu1 %v1636_v0  ;;  %v1624_v0 = vld [vmem:[%s2067_s0 + $0xc0] ss:$8 sps:$4 sm:$0xff]  }
  0x2e   :  { %552 = vmatpush2.bf16.msra.mxu0 %v1549_v14  ;;  %1536 = vmatpush2.bf16.msra.mxu1 %v1549_v14 }
  0x31   :  { %554 = vmatmul.mubr.bf16.vlgmr.msra.gmra.mxu0 %v1550_v15  ;;  %674 = vmatmul.mubr.bf16.vlgmr.msra.gmra.mxu1 %v1553_v16 }
  0x32   :  { %1204 = vmatprep.mubr.msk.bf16.mxu0 %vm433_vm0, %v1556_v17  ;;  %1219 = vmatprep.mubr.msk.bf16.mxu1 %vm433_vm0, %v1559_v18 }
  0x39   :  { %562 = vmatmul.mubr.bf16.gmra.mxu0 %v1558_v19  ;;  %682 = vmatmul.mubr.bf16.gmra.mxu1 %v1561_v20 }
  0x3a   :  { %1205 = vmatprep.mubr.msk.bf16.mxu0 %vm433_vm0, %v1562_v21  ;;  %1220 = vmatprep.mubr.msk.bf16.mxu1 %vm433_vm0, %v1565_v22 }
  0x41   :  { %570 = vmatmul.mubr.bf16.gmra.mxu0 %v1564_v23  ;;  %690 = vmatmul.mubr.bf16.gmra.mxu1 %v1567_v24 }
  0x42   :  { %1206 = vmatprep.mubr.msk.bf16.mxu0 %vm433_vm0, %v1568_v25  ;;  %1221 = vmatprep.mubr.msk.bf16.mxu1 %vm433_vm0, %v1571_v26 }
  0x49   :  { %578 = vmatmul.mubr.bf16.gmra.mxu0 %v1570_v27  ;;  %698 = vmatmul.mubr.bf16.gmra.mxu1 %v1573_v28 }
  0x4a   :  { %1207 = vmatprep.mubr.msk.bf16.mxu0 %vm433_vm0, %v1574_v29  ;;  %1222 = vmatprep.mubr.msk.bf16.mxu1 %vm433_vm0, %v1577_v30 }
  0x51   :  { %586 = vmatmul.mubr.bf16.gmra.mxu0 %v1576_v31  ;;  %706 = vmatmul.mubr.bf16.gmra.mxu1 %v1579_v32 }
  0x52   :  { %1208 = vmatprep.mubr.msk.bf16.mxu0 %vm433_vm0, %v1580_v33  ;;  %1223 = vmatprep.mubr.msk.bf16.mxu1 %vm433_vm0, %v1583_v34 }
  0x59   :  { %594 = vmatmul.mubr.bf16.gmra.mxu0 %v1582_v35  ;;  %714 = vmatmul.mubr.bf16.gmra.mxu1 %v1585_v36 }
  0x5a   :  { %1209 = vmatprep.mubr.msk.bf16.mxu0 %vm433_vm0, %v1586_v37  ;;  %1224 = vmatprep.mubr.msk.bf16.mxu1 %vm433_vm0, %v1589_v38 }
  0x61   :  { %602 = vmatmul.mubr.bf16.gmra.mxu0 %v1588_v39  ;;  %722 = vmatmul.mubr.bf16.gmra.mxu1 %v1591_v40 }
  0x62   :  { %1210 = vmatprep.mubr.msk.bf16.mxu0 %vm433_vm0, %v1592_v41  ;;  %1225 = vmatprep.mubr.msk.bf16.mxu1 %vm433_vm0, %v1595_v42 }
  0x69   :  { %610 = vmatmul.mubr.bf16.gmra.mxu0 %v1594_v43  ;;  %730 = vmatmul.mubr.bf16.gmra.mxu1 %v1597_v44 }
  0x6a   :  { %1211 = vmatprep.mubr.msk.bf16.mxu0 %vm433_vm0, %v1598_v45  ;;  %1226 = vmatprep.mubr.msk.bf16.mxu1 %vm433_vm0, %v1601_v46 }
  0x71   :  { %618 = vmatmul.mubr.bf16.gmra.mxu0 %v1600_v47  ;;  %738 = vmatmul.mubr.bf16.gmra.mxu1 %v1603_v48 }
  0x72   :  { %1212 = vmatprep.mubr.msk.bf16.mxu0 %vm433_vm0, %v1604_v49  ;;  %1227 = vmatprep.mubr.msk.bf16.mxu1 %vm433_vm0, %v1607_v50 }
  0x79   :  { %626 = vmatmul.mubr.bf16.gmra.mxu0 %v1606_v51  ;;  %746 = vmatmul.mubr.bf16.gmra.mxu1 %v1609_v52 }
  0x7a   :  { %1213 = vmatprep.mubr.msk.bf16.mxu0 %vm433_vm0, %v1610_v53  ;;  %1228 = vmatprep.mubr.msk.bf16.mxu1 %vm433_vm0, %v1613_v54 }
  0x81   :  { %634 = vmatmul.mubr.bf16.gmra.mxu0 %v1612_v55  ;;  %754 = vmatmul.mubr.bf16.gmra.mxu1 %v1615_v56 }
  0x82   :  { %1214 = vmatprep.mubr.msk.bf16.mxu0 %vm433_vm0, %v1616_v57  ;;  %1229 = vmatprep.mubr.msk.bf16.mxu1 %vm433_vm0, %v1619_v58 }
  0x89   :  { %642 = vmatmul.mubr.bf16.gmra.mxu0 %v1618_v59  ;;  %762 = vmatmul.mubr.bf16.gmra.mxu1 %v1621_v60 }
  0x8a   :  { %1215 = vmatprep.mubr.msk.bf16.mxu0 %vm433_vm0, %v1622_v61  ;;  %1230 = vmatprep.mubr.msk.bf16.mxu1 %vm433_vm0, %v1625_v62 }
  0x91   :  { %650 = vmatmul.mubr.bf16.gmra.mxu0 %v1624_v0  ;;  %770 = vmatmul.mubr.bf16.gmra.mxu1 %v1627_v1 }
  0x92   :  { %1216 = vmatprep.mubr.msk.bf16.mxu0 %vm433_vm0, %v1628_v2  ;;  %1231 = vmatprep.mubr.msk.bf16.mxu1 %vm433_vm0, %v1190_v3 }
  0x99   :  { %658 = vmatmul.mubr.bf16.gmra.mxu0 %v1630_v4  ;;  %778 = vmatmul.mubr.bf16.gmra.mxu1 %v1189_v5 }
  0x9a   :  { %1217 = vmatprep.mubr.msk.bf16.mxu0 %vm433_vm0, %v1633_v6 }
  0xa1   :  { %666 = vmatmul.mubr.bf16.gmra.mxu0 %v1635_v7 }
  0xf1   :  { %v555_v9 = vpop.f32.mrf.mxu0  ;;  %v675_v10 = vpop.f32.mrf.mxu1 }
  0xf2   :  { %v676_v11 = vadd.f32 %v1920_v8, %v675_v10  ;;  %v556_v14 = vadd.f32 %v1920_v8, %v555_v9 }
  0xf3   :  { %v557_v12 = vpop.f32.mrf.mxu0  ;;  %v677_v13 = vpop.f32.mrf.mxu1 }
  0xf4   :  { %v815_v18 = vmax.f32 %v676_v11, 0.0  ;;  %v785_v22 = vmax.f32 %v556_v14, 0.0 }
  0xf5   :  { %v558_v15 = vpop.f32.mrf.mxu0  ;;  %v678_v16 = vpop.f32.mrf.mxu1 }
  0xf6   :  { %v559_v17 = vadd.f32 %v1920_v8, %v558_v15  ;;  %v679_v19 = vadd.f32 %v1920_v8, %v678_v16 }
  0xf7   :  { %v560_v20 = vpop.f32.mrf.mxu0  ;;  %v680_v21 = vpop.f32.mrf.mxu1 }
  0xf8   :  { %v786_v23 = vmax.f32 %v559_v17, 0.0  ;;  %v816_v24 = vmax.f32 %v679_v19, 0.0 }
  0xf9   :  { %v563_v25 = vpop.f32.mrf.mxu0  ;;  %v683_v26 = vpop.f32.mrf.mxu1 }
  0xfa   :  { %v1349_v27 = vpack.c.bf16 %v786_v23, %v785_v22  ;;  %v1424_v28 = vpack.c.bf16 %v816_v24, %v815_v18  ;;  %v684_v29 = vadd.f32 %v1920_v8, %v683_v26  ;;  %v564_v32 = vadd.f32 %v1920_v8, %v563_v25 }
  0xfb   :  { %v565_v30 = vpop.f32.mrf.mxu0  ;;  %v685_v31 = vpop.f32.mrf.mxu1 }
  0xfc   :  { %1350 = vst [vmem:[%s2069_s3] sm:$0xff] %v1349_v27   ;;  %1500 = vst [vmem:[%s2069_s3 + $0x78] sm:$0xff] %v1424_v28   ;;  %v817_v36 = vmax.f32 %v684_v29, 0.0  ;;  %v787_v40 = vmax.f32 %v564_v32, 0.0 }
  0xfd   :  { %v566_v33 = vpop.f32.mrf.mxu0  ;;  %v686_v34 = vpop.f32.mrf.mxu1 }
  0xfe   :  { %v567_v35 = vadd.f32 %v1920_v8, %v566_v33  ;;  %v687_v37 = vadd.f32 %v1920_v8, %v686_v34 }
  0xff   :  { %v568_v38 = vpop.f32.mrf.mxu0  ;;  %v688_v39 = vpop.f32.mrf.mxu1 }
 0x100   :  { %v788_v41 = vmax.f32 %v567_v35, 0.0  ;;  %v818_v42 = vmax.f32 %v687_v37, 0.0 }
 0x101   :  { %v571_v43 = vpop.f32.mrf.mxu0  ;;  %v691_v44 = vpop.f32.mrf.mxu1 }
 0x102   :  { %v1354_v45 = vpack.c.bf16 %v788_v41, %v787_v40  ;;  %v1429_v46 = vpack.c.bf16 %v818_v42, %v817_v36  ;;  %v692_v47 = vadd.f32 %v1920_v8, %v691_v44  ;;  %v572_v50 = vadd.f32 %v1920_v8, %v571_v43 }
 0x103   :  { %v573_v48 = vpop.f32.mrf.mxu0  ;;  %v693_v49 = vpop.f32.mrf.mxu1 }
 0x104   :  { %1486 = vst [vmem:[%s2069_s3 + $0x8] sm:$0xff] %v1354_v45   ;;  %1501 = vst [vmem:[%s2069_s3 + $0x80] sm:$0xff] %v1429_v46   ;;  %v819_v54 = vmax.f32 %v692_v47, 0.0  ;;  %v789_v58 = vmax.f32 %v572_v50, 0.0 }
 0x105   :  { %v574_v51 = vpop.f32.mrf.mxu0  ;;  %v694_v52 = vpop.f32.mrf.mxu1 }
 0x106   :  { %v575_v53 = vadd.f32 %v1920_v8, %v574_v51  ;;  %v695_v55 = vadd.f32 %v1920_v8, %v694_v52 }
 0x107   :  { %v576_v56 = vpop.f32.mrf.mxu0  ;;  %v696_v57 = vpop.f32.mrf.mxu1 }
 0x108   :  { %v790_v59 = vmax.f32 %v575_v53, 0.0  ;;  %v820_v60 = vmax.f32 %v695_v55, 0.0 }
 0x109   :  { %v579_v61 = vpop.f32.mrf.mxu0  ;;  %v699_v62 = vpop.f32.mrf.mxu1 }
 0x10a   :  { %v1359_v63 = vpack.c.bf16 %v790_v59, %v789_v58  ;;  %v1434_v0 = vpack.c.bf16 %v820_v60, %v819_v54  ;;  %v700_v1 = vadd.f32 %v1920_v8, %v699_v62  ;;  %v580_v4 = vadd.f32 %v1920_v8, %v579_v61 }
 0x10b   :  { %v581_v2 = vpop.f32.mrf.mxu0  ;;  %v701_v3 = vpop.f32.mrf.mxu1 }
 0x10c   :  { %1487 = vst [vmem:[%s2069_s3 + $0x10] sm:$0xff] %v1359_v63   ;;  %1502 = vst [vmem:[%s2069_s3 + $0x88] sm:$0xff] %v1434_v0   ;;  %v821_v9 = vmax.f32 %v700_v1, 0.0  ;;  %v791_v13 = vmax.f32 %v580_v4, 0.0 }
 0x10d   :  { %v582_v5 = vpop.f32.mrf.mxu0  ;;  %v702_v6 = vpop.f32.mrf.mxu1 }
 0x10e   :  { %v583_v7 = vadd.f32 %v1920_v8, %v582_v5  ;;  %v703_v10 = vadd.f32 %v1920_v8, %v702_v6 }
 0x10f   :  { %v584_v11 = vpop.f32.mrf.mxu0  ;;  %v704_v12 = vpop.f32.mrf.mxu1 }
 0x110   :  { %v792_v14 = vmax.f32 %v583_v7, 0.0  ;;  %v822_v15 = vmax.f32 %v703_v10, 0.0 }
 0x111   :  { %v587_v16 = vpop.f32.mrf.mxu0  ;;  %v707_v17 = vpop.f32.mrf.mxu1 }
 0x112   :  { %v1364_v18 = vpack.c.bf16 %v792_v14, %v791_v13  ;;  %v1439_v19 = vpack.c.bf16 %v822_v15, %v821_v9  ;;  %v708_v20 = vadd.f32 %v1920_v8, %v707_v17  ;;  %v588_v23 = vadd.f32 %v1920_v8, %v587_v16 }
 0x113   :  { %v589_v21 = vpop.f32.mrf.mxu0  ;;  %v709_v22 = vpop.f32.mrf.mxu1 }
 0x114   :  { %1488 = vst [vmem:[%s2069_s3 + $0x18] sm:$0xff] %v1364_v18   ;;  %1503 = vst [vmem:[%s2069_s3 + $0x90] sm:$0xff] %v1439_v19   ;;  %v823_v27 = vmax.f32 %v708_v20, 0.0  ;;  %v793_v31 = vmax.f32 %v588_v23, 0.0 }
 0x115   :  { %v590_v24 = vpop.f32.mrf.mxu0  ;;  %v710_v25 = vpop.f32.mrf.mxu1 }
 0x116   :  { %v591_v26 = vadd.f32 %v1920_v8, %v590_v24  ;;  %v711_v28 = vadd.f32 %v1920_v8, %v710_v25 }
 0x117   :  { %v592_v29 = vpop.f32.mrf.mxu0  ;;  %v712_v30 = vpop.f32.mrf.mxu1 }
 0x118   :  { %v794_v32 = vmax.f32 %v591_v26, 0.0  ;;  %v824_v33 = vmax.f32 %v711_v28, 0.0 }
 0x119   :  { %v595_v34 = vpop.f32.mrf.mxu0  ;;  %v715_v35 = vpop.f32.mrf.mxu1 }
 0x11a   :  { %v1369_v36 = vpack.c.bf16 %v794_v32, %v793_v31  ;;  %v1444_v37 = vpack.c.bf16 %v824_v33, %v823_v27  ;;  %v716_v38 = vadd.f32 %v1920_v8, %v715_v35  ;;  %v596_v41 = vadd.f32 %v1920_v8, %v595_v34 }
 0x11b   :  { %v597_v39 = vpop.f32.mrf.mxu0  ;;  %v717_v40 = vpop.f32.mrf.mxu1 }
 0x11c   :  { %1489 = vst [vmem:[%s2069_s3 + $0x20] sm:$0xff] %v1369_v36   ;;  %1504 = vst [vmem:[%s2069_s3 + $0x98] sm:$0xff] %v1444_v37   ;;  %v825_v45 = vmax.f32 %v716_v38, 0.0  ;;  %v795_v49 = vmax.f32 %v596_v41, 0.0 }
 0x11d   :  { %v598_v42 = vpop.f32.mrf.mxu0  ;;  %v718_v43 = vpop.f32.mrf.mxu1 }
 0x11e   :  { %v599_v44 = vadd.f32 %v1920_v8, %v598_v42  ;;  %v719_v46 = vadd.f32 %v1920_v8, %v718_v43 }
 0x11f   :  { %v600_v47 = vpop.f32.mrf.mxu0  ;;  %v720_v48 = vpop.f32.mrf.mxu1 }
 0x120   :  { %v796_v50 = vmax.f32 %v599_v44, 0.0  ;;  %v826_v51 = vmax.f32 %v719_v46, 0.0 }
 0x121   :  { %v603_v52 = vpop.f32.mrf.mxu0  ;;  %v723_v53 = vpop.f32.mrf.mxu1 }
 0x122   :  { %v1374_v54 = vpack.c.bf16 %v796_v50, %v795_v49  ;;  %v1449_v55 = vpack.c.bf16 %v826_v51, %v825_v45  ;;  %v724_v56 = vadd.f32 %v1920_v8, %v723_v53  ;;  %v604_v59 = vadd.f32 %v1920_v8, %v603_v52 }
 0x123   :  { %v605_v57 = vpop.f32.mrf.mxu0  ;;  %v725_v58 = vpop.f32.mrf.mxu1 }
 0x124   :  { %1490 = vst [vmem:[%s2069_s3 + $0x28] sm:$0xff] %v1374_v54   ;;  %1505 = vst [vmem:[%s2069_s3 + $0xa0] sm:$0xff] %v1449_v55   ;;  %v827_v63 = vmax.f32 %v724_v56, 0.0  ;;  %v797_v3 = vmax.f32 %v604_v59, 0.0 }
 0x125   :  { %v606_v60 = vpop.f32.mrf.mxu0  ;;  %v726_v61 = vpop.f32.mrf.mxu1 }
 0x126   :  { %v607_v62 = vadd.f32 %v1920_v8, %v606_v60  ;;  %v727_v0 = vadd.f32 %v1920_v8, %v726_v61 }
 0x127   :  { %v608_v1 = vpop.f32.mrf.mxu0  ;;  %v728_v2 = vpop.f32.mrf.mxu1 }
 0x128   :  { %v798_v4 = vmax.f32 %v607_v62, 0.0  ;;  %v828_v5 = vmax.f32 %v727_v0, 0.0 }
 0x129   :  { %v611_v6 = vpop.f32.mrf.mxu0  ;;  %v731_v7 = vpop.f32.mrf.mxu1 }
 0x12a   :  { %v1379_v9 = vpack.c.bf16 %v798_v4, %v797_v3  ;;  %v1454_v10 = vpack.c.bf16 %v828_v5, %v827_v63  ;;  %v732_v11 = vadd.f32 %v1920_v8, %v731_v7  ;;  %v612_v14 = vadd.f32 %v1920_v8, %v611_v6 }
 0x12b   :  { %v613_v12 = vpop.f32.mrf.mxu0  ;;  %v733_v13 = vpop.f32.mrf.mxu1 }
 0x12c   :  { %1491 = vst [vmem:[%s2069_s3 + $0x30] sm:$0xff] %v1379_v9   ;;  %1506 = vst [vmem:[%s2069_s3 + $0xa8] sm:$0xff] %v1454_v10   ;;  %v829_v18 = vmax.f32 %v732_v11, 0.0  ;;  %v799_v22 = vmax.f32 %v612_v14, 0.0 }
 0x12d   :  { %v614_v15 = vpop.f32.mrf.mxu0  ;;  %v734_v16 = vpop.f32.mrf.mxu1 }
 0x12e   :  { %v615_v17 = vadd.f32 %v1920_v8, %v614_v15  ;;  %v735_v19 = vadd.f32 %v1920_v8, %v734_v16 }
 0x12f   :  { %v616_v20 = vpop.f32.mrf.mxu0  ;;  %v736_v21 = vpop.f32.mrf.mxu1 }
 0x130   :  { %v800_v23 = vmax.f32 %v615_v17, 0.0  ;;  %v830_v24 = vmax.f32 %v735_v19, 0.0 }
 0x131   :  { %v619_v25 = vpop.f32.mrf.mxu0  ;;  %v739_v26 = vpop.f32.mrf.mxu1 }
 0x132   :  { %v1384_v27 = vpack.c.bf16 %v800_v23, %v799_v22  ;;  %v1459_v28 = vpack.c.bf16 %v830_v24, %v829_v18  ;;  %v740_v29 = vadd.f32 %v1920_v8, %v739_v26  ;;  %v620_v32 = vadd.f32 %v1920_v8, %v619_v25 }
 0x133   :  { %v621_v30 = vpop.f32.mrf.mxu0  ;;  %v741_v31 = vpop.f32.mrf.mxu1 }
 0x134   :  { %1492 = vst [vmem:[%s2069_s3 + $0x38] sm:$0xff] %v1384_v27   ;;  %1507 = vst [vmem:[%s2069_s3 + $0xb0] sm:$0xff] %v1459_v28   ;;  %v831_v36 = vmax.f32 %v740_v29, 0.0  ;;  %v801_v40 = vmax.f32 %v620_v32, 0.0 }
 0x135   :  { %v622_v33 = vpop.f32.mrf.mxu0  ;;  %v742_v34 = vpop.f32.mrf.mxu1 }
 0x136   :  { %v623_v35 = vadd.f32 %v1920_v8, %v622_v33  ;;  %v743_v37 = vadd.f32 %v1920_v8, %v742_v34 }
 0x137   :  { %v624_v38 = vpop.f32.mrf.mxu0  ;;  %v744_v39 = vpop.f32.mrf.mxu1 }
 0x138   :  { %v802_v41 = vmax.f32 %v623_v35, 0.0  ;;  %v832_v42 = vmax.f32 %v743_v37, 0.0 }
 0x139   :  { %v627_v43 = vpop.f32.mrf.mxu0  ;;  %v747_v44 = vpop.f32.mrf.mxu1 }
 0x13a   :  { %v1389_v45 = vpack.c.bf16 %v802_v41, %v801_v40  ;;  %v1464_v46 = vpack.c.bf16 %v832_v42, %v831_v36  ;;  %v748_v47 = vadd.f32 %v1920_v8, %v747_v44  ;;  %v628_v50 = vadd.f32 %v1920_v8, %v627_v43 }
 0x13b   :  { %v629_v48 = vpop.f32.mrf.mxu0  ;;  %v749_v49 = vpop.f32.mrf.mxu1 }
 0x13c   :  { %1493 = vst [vmem:[%s2069_s3 + $0x40] sm:$0xff] %v1389_v45   ;;  %1508 = vst [vmem:[%s2069_s3 + $0xb8] sm:$0xff] %v1464_v46   ;;  %v833_v54 = vmax.f32 %v748_v47, 0.0  ;;  %v803_v58 = vmax.f32 %v628_v50, 0.0 }
 0x13d   :  { %v630_v51 = vpop.f32.mrf.mxu0  ;;  %v750_v52 = vpop.f32.mrf.mxu1 }
 0x13e   :  { %v631_v53 = vadd.f32 %v1920_v8, %v630_v51  ;;  %v751_v55 = vadd.f32 %v1920_v8, %v750_v52 }
 0x13f   :  { %v632_v56 = vpop.f32.mrf.mxu0  ;;  %v752_v57 = vpop.f32.mrf.mxu1 }
 0x140   :  { %v804_v59 = vmax.f32 %v631_v53, 0.0  ;;  %v834_v60 = vmax.f32 %v751_v55, 0.0 }
 0x141   :  { %v635_v61 = vpop.f32.mrf.mxu0  ;;  %v755_v62 = vpop.f32.mrf.mxu1 }
 0x142   :  { %v1394_v63 = vpack.c.bf16 %v804_v59, %v803_v58  ;;  %v1469_v0 = vpack.c.bf16 %v834_v60, %v833_v54  ;;  %v756_v1 = vadd.f32 %v1920_v8, %v755_v62  ;;  %v636_v4 = vadd.f32 %v1920_v8, %v635_v61 }
 0x143   :  { %v637_v2 = vpop.f32.mrf.mxu0  ;;  %v757_v3 = vpop.f32.mrf.mxu1 }
 0x144   :  { %1494 = vst [vmem:[%s2069_s3 + $0x48] sm:$0xff] %v1394_v63   ;;  %1509 = vst [vmem:[%s2069_s3 + $0xc0] sm:$0xff] %v1469_v0   ;;  %v835_v9 = vmax.f32 %v756_v1, 0.0  ;;  %v805_v13 = vmax.f32 %v636_v4, 0.0 }
 0x145   :  { %v638_v5 = vpop.f32.mrf.mxu0  ;;  %v758_v6 = vpop.f32.mrf.mxu1 }
 0x146   :  { %v639_v7 = vadd.f32 %v1920_v8, %v638_v5  ;;  %v759_v10 = vadd.f32 %v1920_v8, %v758_v6 }
 0x147   :  { %v640_v11 = vpop.f32.mrf.mxu0  ;;  %v760_v12 = vpop.f32.mrf.mxu1 }
 0x148   :  { %v806_v14 = vmax.f32 %v639_v7, 0.0  ;;  %v836_v15 = vmax.f32 %v759_v10, 0.0 }
 0x149   :  { %v643_v16 = vpop.f32.mrf.mxu0  ;;  %v763_v17 = vpop.f32.mrf.mxu1 }
 0x14a   :  { %v1399_v18 = vpack.c.bf16 %v806_v14, %v805_v13  ;;  %v1474_v19 = vpack.c.bf16 %v836_v15, %v835_v9  ;;  %v764_v20 = vadd.f32 %v1920_v8, %v763_v17  ;;  %v644_v23 = vadd.f32 %v1920_v8, %v643_v16 }
 0x14b   :  { %v645_v21 = vpop.f32.mrf.mxu0  ;;  %v765_v22 = vpop.f32.mrf.mxu1 }
 0x14c   :  { %1495 = vst [vmem:[%s2069_s3 + $0x50] sm:$0xff] %v1399_v18   ;;  %1510 = vst [vmem:[%s2069_s3 + $0xc8] sm:$0xff] %v1474_v19   ;;  %v837_v27 = vmax.f32 %v764_v20, 0.0  ;;  %v807_v31 = vmax.f32 %v644_v23, 0.0 }
 0x14d   :  { %v646_v24 = vpop.f32.mrf.mxu0  ;;  %v766_v25 = vpop.f32.mrf.mxu1 }
 0x14e   :  { %v647_v26 = vadd.f32 %v1920_v8, %v646_v24  ;;  %v767_v28 = vadd.f32 %v1920_v8, %v766_v25 }
 0x14f   :  { %v648_v29 = vpop.f32.mrf.mxu0  ;;  %v768_v30 = vpop.f32.mrf.mxu1 }
 0x150   :  { %v808_v32 = vmax.f32 %v647_v26, 0.0  ;;  %v838_v33 = vmax.f32 %v767_v28, 0.0 }
 0x151   :  { %v651_v34 = vpop.f32.mrf.mxu0  ;;  %v771_v35 = vpop.f32.mrf.mxu1 }
 0x152   :  { %v1404_v36 = vpack.c.bf16 %v808_v32, %v807_v31  ;;  %v1479_v37 = vpack.c.bf16 %v838_v33, %v837_v27  ;;  %v772_v38 = vadd.f32 %v1920_v8, %v771_v35  ;;  %v652_v41 = vadd.f32 %v1920_v8, %v651_v34 }
 0x153   :  { %v653_v39 = vpop.f32.mrf.mxu0  ;;  %v773_v40 = vpop.f32.mrf.mxu1 }
 0x154   :  { %1496 = vst [vmem:[%s2069_s3 + $0x58] sm:$0xff] %v1404_v36   ;;  %1511 = vst [vmem:[%s2069_s3 + $0xd0] sm:$0xff] %v1479_v37   ;;  %v839_v45 = vmax.f32 %v772_v38, 0.0  ;;  %v809_v49 = vmax.f32 %v652_v41, 0.0 }
 0x155   :  { %v654_v42 = vpop.f32.mrf.mxu0  ;;  %v774_v43 = vpop.f32.mrf.mxu1 }
 0x156   :  { %v655_v44 = vadd.f32 %v1920_v8, %v654_v42  ;;  %v775_v46 = vadd.f32 %v1920_v8, %v774_v43 }
 0x157   :  { %v656_v47 = vpop.f32.mrf.mxu0  ;;  %v776_v48 = vpop.f32.mrf.mxu1 }
 0x158   :  { %v810_v50 = vmax.f32 %v655_v44, 0.0  ;;  %v840_v51 = vmax.f32 %v775_v46, 0.0 }
 0x159   :  { %v659_v52 = vpop.f32.mrf.mxu0  ;;  %v779_v53 = vpop.f32.mrf.mxu1 }
 0x15a   :  { %v1409_v54 = vpack.c.bf16 %v810_v50, %v809_v49  ;;  %v1484_v55 = vpack.c.bf16 %v840_v51, %v839_v45  ;;  %v780_v56 = vadd.f32 %v1920_v8, %v779_v53  ;;  %v660_v59 = vadd.f32 %v1920_v8, %v659_v52 }
 0x15b   :  { %v661_v57 = vpop.f32.mrf.mxu0  ;;  %v781_v58 = vpop.f32.mrf.mxu1 }
 0x15c   :  { %1497 = vst [vmem:[%s2069_s3 + $0x60] sm:$0xff] %v1409_v54   ;;  %1512 = vst [vmem:[%s2069_s3 + $0xd8] sm:$0xff] %v1484_v55   ;;  %v841_v60 = vmax.f32 %v780_v56, 0.0  ;;  %v811_v3 = vmax.f32 %v660_v59, 0.0 }
 0x15d   :  { %v662_v61 = vpop.f32.mrf.mxu0  ;;  %v782_v62 = vpop.f32.mrf.mxu1 }
 0x15e   :  { %v663_v63 = vadd.f32 %v1920_v8, %v662_v61  ;;  %v1345_v0 = vpack.c.bf16 %v841_v60, %v841_v60 }
 0x15f   :  { %v664_v1 = vpop.f32.mrf.mxu0  ;;  %v783_v2 = vpop.f32.mrf.mxu1 }
 0x160   :  { %v812_v4 = vmax.f32 %v663_v63, 0.0  ;;  %1127 = vst [vmem:[%s2069_s3 + $0xe0] sm:$0x1] %v1345_v0 }
 0x161   :  { %v667_v5 = vpop.f32.mrf.mxu0 }
 0x162   :  { %v1414_v6 = vpack.c.bf16 %v812_v4, %v811_v3  ;;  %v668_v9 = vadd.f32 %v1920_v8, %v667_v5 }
 0x163   :  { %v669_v7 = vpop.f32.mrf.mxu0 }
 0x164   :  { %1498 = vst [vmem:[%s2069_s3 + $0x68] sm:$0xff] %v1414_v6   ;;  %v813_v13 = vmax.f32 %v668_v9, 0.0 }
 0x165   :  { %v670_v10 = vpop.f32.mrf.mxu0 }
 0x166   :  { %v671_v11 = vadd.f32 %v1920_v8, %v670_v10 }
 0x167   :  { %v672_v12 = vpop.f32.mrf.mxu0 }
 0x168   :  { %v814_v14 = vmax.f32 %v671_v11, 0.0 }
 0x16a   :  { %v1419_v15 = vpack.c.bf16 %v814_v14, %v813_v13 }
 0x16c   :  { %1499 = vst [vmem:[%s2069_s3 + $0x70] sm:$0xff] %v1419_v15  }

// kernel: wzrynet_forward.5
= control target key start
LH: loop header
LB: loop body
LE: loop exit
PB: predicated region body
PF: predicated region fallthrough
CT: control target
= control target key end

     0   :  { %s1916_s1 = inlined_call_operand.vmem [shape: bf16[1024,128], index: 1, kind: input, shape index: {}]   ;;  %s1917_s0 = inlined_call_operand.vmem [shape: bf16[72,1024], index: 0, kind: input, shape index: {}]   ;;  %s1918_s2 = inlined_call_operand.vmem [shape: f32[1,128], index: 2, kind: input, shape index: {}]   ;;  %s1919_s3 = inlined_call_operand.vmem [shape: bf16[72,128], index: 3, kind: output, shape index: {}]  }
   0x1   :  { %v1435_v0 = vld [vmem:[%s1916_s1 + $0x78] sm:$0xff]   ;;  %v1439_v4 = vld [vmem:[%s1916_s1 + $0x70] sm:$0xff]   ;;  %v1443_v8 = vld [vmem:[%s1916_s1 + $0x68] sm:$0xff]  }
   0x2   :  { %v1436_v1 = vld [vmem:[%s1916_s1 + $0xf8] sm:$0xff]   ;;  %1251 = vmatprep.subr.bf16.mxu0 %v1435_v0  ;;  %v1440_v5 = vld [vmem:[%s1916_s1 + $0xf0] sm:$0xff]   ;;  %v1444_v9 = vld [vmem:[%s1916_s1 + $0xe8] sm:$0xff]  }
   0x3   :  { %v1437_v2 = vld [vmem:[%s1916_s1 + $0x38] sm:$0xff]   ;;  %1297 = vmatprep.subr.bf16.mxu1 %v1436_v1  ;;  %v1441_v6 = vld [vmem:[%s1916_s1 + $0x30] sm:$0xff]   ;;  %v1445_v10 = vld [vmem:[%s1916_s1 + $0x28] sm:$0xff]  }
   0x4   :  { %v1438_v3 = vld [vmem:[%s1916_s1 + $0xb8] sm:$0xff]   ;;  %1252 = vmatpush3.bf16.msra.mxu0 %v1437_v2  ;;  %v1442_v7 = vld [vmem:[%s1916_s1 + $0xb0] sm:$0xff]   ;;  %v1446_v11 = vld [vmem:[%s1916_s1 + $0xa8] sm:$0xff]  }
   0x5   :  { %1298 = vmatpush3.bf16.msra.mxu1 %v1438_v3  ;;  %1253 = vmatprep.subr.bf16.mxu0 %v1439_v4  ;;  %v1447_v12 = vld [vmem:[%s1916_s1 + $0x60] sm:$0xff]   ;;  %v1451_v16 = vld [vmem:[%s1916_s1 + $0x58] sm:$0xff]   ;;  %v1455_v20 = vld [vmem:[%s1916_s1 + $0x50] sm:$0xff]  }
   0x6   :  { %1299 = vmatprep.subr.bf16.mxu1 %v1440_v5  ;;  %v1448_v13 = vld [vmem:[%s1916_s1 + $0xe0] sm:$0xff]   ;;  %v1452_v17 = vld [vmem:[%s1916_s1 + $0xd8] sm:$0xff]   ;;  %v1456_v21 = vld [vmem:[%s1916_s1 + $0xd0] sm:$0xff]  }
   0x7   :  { %v1449_v14 = vld [vmem:[%s1916_s1 + $0x20] sm:$0xff]   ;;  %v1453_v18 = vld [vmem:[%s1916_s1 + $0x18] sm:$0xff]   ;;  %v1457_v22 = vld [vmem:[%s1916_s1 + $0x10] sm:$0xff]  }
   0x8   :  { %1254 = vmatpush3.bf16.msra.mxu0 %v1441_v6  ;;  %v1450_v15 = vld [vmem:[%s1916_s1 + $0xa0] sm:$0xff]   ;;  %v1454_v19 = vld [vmem:[%s1916_s1 + $0x98] sm:$0xff]   ;;  %v1458_v23 = vld [vmem:[%s1916_s1 + $0x90] sm:$0xff]  }
   0x9   :  { %1300 = vmatpush3.bf16.msra.mxu1 %v1442_v7  ;;  %1255 = vmatprep.subr.bf16.mxu0 %v1443_v8  ;;  %v1459_v24 = vld [vmem:[%s1916_s1 + $0x48] sm:$0xff]   ;;  %v1463_v28 = vld [vmem:[%s1916_s1 + $0x40] sm:$0xff]   ;;  %v1467_v40 = vld [vmem:[%s1916_s1 + $0x178] sm:$0xff]  }
   0xa   :  { %1301 = vmatprep.subr.bf16.mxu1 %v1444_v9  ;;  %v1460_v25 = vld [vmem:[%s1916_s1 + $0xc8] sm:$0xff]   ;;  %v1464_v29 = vld [vmem:[%s1916_s1 + $0xc0] sm:$0xff]   ;;  %v1468_v41 = vld [vmem:[%s1916_s1 + $0x138] sm:$0xff]  }
   0xb   :  { %v1461_v26 = vld [vmem:[%s1916_s1 + $0x8] sm:$0xff]   ;;  %v1465_v30 = vld [vmem:[%s1916_s1] sm:$0xff]   ;;  %v1469_v42 = vld [vmem:[%s1916_s1 + $0x1f8] sm:$0xff]  }
   0xc   :  { %1256 = vmatpush3.bf16.msra.mxu0 %v1445_v10  ;;  %v1462_v27 = vld [vmem:[%s1916_s1 + $0x88] sm:$0xff]   ;;  %v1466_v31 = vld [vmem:[%s1916_s1 + $0x80] sm:$0xff]   ;;  %v1470_v43 = vld [vmem:[%s1916_s1 + $0x1b8] sm:$0xff]  }
   0xd   :  { %1302 = vmatpush3.bf16.msra.mxu1 %v1446_v11  ;;  %1257 = vmatprep.subr.bf16.mxu0 %v1447_v12  ;;  %v15_v32 = vld [vmem:[%s1917_s0] sm:$0xff]  ;;  %v16_v34 = vld [vmem:[%s1917_s0 + $0x8] sm:$0xff]  ;;  %v1471_v44 = vld [vmem:[%s1916_s1 + $0x170] sm:$0xff]  }
   0xe   :  { %1303 = vmatprep.subr.bf16.mxu1 %v1448_v13  ;;  %v19_v33 = vld [vmem:[%s1917_s0 + $0x20] sm:$0xff]  ;;  %v20_v37 = vld [vmem:[%s1917_s0 + $0x28] sm:$0xff]  ;;  %v1472_v45 = vld [vmem:[%s1916_s1 + $0x130] sm:$0xff]  }
   0xf   :  { %v1106_v35 = vcombine.low %v15_v32, %v19_v33  ;;  %v1107_v36 = vcombine.high %v15_v32, %v19_v33  ;;  %v1108_v38 = vcombine.low %v16_v34, %v20_v37  ;;  %v1109_v39 = vcombine.high %v16_v34, %v20_v37  ;;  %v23_v46 = vld [vmem:[%s1917_s0 + $0x40] sm:$0xff]  ;;  %v24_v49 = vld [vmem:[%s1917_s0 + $0x48] sm:$0xff]  ;;  %v1473_v53 = vld [vmem:[%s1916_s1 + $0x1f0] sm:$0xff]  }
  0x10   :  { %1258 = vmatpush3.bf16.msra.mxu0 %v1449_v14  ;;  %v27_v47 = vld [vmem:[%s1917_s0 + $0x60] sm:$0xff]  ;;  %v28_v50 = vld [vmem:[%s1917_s0 + $0x68] sm:$0xff]  ;;  %v1474_v55 = vld [vmem:[%s1916_s1 + $0x1b0] sm:$0xff]  }
  0x11   :  { %1304 = vmatpush3.bf16.msra.mxu1 %v1450_v15  ;;  %1259 = vmatprep.subr.bf16.mxu0 %v1451_v16  ;;  %v1115_v48 = vcombine.high %v23_v46, %v27_v47  ;;  %v1114_v51 = vcombine.low %v23_v46, %v27_v47  ;;  %v1117_v52 = vcombine.high %v24_v49, %v28_v50  ;;  %v1475_v56 = vld [vmem:[%s1916_s1 + $0x168] sm:$0xff]   ;;  %v31_v60 = vld [vmem:[%s1917_s0 + $0x80] sm:$0xff]  ;;  %v1483_v8 = vld [vmem:[%s1916_s1 + $0x158] sm:$0xff]  }
  0x12   :  { %1305 = vmatprep.subr.bf16.mxu1 %v1452_v17  ;;  %790 = vmatprep.mubr.bf16.mxu0 %v1107_v36  ;;  %v1116_v54 = vcombine.low %v24_v49, %v28_v50  ;;  %v1476_v57 = vld [vmem:[%s1916_s1 + $0x128] sm:$0xff]   ;;  %v35_v61 = vld [vmem:[%s1917_s0 + $0xa0] sm:$0xff]  ;;  %v1484_v9 = vld [vmem:[%s1916_s1 + $0x118] sm:$0xff]  }
  0x13   :  { %862 = vmatprep.mubr.bf16.mxu1 %v1109_v39  ;;  %v1477_v58 = vld [vmem:[%s1916_s1 + $0x1e8] sm:$0xff]   ;;  %v1123_v0 = vcombine.high %v31_v60, %v35_v61  ;;  %v1479_v2 = vld [vmem:[%s1916_s1 + $0x160] sm:$0xff]   ;;  %v1122_v3 = vcombine.low %v31_v60, %v35_v61  ;;  %v1485_v10 = vld [vmem:[%s1916_s1 + $0x1d8] sm:$0xff]  }
  0x14   :  { %1260 = vmatpush3.bf16.msra.mxu0 %v1453_v18  ;;  %v1478_v59 = vld [vmem:[%s1916_s1 + $0x1a8] sm:$0xff]   ;;  %v1480_v5 = vld [vmem:[%s1916_s1 + $0x120] sm:$0xff]   ;;  %v1486_v18 = vld [vmem:[%s1916_s1 + $0x198] sm:$0xff]  }
  0x15   :  { %1306 = vmatpush3.bf16.msra.mxu1 %v1454_v19  ;;  %1261 = vmatprep.subr.bf16.mxu0 %v1455_v20  ;;  %v32_v62 = vld [vmem:[%s1917_s0 + $0x88] sm:$0xff]  ;;  %v1481_v6 = vld [vmem:[%s1916_s1 + $0x1e0] sm:$0xff]   ;;  %v1487_v20 = vld [vmem:[%s1916_s1 + $0x150] sm:$0xff]  }
  0x16   :  { %1307 = vmatprep.subr.bf16.mxu1 %v1456_v21  ;;  %v36_v63 = vld [vmem:[%s1917_s0 + $0xa8] sm:$0xff]  ;;  %v1482_v7 = vld [vmem:[%s1916_s1 + $0x1a0] sm:$0xff]   ;;  %v1488_v21 = vld [vmem:[%s1916_s1 + $0x110] sm:$0xff]  }
  0x17   :  { %v1125_v1 = vcombine.high %v32_v62, %v36_v63  ;;  %v1124_v4 = vcombine.low %v32_v62, %v36_v63  ;;  %v39_v11 = vld [vmem:[%s1917_s0 + $0xc0] sm:$0xff]  ;;  %v40_v13 = vld [vmem:[%s1917_s0 + $0xc8] sm:$0xff]  ;;  %v21_v39 = vld [vmem:[%s1917_s0 + $0x30] sm:$0xff] }
  0x18   :  { %1262 = vmatpush3.bf16.msra.mxu0 %v1457_v22  ;;  %v43_v12 = vld [vmem:[%s1917_s0 + $0xe0] sm:$0xff]  ;;  %v44_v15 = vld [vmem:[%s1917_s0 + $0xe8] sm:$0xff]  ;;  %v1489_v22 = vld [vmem:[%s1916_s1 + $0x1d0] sm:$0xff]  }
  0x19   :  { %1308 = vmatpush3.bf16.msra.mxu1 %v1458_v23  ;;  %1263 = vmatprep.subr.bf16.mxu0 %v1459_v24  ;;  %v1131_v14 = vcombine.high %v39_v11, %v43_v12  ;;  %v1130_v16 = vcombine.low %v39_v11, %v43_v12  ;;  %v1133_v17 = vcombine.high %v40_v13, %v44_v15  ;;  %v1490_v23 = vld [vmem:[%s1916_s1 + $0x190] sm:$0xff]   ;;  %v1491_v24 = vld [vmem:[%s1916_s1 + $0x148] sm:$0xff]   ;;  %v1499_v34 = vld [vmem:[%s1916_s1 + $0x140] sm:$0xff]  }
  0x1a   :  { %1309 = vmatprep.subr.bf16.mxu1 %v1460_v25  ;;  %v1132_v19 = vcombine.low %v40_v13, %v44_v15  ;;  %v47_v25 = vld [vmem:[%s1917_s0 + $0x100] sm:$0xff]  ;;  %v1498_v33 = vld [vmem:[%s1916_s1 + $0x188] sm:$0xff]   ;;  %v26_v47 = vld [vmem:[%s1917_s0 + $0x58] sm:$0xff] }
  0x1b   :  { %v1501_v36 = vld [vmem:[%s1916_s1 + $0x1c0] sm:$0xff]   ;;  %v41_v60 = vld [vmem:[%s1917_s0 + $0xd0] sm:$0xff]  ;;  %v42_v62 = vld [vmem:[%s1917_s0 + $0xd8] sm:$0xff] }
  0x1c   :  { %1264 = vmatpush3.bf16.msra.mxu0 %v1461_v26  ;;  %v48_v26 = vld [vmem:[%s1917_s0 + $0x108] sm:$0xff]  ;;  %v1502_v37 = vld [vmem:[%s1916_s1 + $0x180] sm:$0xff]   ;;  %v45_v61 = vld [vmem:[%s1917_s0 + $0xf0] sm:$0xff] }
  0x1d   :  { %1310 = vmatpush3.bf16.msra.mxu1 %v1462_v27  ;;  %1265 = vmatprep.subr.bf16.mxu0 %v1463_v28  ;;  %v1139_v27 = vcombine.high %v47_v25, %v47_v25  ;;  %v1141_v28 = vcombine.high %v48_v26, %v48_v26  ;;  %v1140_v32 = vcombine.low %v48_v26, %v48_v26  ;;  %v46_v63 = vld [vmem:[%s1917_s0 + $0xf8] sm:$0xff] }
  0x1e   :  { %1311 = vmatprep.subr.bf16.mxu1 %v1464_v29  ;;  %v1494_v29 = vld [vmem:[%s1916_s1 + $0x108] sm:$0xff]  }
  0x20   :  { %1266 = vmatpush3.bf16.msra.mxu0 %v1465_v30  ;;  %v1138_v30 = vcombine.low %v47_v25, %v47_v25 }
  0x21   :  { %1312 = vmatpush3.bf16.msra.mxu1 %v1466_v31  ;;  %1343 = vmatprep.subr.bf16.mxu0 %v1467_v40  ;;  %v1497_v31 = vld [vmem:[%s1916_s1 + $0x1c8] sm:$0xff]   ;;  %v18_v40 = vld [vmem:[%s1917_s0 + $0x18] sm:$0xff] }
  0x22   :  { %1389 = vmatprep.subr.bf16.mxu1 %v1469_v42  ;;  %v22_v42 = vld [vmem:[%s1917_s0 + $0x38] sm:$0xff] }
  0x23   :  { %791 = vmatmul.mubr.bf16.vlgmr.msra.gmra.mxu0 %v1106_v35  ;;  %v1500_v35 = vld [vmem:[%s1916_s1 + $0x100] sm:$0xff]   ;;  %v1113_v46 = vcombine.high %v18_v40, %v22_v42  ;;  %v1112_v49 = vcombine.low %v18_v40, %v22_v42 }
  0x24   :  { %863 = vmatmul.mubr.bf16.vlgmr.msra.gmra.mxu1 %v1108_v38  ;;  %1344 = vmatpush3.bf16.msra.mxu0 %v1468_v41  ;;  %v17_v38 = vld [vmem:[%s1917_s0 + $0x10] sm:$0xff] }
  0x25   :  { %1390 = vmatpush3.bf16.msra.mxu1 %v1470_v43  ;;  %1345 = vmatprep.subr.bf16.mxu0 %v1471_v44  ;;  %v1111_v41 = vcombine.high %v17_v38, %v21_v39  ;;  %v25_v43 = vld [vmem:[%s1917_s0 + $0x50] sm:$0xff] }
  0x26   :  { %798 = vmatprep.mubr.bf16.mxu0 %v1115_v48  ;;  %870 = vmatprep.mubr.bf16.mxu1 %v1117_v52  ;;  %v29_v44 = vld [vmem:[%s1917_s0 + $0x70] sm:$0xff]  ;;  %v30_v48 = vld [vmem:[%s1917_s0 + $0x78] sm:$0xff] }
  0x27   :  { %1391 = vmatprep.subr.bf16.mxu1 %v1473_v53  ;;  %v1119_v50 = vcombine.high %v25_v43, %v29_v44  ;;  %v33_v52 = vld [vmem:[%s1917_s0 + $0x90] sm:$0xff] }
  0x28   :  { %1346 = vmatpush3.bf16.msra.mxu0 %v1472_v45  ;;  %v1110_v45 = vcombine.low %v17_v38, %v21_v39  ;;  %v37_v53 = vld [vmem:[%s1917_s0 + $0xb0] sm:$0xff] }
  0x29   :  { %1392 = vmatpush3.bf16.msra.mxu1 %v1474_v55  ;;  %1347 = vmatprep.subr.bf16.mxu0 %v1475_v56  ;;  %v38_v55 = vld [vmem:[%s1917_s0 + $0xb8] sm:$0xff]  ;;  %v1118_v56 = vcombine.low %v25_v43, %v29_v44 }
  0x2a   :  { %1393 = vmatprep.subr.bf16.mxu1 %v1477_v58  ;;  %v1127_v58 = vcombine.high %v33_v52, %v37_v53 }
  0x2b   :  { %799 = vmatmul.mubr.bf16.gmra.mxu0 %v1114_v51  ;;  %v1121_v51 = vcombine.high %v26_v47, %v30_v48 }
  0x2c   :  { %871 = vmatmul.mubr.bf16.gmra.mxu1 %v1116_v54  ;;  %1348 = vmatpush3.bf16.msra.mxu0 %v1476_v57  ;;  %v34_v54 = vld [vmem:[%s1917_s0 + $0x98] sm:$0xff]  ;;  %v1120_v57 = vcombine.low %v26_v47, %v30_v48 }
  0x2d   :  { %1394 = vmatpush3.bf16.msra.mxu1 %v1478_v59  ;;  %806 = vmatprep.mubr.bf16.mxu0 %v1123_v0  ;;  %v1129_v59 = vcombine.high %v34_v54, %v38_v55  ;;  %v1126_v0 = vcombine.low %v33_v52, %v37_v53 }
  0x2e   :  { %878 = vmatprep.mubr.bf16.mxu1 %v1125_v1  ;;  %1349 = vmatprep.subr.bf16.mxu0 %v1479_v2  ;;  %v1128_v1 = vcombine.low %v34_v54, %v38_v55  ;;  %v1135_v2 = vcombine.high %v41_v60, %v45_v61 }
  0x2f   :  { %1395 = vmatprep.subr.bf16.mxu1 %v1481_v6  ;;  %v1134_v6 = vcombine.low %v41_v60, %v45_v61 }
  0x30   :  { %1350 = vmatpush3.bf16.msra.mxu0 %v1480_v5  ;;  %v50_v5 = vld [vmem:[%s1917_s0 + $0x118] sm:$0xff] }
  0x31   :  { %1396 = vmatpush3.bf16.msra.mxu1 %v1482_v7  ;;  %1351 = vmatprep.subr.bf16.mxu0 %v1483_v8  ;;  %v1136_v7 = vcombine.low %v42_v62, %v46_v63  ;;  %v1144_v11 = vcombine.low %v50_v5, %v50_v5 }
  0x32   :  { %1397 = vmatprep.subr.bf16.mxu1 %v1485_v10 }
  0x33   :  { %807 = vmatmul.mubr.bf16.gmra.mxu0 %v1122_v3  ;;  %v1137_v3 = vcombine.high %v42_v62, %v46_v63 }
  0x34   :  { %879 = vmatmul.mubr.bf16.gmra.mxu1 %v1124_v4  ;;  %1352 = vmatpush3.bf16.msra.mxu0 %v1484_v9  ;;  %v49_v4 = vld [vmem:[%s1917_s0 + $0x110] sm:$0xff]  ;;  %v1145_v9 = vcombine.high %v50_v5, %v50_v5 }
  0x35   :  { %814 = vmatprep.mubr.bf16.mxu0 %v1131_v14  ;;  %886 = vmatprep.mubr.bf16.mxu1 %v1133_v17  ;;  %v1143_v8 = vcombine.high %v49_v4, %v49_v4  ;;  %v1142_v10 = vcombine.low %v49_v4, %v49_v4 }
  0x36   :  { %1398 = vmatpush3.bf16.msra.mxu1 %v1486_v18  ;;  %1353 = vmatprep.subr.bf16.mxu0 %v1487_v20 }
  0x37   :  { %1399 = vmatprep.subr.bf16.mxu1 %v1489_v22 }
  0x38   :  { %1354 = vmatpush3.bf16.msra.mxu0 %v1488_v21 }
  0x39   :  { %1355 = vmatprep.subr.bf16.mxu0 %v1491_v24 }
  0x3a   :  { %1400 = vmatpush3.bf16.msra.mxu1 %v1490_v23 }
  0x3b   :  { %815 = vmatmul.mubr.bf16.gmra.mxu0 %v1130_v16  ;;  %1401 = vmatprep.subr.bf16.mxu1 %v1497_v31 }
  0x3c   :  { %887 = vmatmul.mubr.bf16.gmra.mxu1 %v1132_v19  ;;  %822 = vmatprep.mubr.bf16.mxu0 %v1139_v27 }
  0x3d   :  { %894 = vmatprep.mubr.bf16.mxu1 %v1141_v28  ;;  %1356 = vmatpush3.bf16.msra.mxu0 %v1494_v29 }
  0x3e   :  { %1402 = vmatpush3.bf16.msra.mxu1 %v1498_v33  ;;  %1357 = vmatprep.subr.bf16.mxu0 %v1499_v34 }
  0x3f   :  { %1403 = vmatprep.subr.bf16.mxu1 %v1501_v36 }
  0x41   :  { %1358 = vmatpush3.bf16.msra.mxu0 %v1500_v35 }
  0x42   :  { %1404 = vmatpush3.bf16.msra.mxu1 %v1502_v37 }
  0x43   :  { %823 = vmatmul.mubr.bf16.gmra.mxu0 %v1138_v30 }
  0x44   :  { %895 = vmatmul.mubr.bf16.gmra.mxu1 %v1140_v32  ;;  %934 = vmatprep.mubr.bf16.mxu0 %v1111_v41 }
  0x45   :  { %1006 = vmatprep.mubr.bf16.mxu1 %v1113_v46 }
  0x4b   :  { %935 = vmatmul.mubr.bf16.vlgmr.msra.gmra.mxu0 %v1110_v45 }
  0x4c   :  { %1007 = vmatmul.mubr.bf16.vlgmr.msra.gmra.mxu1 %v1112_v49  ;;  %942 = vmatprep.mubr.bf16.mxu0 %v1119_v50  ;;  %v1870_v49 = vld [vmem:[%s1918_s2] ss:$0 sm:$0xff] }
  0x4d   :  { %1014 = vmatprep.mubr.bf16.mxu1 %v1121_v51 }
  0x53   :  { %943 = vmatmul.mubr.bf16.gmra.mxu0 %v1118_v56 }
  0x54   :  { %1015 = vmatmul.mubr.bf16.gmra.mxu1 %v1120_v57  ;;  %950 = vmatprep.mubr.bf16.mxu0 %v1127_v58 }
  0x55   :  { %1022 = vmatprep.mubr.bf16.mxu1 %v1129_v59 }
  0x5b   :  { %951 = vmatmul.mubr.bf16.gmra.mxu0 %v1126_v0 }
  0x5c   :  { %1023 = vmatmul.mubr.bf16.gmra.mxu1 %v1128_v1  ;;  %958 = vmatprep.mubr.bf16.mxu0 %v1135_v2 }
  0x5d   :  { %1030 = vmatprep.mubr.bf16.mxu1 %v1137_v3 }
  0x63   :  { %959 = vmatmul.mubr.bf16.gmra.mxu0 %v1134_v6 }
  0x64   :  { %1031 = vmatmul.mubr.bf16.gmra.mxu1 %v1136_v7  ;;  %966 = vmatprep.mubr.bf16.mxu0 %v1143_v8 }
  0x65   :  { %1038 = vmatprep.mubr.bf16.mxu1 %v1145_v9 }
  0x6b   :  { %967 = vmatmul.mubr.bf16.gmra.mxu0 %v1142_v10 }
  0x6c   :  { %1039 = vmatmul.mubr.bf16.gmra.mxu1 %v1144_v11 }
  0xe3   :  { %v1267_v12 = vpop.f32.mrf.mxu0 }
  0xe4   :  { %v1313_v13 = vpop.f32.mrf.mxu1 }
  0xe5   :  { %v1268_v14 = vpop.f32.mrf.mxu0 }
  0xe6   :  { %v1314_v15 = vpop.f32.mrf.mxu1  ;;  %v1269_v47 = vadd.f32 %v1268_v14, %v1267_v12 }
  0xe7   :  { %v1270_v16 = vpop.f32.mrf.mxu0  ;;  %v1315_v57 = vadd.f32 %v1314_v15, %v1313_v13 }
  0xe8   :  { %v1316_v17 = vpop.f32.mrf.mxu1  ;;  %v793_v53 = vadd.f32 %v1269_v47, %v1870_v49 }
  0xe9   :  { %v1271_v18 = vpop.f32.mrf.mxu0 }
  0xea   :  { %v1317_v19 = vpop.f32.mrf.mxu1  ;;  %v1272_v54 = vadd.f32 %v1271_v18, %v1270_v16  ;;  %v865_v60 = vadd.f32 %v1315_v57, %v793_v53 }
  0xeb   :  { %v1273_v20 = vpop.f32.mrf.mxu0  ;;  %v1318_v2 = vadd.f32 %v1317_v19, %v1316_v17 }
  0xec   :  { %v1319_v21 = vpop.f32.mrf.mxu1  ;;  %v796_v61 = vadd.f32 %v1272_v54, %v1870_v49 }
  0xed   :  { %v1274_v22 = vpop.f32.mrf.mxu0 }
  0xee   :  { %v1320_v23 = vpop.f32.mrf.mxu1  ;;  %v1275_v62 = vadd.f32 %v1274_v22, %v1273_v20  ;;  %v868_v7 = vadd.f32 %v1318_v2, %v796_v61 }
  0xef   :  { %v1276_v24 = vpop.f32.mrf.mxu0  ;;  %v1321_v13 = vadd.f32 %v1320_v23, %v1319_v21 }
  0xf0   :  { %v1827_v25 = vpop.f32.mrf.mxu1  ;;  %v801_v8 = vadd.f32 %v1275_v62, %v1870_v49 }
  0xf1   :  { %v1277_v26 = vpop.f32.mrf.mxu0 }
  0xf2   :  { %v1829_v27 = vpop.f32.mrf.mxu1  ;;  %v1278_v5 = vadd.f32 %v1277_v26, %v1276_v24  ;;  %v873_v17 = vadd.f32 %v1321_v13, %v801_v8 }
  0xf3   :  { %v1279_v28 = vpop.f32.mrf.mxu0 }
  0xf4   :  { %v1831_v29 = vpop.f32.mrf.mxu1  ;;  %v804_v20 = vadd.f32 %v1278_v5, %v1870_v49 }
  0xf5   :  { %v1280_v30 = vpop.f32.mrf.mxu0 }
  0xf6   :  { %v1833_v31 = vpop.f32.mrf.mxu1  ;;  %v1281_v19 = vadd.f32 %v1280_v30, %v1279_v28 }
  0xf7   :  { %v1835_v32 = vpop.f32.mrf.mxu0 }
  0xf8   :  { %v1837_v33 = vpop.f32.mrf.mxu1  ;;  %v809_v57 = vadd.f32 %v1281_v19, %v1870_v49 }
  0xf9   :  { %v1839_v34 = vpop.f32.mrf.mxu0 }
  0xfa   :  { %v1841_v35 = vpop.f32.mrf.mxu1 }
  0xfb   :  { %v1843_v36 = vpop.f32.mrf.mxu0 }
  0xfc   :  { %v1845_v37 = vpop.f32.mrf.mxu1 }
  0xfd   :  { %v1847_v38 = vpop.f32.mrf.mxu0 }
  0xfe   :  { %v1849_v39 = vpop.f32.mrf.mxu1 }
  0xff   :  { %v1851_v40 = vpop.f32.mrf.mxu0 }
 0x100   :  { %v1853_v41 = vpop.f32.mrf.mxu1 }
 0x101   :  { %v1855_v42 = vpop.f32.mrf.mxu0 }
 0x102   :  { %v1857_v43 = vpop.f32.mrf.mxu1 }
 0x103   :  { %v1859_v44 = vpop.f32.mrf.mxu0 }
 0x104   :  { %v1861_v45 = vpop.f32.mrf.mxu1 }
 0x105   :  { %v1863_v46 = vpop.f32.mrf.mxu0 }
 0x106   :  { %v1865_v48 = vpop.f32.mrf.mxu1 }
 0x107   :  { %v1294_v50 = vpop.f32.mrf.mxu0 }
 0x108   :  { %v1340_v51 = vpop.f32.mrf.mxu1  ;;  %v1324_v50 = vadd.f32 %v1829_v27, %v1827_v25  ;;  %v1327_v25 = vadd.f32 %v1833_v31, %v1831_v29  ;;  %v1330_v29 = vadd.f32 %v1841_v35, %v1837_v33  ;;  %v1333_v33 = vadd.f32 %v1849_v39, %v1845_v37 }
 0x109   :  { %v1295_v52 = vpop.f32.mrf.mxu0  ;;  %v1336_v37 = vadd.f32 %v1857_v43, %v1853_v41 }
 0x10a   :  { %v1341_v55 = vpop.f32.mrf.mxu1  ;;  %v876_v23 = vadd.f32 %v1324_v50, %v804_v20 }
 0x10b   :  { %v1359_v56 = vpop.f32.mrf.mxu0  ;;  %v1284_v55 = vadd.f32 %v1839_v34, %v1835_v32 }
 0x10c   :  { %v1405_v58 = vpop.f32.mrf.mxu1 }
 0x10d   :  { %v1360_v59 = vpop.f32.mrf.mxu0  ;;  %v812_v32 = vadd.f32 %v1284_v55, %v1870_v49 }
 0x10e   :  { %v1361_v63 = vadd.f32 %v1360_v59, %v1359_v56  ;;  %v1406_v0 = vpop.f32.mrf.mxu1 }
 0x10f   :  { %v1362_v1 = vpop.f32.mrf.mxu0  ;;  %v1407_v9 = vadd.f32 %v1406_v0, %v1405_v58  ;;  %v881_v0 = vadd.f32 %v1327_v25, %v809_v57 }
 0x110   :  { %v937_v3 = vadd.f32 %v1361_v63, %v865_v60  ;;  %v1408_v4 = vpop.f32.mrf.mxu1 }
 0x111   :  { %v1363_v6 = vpop.f32.mrf.mxu0 }
 0x112   :  { %v1364_v10 = vadd.f32 %v1363_v6, %v1362_v1  ;;  %v1409_v11 = vpop.f32.mrf.mxu1  ;;  %v1009_v14 = vadd.f32 %v1407_v9, %v937_v3  ;;  %v1287_v1 = vadd.f32 %v1847_v38, %v1843_v36  ;;  %v884_v9 = vadd.f32 %v1330_v29, %v812_v32 }
 0x113   :  { %v1365_v12 = vpop.f32.mrf.mxu0  ;;  %v1410_v16 = vadd.f32 %v1409_v11, %v1408_v4 }
 0x114   :  { %v940_v15 = vadd.f32 %v1364_v10, %v868_v7  ;;  %v1411_v18 = vpop.f32.mrf.mxu1  ;;  %v1046_v52 = vmax.f32 %v1009_v14, 0.0  ;;  %v1290_v10 = vadd.f32 %v1855_v42, %v1851_v40 }
 0x115   :  { %v1366_v22 = vpop.f32.mrf.mxu0 }
 0x116   :  { %v1012_v47 = vadd.f32 %v1410_v16, %v940_v15  ;;  %v1367_v24 = vadd.f32 %v1366_v22, %v1365_v12  ;;  %v1412_v26 = vpop.f32.mrf.mxu1  ;;  %v817_v12 = vadd.f32 %v1287_v1, %v1870_v49  ;;  %v820_v40 = vadd.f32 %v1290_v10, %v1870_v49 }
 0x117   :  { %v1368_v51 = vpop.f32.mrf.mxu0  ;;  %v1413_v28 = vadd.f32 %v1412_v26, %v1411_v18 }
 0x118   :  { %v1047_v53 = vmax.f32 %v1012_v47, 0.0  ;;  %v945_v54 = vadd.f32 %v1367_v24, %v873_v17  ;;  %v1414_v21 = vpop.f32.mrf.mxu1  ;;  %v889_v22 = vadd.f32 %v1333_v33, %v817_v12  ;;  %v1293_v17 = vadd.f32 %v1863_v46, %v1859_v44 }
 0x119   :  { %v1369_v56 = vpop.f32.mrf.mxu0  ;;  %v1339_v46 = vadd.f32 %v1865_v48, %v1861_v45 }
 0x11a   :  { %v1231_v58 = vpack.c.bf16 %v1047_v53, %v1046_v52  ;;  %v1370_v30 = vadd.f32 %v1369_v56, %v1368_v51  ;;  %v1415_v59 = vpop.f32.mrf.mxu1  ;;  %v1017_v27 = vadd.f32 %v1413_v28, %v945_v54  ;;  %v892_v53 = vadd.f32 %v1336_v37, %v820_v40 }
 0x11b   :  { %v1371_v60 = vpop.f32.mrf.mxu0  ;;  %v1416_v62 = vadd.f32 %v1415_v59, %v1414_v21  ;;  %v825_v21 = vadd.f32 %v1293_v17, %v1870_v49 }
 0x11c   :  { %1232 = vst [vmem:[%s1919_s3] sm:$0xff] %v1231_v58   ;;  %v948_v61 = vadd.f32 %v1370_v30, %v876_v23  ;;  %v1417_v63 = vpop.f32.mrf.mxu1  ;;  %v1048_v5 = vmax.f32 %v1017_v27, 0.0 }
 0x11d   :  { %v1372_v34 = vpop.f32.mrf.mxu0  ;;  %v897_v59 = vadd.f32 %v1339_v46, %v825_v21 }
 0x11e   :  { %v1020_v2 = vadd.f32 %v1416_v62, %v948_v61  ;;  %v1373_v3 = vadd.f32 %v1372_v34, %v1371_v60  ;;  %v1418_v4 = vpop.f32.mrf.mxu1 }
 0x11f   :  { %v1374_v31 = vpop.f32.mrf.mxu0  ;;  %v1419_v36 = vadd.f32 %v1418_v4, %v1417_v63 }
 0x120   :  { %v1049_v6 = vmax.f32 %v1020_v2, 0.0  ;;  %v953_v7 = vadd.f32 %v1373_v3, %v881_v0  ;;  %v1420_v8 = vpop.f32.mrf.mxu1 }
 0x121   :  { %v1375_v11 = vpop.f32.mrf.mxu0 }
 0x122   :  { %v1236_v13 = vpack.c.bf16 %v1049_v6, %v1048_v5  ;;  %v1376_v38 = vadd.f32 %v1375_v11, %v1374_v31  ;;  %v1421_v14 = vpop.f32.mrf.mxu1  ;;  %v1025_v35 = vadd.f32 %v1419_v36, %v953_v7 }
 0x123   :  { %v1377_v15 = vpop.f32.mrf.mxu0  ;;  %v1422_v18 = vadd.f32 %v1421_v14, %v1420_v8 }
 0x124   :  { %1248 = vst [vmem:[%s1919_s3 + $0x8] sm:$0xff] %v1236_v13   ;;  %v956_v16 = vadd.f32 %v1376_v38, %v884_v9  ;;  %v1423_v20 = vpop.f32.mrf.mxu1  ;;  %v1050_v26 = vmax.f32 %v1025_v35, 0.0 }
 0x125   :  { %v1378_v42 = vpop.f32.mrf.mxu0 }
 0x126   :  { %v1028_v19 = vadd.f32 %v1422_v18, %v956_v16  ;;  %v1379_v47 = vadd.f32 %v1378_v42, %v1377_v15  ;;  %v1424_v24 = vpop.f32.mrf.mxu1 }
 0x127   :  { %v1380_v39 = vpop.f32.mrf.mxu0  ;;  %v1425_v55 = vadd.f32 %v1424_v24, %v1423_v20 }
 0x128   :  { %v1051_v50 = vmax.f32 %v1028_v19, 0.0  ;;  %v961_v51 = vadd.f32 %v1379_v47, %v889_v22  ;;  %v1426_v52 = vpop.f32.mrf.mxu1 }
 0x129   :  { %v1381_v54 = vpop.f32.mrf.mxu0 }
 0x12a   :  { %v1241_v23 = vpack.c.bf16 %v1051_v50, %v1050_v26  ;;  %v1382_v56 = vadd.f32 %v1381_v54, %v1380_v39  ;;  %v1427_v57 = vpop.f32.mrf.mxu1  ;;  %v1033_v41 = vadd.f32 %v1425_v55, %v961_v51 }
 0x12b   :  { %v1383_v44 = vpop.f32.mrf.mxu0  ;;  %v1428_v58 = vadd.f32 %v1427_v57, %v1426_v52 }
 0x12c   :  { %1249 = vst [vmem:[%s1919_s3 + $0x10] sm:$0xff] %v1241_v23   ;;  %v964_v43 = vadd.f32 %v1382_v56, %v892_v53  ;;  %v1429_v28 = vpop.f32.mrf.mxu1  ;;  %v1052_v61 = vmax.f32 %v1033_v41, 0.0 }
 0x12d   :  { %v1384_v30 = vpop.f32.mrf.mxu0 }
 0x12e   :  { %v1036_v60 = vadd.f32 %v1428_v58, %v964_v43  ;;  %v1385_v49 = vadd.f32 %v1384_v30, %v1383_v44  ;;  %v1430_v25 = vpop.f32.mrf.mxu1 }
 0x12f   :  { %v1386_v27 = vpop.f32.mrf.mxu0  ;;  %v1431_v32 = vadd.f32 %v1430_v25, %v1429_v28 }
 0x130   :  { %v1053_v62 = vmax.f32 %v1036_v60, 0.0  ;;  %v969_v63 = vadd.f32 %v1385_v49, %v897_v59  ;;  %v1432_v34 = vpop.f32.mrf.mxu1 }
 0x131   :  { %v1387_v45 = vpop.f32.mrf.mxu0 }
 0x132   :  { %v1246_v48 = vpack.c.bf16 %v1053_v62, %v1052_v61  ;;  %v1041_v0 = vadd.f32 %v1431_v32, %v969_v63  ;;  %v1433_v1 = vpop.f32.mrf.mxu1 }
 0x134   :  { %1250 = vst [vmem:[%s1919_s3 + $0x18] sm:$0xff] %v1246_v48   ;;  %v1054_v2 = vmax.f32 %v1041_v0, 0.0 }
 0x136   :  { %v1227_v3 = vpack.c.bf16 %v1054_v2, %v1054_v2 }
 0x138   :  { %1100 = vst [vmem:[%s1919_s3 + $0x20] sm:$0xf] %v1227_v3 }

// kernel: wzrynet_forward.7
= control target key start
LH: loop header
LB: loop body
LE: loop exit
PB: predicated region body
PF: predicated region fallthrough
CT: control target
= control target key end

     0   :  { %v51_v38 = vlaneseq  ;;  %vm42_vm0 = vcmask 1041408   ;;  %s1470_s0 = inlined_call_operand.vmem [shape: f32[2,2,256], index: 0, kind: input, shape index: {}]   ;;  %s1471_s1 = inlined_call_operand.vmem [shape: f32[1,256], index: 1, kind: input, shape index: {}]   ;;  %s1472_s2 = inlined_call_operand.vmem [shape: bf16[256,768], index: 2, kind: input, shape index: {}]   ;;  %s1473_s3 = inlined_call_operand.vmem [shape: f32[1,768], index: 3, kind: input, shape index: {}]   ;;  %s1474_s4 = inlined_call_operand.hbm [shape: f32[2,768], index: 4, kind: output, shape index: {}]  }
   0x1   :  { %v948_v0 = vld [vmem:[%s1472_s2 + $0x154] ss:$24 sps:$4 sm:$0xff]   ;;  %v952_v2 = vld [vmem:[%s1472_s2 + $0x150] ss:$24 sps:$4 sm:$0xff]   ;;  %v954_v4 = vld [vmem:[%s1472_s2 + $0x124] ss:$24 sps:$4 sm:$0xff]  }
   0x2   :  { %v950_v1 = vld [vmem:[%s1472_s2 + $0x15c] ss:$24 sps:$4 sm:$0xff]   ;;  %675 = vmatprep.subr.bf16.mxu0 %v948_v0  ;;  %v953_v3 = vld [vmem:[%s1472_s2 + $0x158] ss:$24 sps:$4 sm:$0xff]   ;;  %v956_v5 = vld [vmem:[%s1472_s2 + $0x12c] ss:$24 sps:$4 sm:$0xff]  }
   0x3   :  { %716 = vmatprep.subr.bf16.mxu1 %v950_v1  ;;  %676 = vmatpush1.bf16.msra.mxu0 %v952_v2  ;;  %v958_v6 = vld [vmem:[%s1472_s2 + $0x120] ss:$24 sps:$4 sm:$0xff]   ;;  %v960_v8 = vld [vmem:[%s1472_s2 + $0xf4] ss:$24 sps:$4 sm:$0xff]   ;;  %v964_v10 = vld [vmem:[%s1472_s2 + $0xf0] ss:$24 sps:$4 sm:$0xff]  }
   0x4   :  { %717 = vmatpush1.bf16.msra.mxu1 %v953_v3  ;;  %677 = vmatprep.subr.bf16.mxu0 %v954_v4  ;;  %v959_v7 = vld [vmem:[%s1472_s2 + $0x128] ss:$24 sps:$4 sm:$0xff]   ;;  %v962_v9 = vld [vmem:[%s1472_s2 + $0xfc] ss:$24 sps:$4 sm:$0xff]   ;;  %v965_v11 = vld [vmem:[%s1472_s2 + $0xf8] ss:$24 sps:$4 sm:$0xff]  }
   0x5   :  { %718 = vmatprep.subr.bf16.mxu1 %v956_v5  ;;  %v966_v12 = vld [vmem:[%s1472_s2 + $0xc4] ss:$24 sps:$4 sm:$0xff]   ;;  %v970_v14 = vld [vmem:[%s1472_s2 + $0xc0] ss:$24 sps:$4 sm:$0xff]   ;;  %v972_v16 = vld [vmem:[%s1472_s2 + $0x94] ss:$24 sps:$4 sm:$0xff]  }
   0x6   :  { %v968_v13 = vld [vmem:[%s1472_s2 + $0xcc] ss:$24 sps:$4 sm:$0xff]   ;;  %v971_v15 = vld [vmem:[%s1472_s2 + $0xc8] ss:$24 sps:$4 sm:$0xff]   ;;  %v974_v17 = vld [vmem:[%s1472_s2 + $0x9c] ss:$24 sps:$4 sm:$0xff]  }
   0x7   :  { %678 = vmatpush1.bf16.msra.mxu0 %v958_v6  ;;  %v976_v18 = vld [vmem:[%s1472_s2 + $0x90] ss:$24 sps:$4 sm:$0xff]   ;;  %v978_v20 = vld [vmem:[%s1472_s2 + $0x64] ss:$24 sps:$4 sm:$0xff]   ;;  %v982_v22 = vld [vmem:[%s1472_s2 + $0x60] ss:$24 sps:$4 sm:$0xff]  }
   0x8   :  { %719 = vmatpush1.bf16.msra.mxu1 %v959_v7  ;;  %679 = vmatprep.subr.bf16.mxu0 %v960_v8  ;;  %v977_v19 = vld [vmem:[%s1472_s2 + $0x98] ss:$24 sps:$4 sm:$0xff]   ;;  %v980_v21 = vld [vmem:[%s1472_s2 + $0x6c] ss:$24 sps:$4 sm:$0xff]   ;;  %v983_v23 = vld [vmem:[%s1472_s2 + $0x68] ss:$24 sps:$4 sm:$0xff]  }
   0x9   :  { %720 = vmatprep.subr.bf16.mxu1 %v962_v9  ;;  %v984_v24 = vld [vmem:[%s1472_s2 + $0x34] ss:$24 sps:$4 sm:$0xff]   ;;  %v988_v26 = vld [vmem:[%s1472_s2 + $0x30] ss:$24 sps:$4 sm:$0xff]   ;;  %v990_v28 = vld [vmem:[%s1472_s2 + $0x4] ss:$24 sps:$4 sm:$0xff]  }
   0xa   :  { %v986_v25 = vld [vmem:[%s1472_s2 + $0x3c] ss:$24 sps:$4 sm:$0xff]   ;;  %v989_v27 = vld [vmem:[%s1472_s2 + $0x38] ss:$24 sps:$4 sm:$0xff]   ;;  %v992_v29 = vld [vmem:[%s1472_s2 + $0xc] ss:$24 sps:$4 sm:$0xff]  }
   0xb   :  { %680 = vmatpush1.bf16.msra.mxu0 %v964_v10  ;;  %v994_v30 = vld [vmem:[%s1472_s2] ss:$24 sps:$4 sm:$0xff]   ;;  %v996_v32 = vld [vmem:[%s1472_s2 + $0x2d4] ss:$24 sps:$4 sm:$0xff]   ;;  %v1000_v34 = vld [vmem:[%s1472_s2 + $0x2d0] ss:$24 sps:$4 sm:$0xff]  }
   0xc   :  { %721 = vmatpush1.bf16.msra.mxu1 %v965_v11  ;;  %681 = vmatprep.subr.bf16.mxu0 %v966_v12  ;;  %v995_v31 = vld [vmem:[%s1472_s2 + $0x8] ss:$24 sps:$4 sm:$0xff]   ;;  %v998_v33 = vld [vmem:[%s1472_s2 + $0x2dc] ss:$24 sps:$4 sm:$0xff]   ;;  %v1001_v35 = vld [vmem:[%s1472_s2 + $0x2d8] ss:$24 sps:$4 sm:$0xff]  }
   0xd   :  { %722 = vmatprep.subr.bf16.mxu1 %v968_v13  ;;  %v1002_v36 = vld [vmem:[%s1472_s2 + $0x2a4] ss:$24 sps:$4 sm:$0xff]   ;;  %v1006_v39 = vld [vmem:[%s1472_s2 + $0x2a0] ss:$24 sps:$4 sm:$0xff]   ;;  %v1008_v41 = vld [vmem:[%s1472_s2 + $0x274] ss:$24 sps:$4 sm:$0xff]  }
   0xe   :  { %v1004_v37 = vld [vmem:[%s1472_s2 + $0x2ac] ss:$24 sps:$4 sm:$0xff]   ;;  %v1007_v40 = vld [vmem:[%s1472_s2 + $0x2a8] ss:$24 sps:$4 sm:$0xff]   ;;  %v1010_v42 = vld [vmem:[%s1472_s2 + $0x27c] ss:$24 sps:$4 sm:$0xff]  }
   0xf   :  { %682 = vmatpush1.bf16.msra.mxu0 %v970_v14  ;;  %v1267_v43 = vshrl.u32 %v51_v38, 7  ;;  %v1012_v44 = vld [vmem:[%s1472_s2 + $0x270] ss:$24 sps:$4 sm:$0xff]   ;;  %v1014_v46 = vld [vmem:[%s1472_s2 + $0x244] ss:$24 sps:$4 sm:$0xff]  }
  0x10   :  { %723 = vmatpush1.bf16.msra.mxu1 %v971_v15  ;;  %683 = vmatprep.subr.bf16.mxu0 %v972_v16  ;;  %v1013_v45 = vld [vmem:[%s1472_s2 + $0x278] ss:$24 sps:$4 sm:$0xff]   ;;  %v1016_v47 = vld [vmem:[%s1472_s2 + $0x24c] ss:$24 sps:$4 sm:$0xff]   ;;  %v1019_v50 = vld [vmem:[%s1472_s2 + $0x248] ss:$24 sps:$4 sm:$0xff]  }
  0x11   :  { %724 = vmatprep.subr.bf16.mxu1 %v974_v17  ;;  %v57_v48 = vsub.s32 1, %v1267_v43  ;;  %v1018_v49 = vld [vmem:[%s1472_s2 + $0x240] ss:$24 sps:$4 sm:$0xff]   ;;  %v1020_v55 = vld [vmem:[%s1472_s2 + $0x214] ss:$24 sps:$4 sm:$0xff]   ;;  %v53_v60 = vsub.s32 0, %v1267_v43 }
  0x12   :  { %v49_v51 = vld [vmem:[%s1471_s1] sm:$0x3]  ;;  %v848_v53 = vld.sshfl [vmem:[%s1470_s0 + $0x4] sm:$0x33 pattern:$0x76325410] }
  0x13   :  { %684 = vmatpush1.bf16.msra.mxu0 %v976_v18  ;;  %v847_v52 = vld.sshfl [vmem:[%s1470_s0] sm:$0x33 pattern:$0x76325410]  ;;  %v1022_v56 = vld [vmem:[%s1472_s2 + $0x21c] ss:$24 sps:$4 sm:$0xff]   ;;  %v37_v57 = vcombine.high %v848_v53, %v848_v53  ;;  %v58_v59 = vrot.slane %v49_v51, %v57_v48  ;;  %v54_v9 = vrot.slane %v49_v51, %v53_v60 }
  0x14   :  { %725 = vmatpush1.bf16.msra.mxu1 %v977_v19  ;;  %685 = vmatprep.subr.bf16.mxu0 %v978_v20  ;;  %v29_v54 = vcombine.high %v847_v52, %v847_v52  ;;  %v1024_v61 = vld [vmem:[%s1472_s2 + $0x210] ss:$24 sps:$4 sm:$0xff]   ;;  %v1026_v0 = vld [vmem:[%s1472_s2 + $0x1e4] ss:$24 sps:$4 sm:$0xff]   ;;  %v43_v2 = vsel %vm42_vm0, %v847_v52, 0.0  ;;  %v44_v3 = vsel %vm42_vm0, %v848_v53, 0.0 }
  0x15   :  { %726 = vmatprep.subr.bf16.mxu1 %v980_v21  ;;  %v1025_v62 = vld [vmem:[%s1472_s2 + $0x218] ss:$24 sps:$4 sm:$0xff]   ;;  %v47_v63 = vsel %vm42_vm0, %v37_v57, 0.0  ;;  %v1028_v4 = vld [vmem:[%s1472_s2 + $0x1ec] ss:$24 sps:$4 sm:$0xff]   ;;  %v45_v8 = vadd.f32 %v44_v3, %v43_v2 }
  0x16   :  { %v46_v58 = vsel %vm42_vm0, %v29_v54, 0.0  ;;  %v1030_v6 = vld [vmem:[%s1472_s2 + $0x1e0] ss:$24 sps:$4 sm:$0xff]   ;;  %v1032_v10 = vld [vmem:[%s1472_s2 + $0x1b4] ss:$24 sps:$4 sm:$0xff]  }
  0x17   :  { %686 = vmatpush1.bf16.msra.mxu0 %v982_v22  ;;  %v48_v1 = vadd.f32 %v47_v63, %v46_v58  ;;  %v1031_v7 = vld [vmem:[%s1472_s2 + $0x1e8] ss:$24 sps:$4 sm:$0xff]   ;;  %v1034_v12 = vld [vmem:[%s1472_s2 + $0x1bc] ss:$24 sps:$4 sm:$0xff]   ;;  %v1037_v15 = vld [vmem:[%s1472_s2 + $0x1b8] ss:$24 sps:$4 sm:$0xff]   ;;  %v61_v16 = vadd.f32 %v54_v9, %v45_v8 }
  0x18   :  { %727 = vmatpush1.bf16.msra.mxu1 %v983_v23  ;;  %687 = vmatprep.subr.bf16.mxu0 %v984_v24  ;;  %v1036_v14 = vld [vmem:[%s1472_s2 + $0x1b0] ss:$24 sps:$4 sm:$0xff]   ;;  %v1038_v17 = vld [vmem:[%s1472_s2 + $0x184] ss:$24 sps:$4 sm:$0xff]   ;;  %v1042_v19 = vld [vmem:[%s1472_s2 + $0x180] ss:$24 sps:$4 sm:$0xff]  }
  0x19   :  { %728 = vmatprep.subr.bf16.mxu1 %v986_v25  ;;  %v62_v5 = vadd.f32 %v58_v59, %v48_v1  ;;  %v1040_v18 = vld [vmem:[%s1472_s2 + $0x18c] ss:$24 sps:$4 sm:$0xff]   ;;  %v63_v20 = vmax.f32 %v61_v16, 0.0  ;;  %v1043_v21 = vld [vmem:[%s1472_s2 + $0x188] ss:$24 sps:$4 sm:$0xff]  }
  0x1a   :  { %v1046_v22 = vld [vmem:[%s1472_s2 + $0x164] ss:$24 sps:$4 sm:$0xff]   ;;  %v1044_v24 = vld [vmem:[%s1472_s2 + $0x160] ss:$24 sps:$4 sm:$0xff]   ;;  %v1049_v25 = vld [vmem:[%s1472_s2 + $0x134] ss:$24 sps:$4 sm:$0xff]  }
  0x1b   :  { %688 = vmatpush1.bf16.msra.mxu0 %v988_v26  ;;  %v64_v11 = vmax.f32 %v62_v5, 0.0  ;;  %v1357_v23 = vpack.c.bf16 %v63_v20, %v63_v20 }
  0x1c   :  { %729 = vmatpush1.bf16.msra.mxu1 %v989_v27  ;;  %689 = vmatprep.subr.bf16.mxu0 %v990_v28 }
  0x1d   :  { %730 = vmatprep.subr.bf16.mxu1 %v992_v29  ;;  %v66_v13 = vpack.c.bf16 %v64_v11, %v64_v11 }
  0x1f   :  { %690 = vmatpush1.bf16.msra.mxu0 %v994_v30  ;;  %707 = vmatprep.mubr.bf16.mxu0 %v66_v13 }
  0x20   :  { %731 = vmatpush1.bf16.msra.mxu1 %v995_v31  ;;  %691 = vmatprep.subr.bf16.mxu0 %v996_v32 }
  0x21   :  { %732 = vmatprep.subr.bf16.mxu1 %v998_v33  ;;  %748 = vmatprep.mubr.bf16.mxu1 %v66_v13 }
  0x23   :  { %692 = vmatpush2.bf16.msra.mxu0 %v1000_v34 }
  0x24   :  { %733 = vmatpush2.bf16.msra.mxu1 %v1001_v35  ;;  %693 = vmatprep.subr.bf16.mxu0 %v1002_v36 }
  0x25   :  { %734 = vmatprep.subr.bf16.mxu1 %v1004_v37 }
  0x27   :  { %694 = vmatpush2.bf16.msra.mxu0 %v1006_v39 }
  0x28   :  { %735 = vmatpush2.bf16.msra.mxu1 %v1007_v40  ;;  %695 = vmatprep.subr.bf16.mxu0 %v1008_v41 }
  0x29   :  { %736 = vmatprep.subr.bf16.mxu1 %v1010_v42 }
  0x2b   :  { %696 = vmatpush2.bf16.msra.mxu0 %v1012_v44 }
  0x2c   :  { %737 = vmatpush2.bf16.msra.mxu1 %v1013_v45  ;;  %697 = vmatprep.subr.bf16.mxu0 %v1014_v46 }
  0x2d   :  { %738 = vmatprep.subr.bf16.mxu1 %v1016_v47 }
  0x2f   :  { %698 = vmatpush2.bf16.msra.mxu0 %v1018_v49 }
  0x30   :  { %739 = vmatpush2.bf16.msra.mxu1 %v1019_v50  ;;  %699 = vmatprep.subr.bf16.mxu0 %v1020_v55 }
  0x31   :  { %740 = vmatprep.subr.bf16.mxu1 %v1022_v56 }
  0x33   :  { %700 = vmatpush2.bf16.msra.mxu0 %v1024_v61 }
  0x34   :  { %741 = vmatpush2.bf16.msra.mxu1 %v1025_v62  ;;  %701 = vmatprep.subr.bf16.mxu0 %v1026_v0 }
  0x35   :  { %742 = vmatprep.subr.bf16.mxu1 %v1028_v4 }
  0x37   :  { %702 = vmatpush2.bf16.msra.mxu0 %v1030_v6 }
  0x38   :  { %743 = vmatpush2.bf16.msra.mxu1 %v1031_v7  ;;  %703 = vmatprep.subr.bf16.mxu0 %v1032_v10 }
  0x39   :  { %744 = vmatprep.subr.bf16.mxu1 %v1034_v12 }
  0x3b   :  { %704 = vmatpush2.bf16.msra.mxu0 %v1036_v14 }
  0x3c   :  { %745 = vmatpush2.bf16.msra.mxu1 %v1037_v15  ;;  %705 = vmatprep.subr.bf16.mxu0 %v1038_v17 }
  0x3d   :  { %746 = vmatprep.subr.bf16.mxu1 %v1040_v18 }
  0x3f   :  { %706 = vmatpush2.bf16.msra.mxu0 %v1042_v19 }
  0x40   :  { %747 = vmatpush2.bf16.msra.mxu1 %v1043_v21  ;;  %757 = vmatprep.subr.bf16.mxu0 %v1046_v22 }
  0x41   :  { %9 = vsyncpa [#allocation3], 0  ;;  %v1047_v26 = vld [vmem:[%s1472_s2 + $0x130] ss:$24 sps:$4 sm:$0xff]   ;;  %v1052_v27 = vld [vmem:[%s1472_s2 + $0x104] ss:$24 sps:$4 sm:$0xff]  }
  0x42   :  { %708 = vmatmul.mubr.bf16.vlgmr.msra.gmra.mxu0 %v1357_v23  ;;  %v1050_v28 = vld [vmem:[%s1472_s2 + $0x100] ss:$24 sps:$4 sm:$0xff]   ;;  %v1055_v29 = vld [vmem:[%s1472_s2 + $0xd4] ss:$24 sps:$4 sm:$0xff]   ;;  %v1053_v30 = vld [vmem:[%s1472_s2 + $0xd0] ss:$24 sps:$4 sm:$0xff]  }
  0x43   :  { %749 = vmatmul.mubr.bf16.vlgmr.msra.gmra.mxu1 %v1357_v23  ;;  %758 = vmatpush1.bf16.msra.mxu0 %v1044_v24  ;;  %v1058_v31 = vld [vmem:[%s1472_s2 + $0xa4] ss:$24 sps:$4 sm:$0xff]   ;;  %v1056_v32 = vld [vmem:[%s1472_s2 + $0xa0] ss:$24 sps:$4 sm:$0xff]   ;;  %v1061_v33 = vld [vmem:[%s1472_s2 + $0x74] ss:$24 sps:$4 sm:$0xff]  }
  0x44   :  { %789 = vmatprep.mubr.bf16.mxu0 %v66_v13  ;;  %759 = vmatprep.subr.bf16.mxu0 %v1049_v25  ;;  %v1059_v34 = vld [vmem:[%s1472_s2 + $0x70] ss:$24 sps:$4 sm:$0xff]   ;;  %v1064_v35 = vld [vmem:[%s1472_s2 + $0x44] ss:$24 sps:$4 sm:$0xff]   ;;  %v1062_v36 = vld [vmem:[%s1472_s2 + $0x40] ss:$24 sps:$4 sm:$0xff]  }
  0x45   :  { %v1067_v37 = vld [vmem:[%s1472_s2 + $0x14] ss:$24 sps:$4 sm:$0xff]   ;;  %v1065_v38 = vld [vmem:[%s1472_s2 + $0x10] ss:$24 sps:$4 sm:$0xff]   ;;  %v1070_v39 = vld [vmem:[%s1472_s2 + $0x2e4] ss:$24 sps:$4 sm:$0xff]  }
  0x46   :  { %v1068_v40 = vld [vmem:[%s1472_s2 + $0x2e0] ss:$24 sps:$4 sm:$0xff]   ;;  %v1073_v41 = vld [vmem:[%s1472_s2 + $0x2b4] ss:$24 sps:$4 sm:$0xff]   ;;  %v1071_v42 = vld [vmem:[%s1472_s2 + $0x2b0] ss:$24 sps:$4 sm:$0xff]  }
  0x47   :  { %760 = vmatpush1.bf16.msra.mxu0 %v1047_v26  ;;  %v1076_v44 = vld [vmem:[%s1472_s2 + $0x284] ss:$24 sps:$4 sm:$0xff]   ;;  %v1074_v45 = vld [vmem:[%s1472_s2 + $0x280] ss:$24 sps:$4 sm:$0xff]   ;;  %v1079_v46 = vld [vmem:[%s1472_s2 + $0x254] ss:$24 sps:$4 sm:$0xff]  }
  0x48   :  { %761 = vmatprep.subr.bf16.mxu0 %v1052_v27  ;;  %v1077_v47 = vld [vmem:[%s1472_s2 + $0x250] ss:$24 sps:$4 sm:$0xff]   ;;  %v1082_v49 = vld [vmem:[%s1472_s2 + $0x224] ss:$24 sps:$4 sm:$0xff]   ;;  %v1080_v50 = vld [vmem:[%s1472_s2 + $0x220] ss:$24 sps:$4 sm:$0xff]  }
  0x49   :  { %v1085_v51 = vld [vmem:[%s1472_s2 + $0x1f4] ss:$24 sps:$4 sm:$0xff]   ;;  %v1083_v52 = vld [vmem:[%s1472_s2 + $0x1f0] ss:$24 sps:$4 sm:$0xff]   ;;  %v1088_v53 = vld [vmem:[%s1472_s2 + $0x1c4] ss:$24 sps:$4 sm:$0xff]  }
  0x4a   :  { %v1086_v54 = vld [vmem:[%s1472_s2 + $0x1c0] ss:$24 sps:$4 sm:$0xff]   ;;  %v1091_v55 = vld [vmem:[%s1472_s2 + $0x194] ss:$24 sps:$4 sm:$0xff]   ;;  %v1089_v56 = vld [vmem:[%s1472_s2 + $0x190] ss:$24 sps:$4 sm:$0xff]  }
  0x4b   :  { %762 = vmatpush1.bf16.msra.mxu0 %v1050_v28  ;;  %v175_v57 = vsub.s32 2, %v1267_v43  ;;  %v163_v58 = vld [vmem:[%s1473_s3] sm:$0x3f]  ;;  %v1114_v59 = vmov 1983009808   ;;  %v179_v62 = vsub.s32 3, %v1267_v43 }
  0x4c   :  { %763 = vmatprep.subr.bf16.mxu0 %v1055_v29  ;;  %v807_v61 = vunpack.c.l.s4 %v1114_v59  ;;  %v168_v63 = vrot.slane %v163_v58, %v53_v60  ;;  %v172_v1 = vrot.slane %v163_v58, %v57_v48  ;;  %v183_v20 = vsub.s32 4, %v1267_v43  ;;  %s1115_s2 = smov [#allocation2]  }
  0x4d   :  { %v176_v0 = vrot.slane %v163_v58, %v175_v57  ;;  %v180_v3 = vrot.slane %v163_v58, %v179_v62  ;;  %v187_v21 = vsub.s32 5, %v1267_v43  ;;  %s839_s3 = sshll.u32 %s1115_s2, 4  ;;  %s840_s3 = int_to_ptr.vmem [resolvable:$true] %s839_s3 }
  0x4e   :  { %v808_v2 = vunpack.c.0.s8 %v807_v61  ;;  %v184_v22 = vrot.slane %v163_v58, %v183_v20  ;;  %s1092_s25 = scalar_lea.vmem %s840_s3, 192  ;;  %p1097_p1 = scmp.lt.s32.totalorder %s840_s3, %s840_s3 }
  0x4f   :  { %764 = vmatpush1.bf16.msra.mxu0 %v1053_v30  ;;  %p1093_p0 = scmp.ne.s32.totalorder %s840_s3, %s1092_s25  ;;  %p1098_p2 = scmp.lt.s32.totalorder %s1092_s25, %s1092_s25 }
  0x50   :  { %765 = vmatprep.subr.bf16.mxu0 %v1058_v31  ;;  %v811_v11 = vsub.s32 %v808_v2, %v1267_v43 }
  0x51   :  { %p1099_p3 = por %p1098_p2, %p1097_p1 }
  0x53   :  { %766 = vmatpush1.bf16.msra.mxu0 %v1056_v32  ;;  %p1100_p4 = pnand %p1099_p3, %p1093_p0 }
  0x54   :  { %767 = vmatprep.subr.bf16.mxu0 %v1061_v33 }
  0x57   :  { %768 = vmatpush1.bf16.msra.mxu0 %v1059_v34 }
  0x58   :  { %769 = vmatprep.subr.bf16.mxu0 %v1064_v35 }
  0x5b   :  { %770 = vmatpush1.bf16.msra.mxu0 %v1062_v36 }
  0x5c   :  { %771 = vmatprep.subr.bf16.mxu0 %v1067_v37 }
  0x5f   :  { %772 = vmatpush1.bf16.msra.mxu0 %v1065_v38 }
  0x60   :  { %773 = vmatprep.subr.bf16.mxu0 %v1070_v39 }
  0x63   :  { %774 = vmatpush2.bf16.msra.mxu0 %v1068_v40 }
  0x64   :  { %775 = vmatprep.subr.bf16.mxu0 %v1073_v41 }
  0x67   :  { %776 = vmatpush2.bf16.msra.mxu0 %v1071_v42 }
  0x68   :  { %777 = vmatprep.subr.bf16.mxu0 %v1076_v44 }
  0x6b   :  { %778 = vmatpush2.bf16.msra.mxu0 %v1074_v45 }
  0x6c   :  { %779 = vmatprep.subr.bf16.mxu0 %v1079_v46 }
  0x6f   :  { %780 = vmatpush2.bf16.msra.mxu0 %v1077_v47 }
  0x70   :  { %781 = vmatprep.subr.bf16.mxu0 %v1082_v49 }
  0x73   :  { %782 = vmatpush2.bf16.msra.mxu0 %v1080_v50 }
  0x74   :  { %783 = vmatprep.subr.bf16.mxu0 %v1085_v51 }
  0x77   :  { %784 = vmatpush2.bf16.msra.mxu0 %v1083_v52 }
  0x78   :  { %785 = vmatprep.subr.bf16.mxu0 %v1088_v53 }
  0x7b   :  { %786 = vmatpush2.bf16.msra.mxu0 %v1086_v54 }
  0x7c   :  { %787 = vmatprep.subr.bf16.mxu0 %v1091_v55 }
  0x7f   :  { %788 = vmatpush2.bf16.msra.mxu0 %v1089_v56 }
  0x82   :  { %790 = vmatmul.mubr.bf16.vlgmr.msra.gmra.mxu0 %v1357_v23  ;;  %v188_v23 = vrot.slane %v163_v58, %v187_v21 }
 0x102   :  { %v709_v4 = vpop.f32.mrf.mxu0 }
 0x103   :  { %v750_v5 = vpop.f32.mrf.mxu1  ;;  %v710_v6 = vadd.f32 %v709_v4, %v168_v63 }
 0x104   :  { %v751_v7 = vadd.f32 %v750_v5, %v176_v0  ;;  %v711_v8 = vpop.f32.mrf.mxu0 }
 0x105   :  { %v752_v9 = vpop.f32.mrf.mxu1  ;;  %v712_v10 = vadd.f32 %v711_v8, %v172_v1 }
 0x106   :  { %v753_v12 = vadd.f32 %v752_v9, %v180_v3  ;;  %v713_v13 = vpop.f32.mrf.mxu0 }
 0x107   :  { %v754_v14 = vpop.f32.mrf.mxu1  ;;  %v804_v15 = vcombine.low %v710_v6, %v712_v10 }
 0x108   :  { %v805_v60 = vcombine.low %v751_v7, %v753_v12  ;;  %v714_v16 = vpop.f32.mrf.mxu0 }
 0x109   :  { %v755_v17 = vpop.f32.mrf.mxu1  ;;  %v812_v18 = vrot.slane %v804_v15, %v811_v11 }
 0x10a   :  { %v819_v48 = vrot.slane %v805_v60, %v811_v11 }
 0x10c   :  { %v820_v19 = vcombine.low %v812_v18, %v819_v48 }
 0x10e   :  { %831 = vst [vmem:[#allocation2] sm:$0xff] %v820_v19 }
 0x142   :  { %v791_v24 = vpop.f32.mrf.mxu0 }
 0x143   :  { %v792_v26 = vadd.f32 %v791_v24, %v184_v22 }
 0x144   :  { %v793_v25 = vpop.f32.mrf.mxu0 }
 0x145   :  { %v794_v27 = vadd.f32 %v793_v25, %v188_v23 }
 0x146   :  { %v795_v28 = vpop.f32.mrf.mxu0 }
 0x147   :  { %v821_v29 = vcombine.low %v792_v26, %v794_v27 }
 0x148   :  { %v796_v30 = vpop.f32.mrf.mxu0 }
 0x149   :  { %945 = vst.sshfl [vmem:[#allocation2 + $0x8] sm:$0x33 pattern:$0x76325410] %v821_v29 }
 0x14a   :  { %1103 = shalt.err (!%p1100_p4)
}
 0x14b   :  { %842 = dma.vmem_to_hbm [thread:$0]  %s840_s3, 192, %s1474_s4, [#allocation3]  }
 0x14c   :  { %1112 = dma.done.wait [#allocation3], 192  }
 0x14d   :  { %1113 = vsyncadd [#allocation3], 4294967104 }
 0x14e   :  { %846 = vsyncpa [#allocation3], 1 }

// kernel: wzrynet_forward.6
= control target key start
LH: loop header
LB: loop body
LE: loop exit
PB: predicated region body
PF: predicated region fallthrough
CT: control target
= control target key end

     0   :  { %s3331_s9 = smov 0   ;;  %s3333_s10 = smov 0   ;;  %s3724_s0 = inlined_call_operand.vmem [shape: bf16[2,4608], index: 0, kind: input, shape index: {}]   ;;  %s3725_s1 = inlined_call_operand.vmem [shape: bf16[4608,256], index: 1, kind: input, shape index: {}]   ;;  %s3726_s2 = inlined_call_operand.vmem [shape: f32[2,2,256], index: 2, kind: output, shape index: {}]  }
   0x1   :  { %s3335_s11 = smov 0  }
   0x2 LB: > { %s24_s12 = sadd.s32 1, %s3307_s10  ;;  %p2530_p0 = scmp.ge.s32.totalorder %s3311_s11, 1  ;;  %s3311_s11 = sphi %s3335_s11, %s12_s11   ;;  %s3307_s10 = sphi %s3333_s10, %s3728_s10   ;;  %s3303_s9 = sphi %s3331_s9, %s3727_s9  }
   0x3   : > { %p26_p1 = scmp.ge.s32.totalorder %s24_s12, 2  ;;  %p144_p2 = scmp.lt.s32.totalorder %s3311_s11, 3 }
   0x5   : > { %s3730_s12 = smov (%p26_p1, %s24_s12), 0  ;;  %p145_p3 = pnand %p2530_p0, %p144_p2 }
   0x6   : > { %s181_s13 = smul.u32 (!%p145_p3), 288, %s3303_s9  ;;  %p189_p6 = scmp.lt.s32.totalorder (!%p145_p3), %s3303_s9, 1 }
   0x7   : > { %148 = sbr.rel (%p145_p3) target bundleno = 540 (0x21c), region = 28 }
   0x8   : > { %p182_p4 = scmp.lt.s32.totalorder (!%p145_p3), %s181_s13, 575  ;;  %s174_s18 = smul.u32 (!%p145_p3), 18, %s3303_s9 }
   0xa   : > { %p175_p5 = scmp.lt.s32.totalorder (!%p145_p3), %s174_s18, 35 }
   0xc   : > { %s3732_s13 = smov (!%p182_p4, %s181_s13), 575  ;;  %v3313_v36 = vmov 1966171168   ;;  %v498_v38 = vlaneseq  ;;  %s3734_s18 = smov (!%p175_p5, %s174_s18), 35 }
   0xd   : > { %s2826_s14 = sshll.u32 %s3732_s13, 3  ;;  %v496_v37 = vunpack.c.l.s4 %v3313_v36  ;;  %s3407_s21 = scalar_lea.vmem %s3724_s0, %s3734_s18 }
   0xe   : > { %s3355_s17 = scalar_lea.vmem %s3725_s1, %s2826_s14  ;;  %v3397_v43 = vshrl.u32 %v498_v38, 7  ;;  %v200_v52 = vld [vmem:[%s3407_s21] sm:$0xff]  ;;  %s3736_s9 = smov (!%p189_p6, %s3303_s9), 1 }
   0xf   : > { %v2855_v0 = vld [vmem:[%s3355_s17 + $0x74] ss:$8 sps:$4 sm:$0xff]   ;;  %v2859_v2 = vld [vmem:[%s3355_s17 + $0x70] ss:$8 sps:$4 sm:$0xff]   ;;  %v2861_v4 = vld [vmem:[%s3355_s17 + $0x64] ss:$8 sps:$4 sm:$0xff]   ;;  %v497_v42 = vunpack.c.0.s8 %v496_v37 }
  0x10   : > { %v2857_v1 = vld [vmem:[%s3355_s17 + $0x174] ss:$8 sps:$4 sm:$0xff]   ;;  %2072 = vmatprep.subr.bf16.mxu0 %v2855_v0  ;;  %v2860_v3 = vld [vmem:[%s3355_s17 + $0x170] ss:$8 sps:$4 sm:$0xff]   ;;  %v2863_v5 = vld [vmem:[%s3355_s17 + $0x164] ss:$8 sps:$4 sm:$0xff]  }
  0x11   : > { %2113 = vmatprep.subr.bf16.mxu1 %v2857_v1  ;;  %2073 = vmatpush1.bf16.msra.mxu0 %v2859_v2  ;;  %v2865_v6 = vld [vmem:[%s3355_s17 + $0x60] ss:$8 sps:$4 sm:$0xff]   ;;  %v2867_v8 = vld [vmem:[%s3355_s17 + $0x54] ss:$8 sps:$4 sm:$0xff]   ;;  %v2871_v10 = vld [vmem:[%s3355_s17 + $0x50] ss:$8 sps:$4 sm:$0xff]   ;;  %v3410_v49 = vsub.s32 %v497_v42, %v3397_v43  ;;  %v494_v1 = vcombine.high %v200_v52, %v200_v52 }
  0x12   : > { %2114 = vmatpush1.bf16.msra.mxu1 %v2860_v3  ;;  %2074 = vmatprep.subr.bf16.mxu0 %v2861_v4  ;;  %v2866_v7 = vld [vmem:[%s3355_s17 + $0x160] ss:$8 sps:$4 sm:$0xff]   ;;  %v2869_v9 = vld [vmem:[%s3355_s17 + $0x154] ss:$8 sps:$4 sm:$0xff]   ;;  %v2872_v11 = vld [vmem:[%s3355_s17 + $0x150] ss:$8 sps:$4 sm:$0xff]  }
  0x13   : > { %2115 = vmatprep.subr.bf16.mxu1 %v2863_v5  ;;  %v2873_v12 = vld [vmem:[%s3355_s17 + $0x44] ss:$8 sps:$4 sm:$0xff]   ;;  %v2877_v14 = vld [vmem:[%s3355_s17 + $0x40] ss:$8 sps:$4 sm:$0xff]   ;;  %v2879_v16 = vld [vmem:[%s3355_s17 + $0x34] ss:$8 sps:$4 sm:$0xff]   ;;  %v501_v54 = vrot.slane %v200_v52, %v3410_v49 }
  0x14   : > { %v2875_v13 = vld [vmem:[%s3355_s17 + $0x144] ss:$8 sps:$4 sm:$0xff]   ;;  %v2878_v15 = vld [vmem:[%s3355_s17 + $0x140] ss:$8 sps:$4 sm:$0xff]   ;;  %v2881_v17 = vld [vmem:[%s3355_s17 + $0x134] ss:$8 sps:$4 sm:$0xff]  }
  0x15   : > { %2075 = vmatpush1.bf16.msra.mxu0 %v2865_v6  ;;  %v2883_v18 = vld [vmem:[%s3355_s17 + $0x30] ss:$8 sps:$4 sm:$0xff]   ;;  %v2885_v20 = vld [vmem:[%s3355_s17 + $0x24] ss:$8 sps:$4 sm:$0xff]   ;;  %v2889_v22 = vld [vmem:[%s3355_s17 + $0x20] ss:$8 sps:$4 sm:$0xff]   ;;  %v509_v58 = vcombine.high %v501_v54, %v501_v54  ;;  %v3430_v6 = vrot.slane %v494_v1, %v3410_v49 }
  0x16   : > { %2116 = vmatpush1.bf16.msra.mxu1 %v2866_v7  ;;  %2076 = vmatprep.subr.bf16.mxu0 %v2867_v8  ;;  %v2884_v19 = vld [vmem:[%s3355_s17 + $0x130] ss:$8 sps:$4 sm:$0xff]   ;;  %v2887_v21 = vld [vmem:[%s3355_s17 + $0x124] ss:$8 sps:$4 sm:$0xff]   ;;  %v2890_v23 = vld [vmem:[%s3355_s17 + $0x120] ss:$8 sps:$4 sm:$0xff]  }
  0x17   : > { %2117 = vmatprep.subr.bf16.mxu1 %v2869_v9  ;;  %v2891_v24 = vld [vmem:[%s3355_s17 + $0x14] ss:$8 sps:$4 sm:$0xff]   ;;  %v2895_v26 = vld [vmem:[%s3355_s17 + $0x10] ss:$8 sps:$4 sm:$0xff]   ;;  %v2897_v28 = vld [vmem:[%s3355_s17 + $0x4] ss:$8 sps:$4 sm:$0xff]   ;;  %v531_v60 = vrot.slane %v509_v58, %v3410_v49 }
  0x18   : > { %v2893_v25 = vld [vmem:[%s3355_s17 + $0x114] ss:$8 sps:$4 sm:$0xff]   ;;  %v2896_v27 = vld [vmem:[%s3355_s17 + $0x110] ss:$8 sps:$4 sm:$0xff]   ;;  %v2899_v29 = vld [vmem:[%s3355_s17 + $0x104] ss:$8 sps:$4 sm:$0xff]  }
  0x19   : > { %2077 = vmatpush1.bf16.msra.mxu0 %v2871_v10  ;;  %v2901_v30 = vld [vmem:[%s3355_s17] ss:$8 sps:$4 sm:$0xff]   ;;  %v2903_v32 = vld [vmem:[%s3355_s17 + $0xf4] ss:$8 sps:$4 sm:$0xff]   ;;  %v2907_v34 = vld [vmem:[%s3355_s17 + $0xf0] ss:$8 sps:$4 sm:$0xff]   ;;  %v541_v0 = vcombine.high %v531_v60, %v531_v60  ;;  %2104 = vmatprep.mubr.bf16.mxu0 %v531_v60 }
  0x1a   : > { %2118 = vmatpush1.bf16.msra.mxu1 %v2872_v11  ;;  %2078 = vmatprep.subr.bf16.mxu0 %v2873_v12  ;;  %v2902_v31 = vld [vmem:[%s3355_s17 + $0x100] ss:$8 sps:$4 sm:$0xff]   ;;  %v2905_v33 = vld [vmem:[%s3355_s17 + $0x1f4] ss:$8 sps:$4 sm:$0xff]   ;;  %v2908_v35 = vld [vmem:[%s3355_s17 + $0x1f0] ss:$8 sps:$4 sm:$0xff]   ;;  %v510_v11 = vcombine.high %v3430_v6, %v3430_v6 }
  0x1b   : > { %2119 = vmatprep.subr.bf16.mxu1 %v2875_v13  ;;  %v2909_v39 = vld [vmem:[%s3355_s17 + $0xe4] ss:$8 sps:$4 sm:$0xff]   ;;  %v2913_v41 = vld [vmem:[%s3355_s17 + $0xe0] ss:$8 sps:$4 sm:$0xff]   ;;  %v2915_v45 = vld [vmem:[%s3355_s17 + $0xd4] ss:$8 sps:$4 sm:$0xff]   ;;  %2145 = vmatprep.mubr.bf16.mxu1 %v541_v0  ;;  %v517_v13 = vrot.slane %v501_v54, %v3410_v49 }
  0x1c   : > { %v2911_v40 = vld [vmem:[%s3355_s17 + $0x1e4] ss:$8 sps:$4 sm:$0xff]   ;;  %v2914_v44 = vld [vmem:[%s3355_s17 + $0x1e0] ss:$8 sps:$4 sm:$0xff]   ;;  %v2917_v46 = vld [vmem:[%s3355_s17 + $0x1d4] ss:$8 sps:$4 sm:$0xff]  }
  0x1d   : > { %2079 = vmatpush1.bf16.msra.mxu0 %v2877_v14  ;;  %v2919_v47 = vld [vmem:[%s3355_s17 + $0xd0] ss:$8 sps:$4 sm:$0xff]   ;;  %v2921_v50 = vld [vmem:[%s3355_s17 + $0xc4] ss:$8 sps:$4 sm:$0xff]   ;;  %v2925_v53 = vld [vmem:[%s3355_s17 + $0xc0] ss:$8 sps:$4 sm:$0xff]  }
  0x1e   : > { %2120 = vmatpush1.bf16.msra.mxu1 %v2878_v15  ;;  %2080 = vmatprep.subr.bf16.mxu0 %v2879_v16  ;;  %v2920_v48 = vld [vmem:[%s3355_s17 + $0x1d0] ss:$8 sps:$4 sm:$0xff]   ;;  %v2923_v51 = vld [vmem:[%s3355_s17 + $0x1c4] ss:$8 sps:$4 sm:$0xff]   ;;  %v2926_v55 = vld [vmem:[%s3355_s17 + $0x1c0] ss:$8 sps:$4 sm:$0xff]  }
  0x1f   : > { %2121 = vmatprep.subr.bf16.mxu1 %v2881_v17  ;;  %v2927_v56 = vld [vmem:[%s3355_s17 + $0xb4] ss:$8 sps:$4 sm:$0xff]   ;;  %v2931_v59 = vld [vmem:[%s3355_s17 + $0xb0] ss:$8 sps:$4 sm:$0xff]   ;;  %v2933_v62 = vld [vmem:[%s3355_s17 + $0xa4] ss:$8 sps:$4 sm:$0xff]   ;;  %v538_v17 = vrot.slane %v510_v11, %v3410_v49 }
  0x20   : > { %v2929_v57 = vld [vmem:[%s3355_s17 + $0x1b4] ss:$8 sps:$4 sm:$0xff]   ;;  %v2932_v61 = vld [vmem:[%s3355_s17 + $0x1b0] ss:$8 sps:$4 sm:$0xff]   ;;  %v2935_v63 = vld [vmem:[%s3355_s17 + $0x1a4] ss:$8 sps:$4 sm:$0xff]  }
  0x21   : > { %2081 = vmatpush1.bf16.msra.mxu0 %v2883_v18  ;;  %v2937_v2 = vld [vmem:[%s3355_s17 + $0xa0] ss:$8 sps:$4 sm:$0xff]   ;;  %v2939_v4 = vld [vmem:[%s3355_s17 + $0x94] ss:$8 sps:$4 sm:$0xff]   ;;  %v2943_v7 = vld [vmem:[%s3355_s17 + $0x90] ss:$8 sps:$4 sm:$0xff]   ;;  %v539_v18 = vcombine.high %v517_v13, %v517_v13 }
  0x22   : > { %2122 = vmatpush1.bf16.msra.mxu1 %v2884_v19  ;;  %2082 = vmatprep.subr.bf16.mxu0 %v2885_v20  ;;  %v2938_v3 = vld [vmem:[%s3355_s17 + $0x1a0] ss:$8 sps:$4 sm:$0xff]   ;;  %v2941_v5 = vld [vmem:[%s3355_s17 + $0x194] ss:$8 sps:$4 sm:$0xff]   ;;  %v2944_v8 = vld [vmem:[%s3355_s17 + $0x190] ss:$8 sps:$4 sm:$0xff]  }
  0x23   : > { %2123 = vmatprep.subr.bf16.mxu1 %v2887_v21  ;;  %v2945_v9 = vld [vmem:[%s3355_s17 + $0x84] ss:$8 sps:$4 sm:$0xff]   ;;  %v2949_v12 = vld [vmem:[%s3355_s17 + $0x80] ss:$8 sps:$4 sm:$0xff]   ;;  %v2954_v15 = vld [vmem:[%s3355_s17 + $0x274] ss:$8 sps:$4 sm:$0xff]  }
  0x24   : > { %v2947_v10 = vld [vmem:[%s3355_s17 + $0x184] ss:$8 sps:$4 sm:$0xff]   ;;  %v2950_v14 = vld [vmem:[%s3355_s17 + $0x180] ss:$8 sps:$4 sm:$0xff]   ;;  %v2957_v16 = vld [vmem:[%s3355_s17 + $0x374] ss:$8 sps:$4 sm:$0xff]  }
  0x25   : > { %2083 = vmatpush1.bf16.msra.mxu0 %v2889_v22  ;;  %v2952_v19 = vld [vmem:[%s3355_s17 + $0x270] ss:$8 sps:$4 sm:$0xff]   ;;  %v2960_v21 = vld [vmem:[%s3355_s17 + $0x264] ss:$8 sps:$4 sm:$0xff]   ;;  %v2990_v42 = vld [vmem:[%s3355_s17 + $0x214] ss:$8 sps:$4 sm:$0xff]  }
  0x26   : > { %2124 = vmatpush1.bf16.msra.mxu1 %v2890_v23  ;;  %2084 = vmatprep.subr.bf16.mxu0 %v2891_v24  ;;  %v2955_v20 = vld [vmem:[%s3355_s17 + $0x370] ss:$8 sps:$4 sm:$0xff]   ;;  %v2963_v22 = vld [vmem:[%s3355_s17 + $0x364] ss:$8 sps:$4 sm:$0xff]   ;;  %v542_v23 = vcombine.high %v538_v17, %v538_v17  ;;  %v2958_v24 = vld [vmem:[%s3355_s17 + $0x260] ss:$8 sps:$4 sm:$0xff]  }
  0x27   : > { %2125 = vmatprep.subr.bf16.mxu1 %v2893_v25  ;;  %v2961_v25 = vld [vmem:[%s3355_s17 + $0x360] ss:$8 sps:$4 sm:$0xff]   ;;  %v2976_v36 = vld [vmem:[%s3355_s17 + $0x230] ss:$8 sps:$4 sm:$0xff]   ;;  %v2984_v38 = vld [vmem:[%s3355_s17 + $0x224] ss:$8 sps:$4 sm:$0xff]  }
  0x28   : > { %v2979_v37 = vld [vmem:[%s3355_s17 + $0x330] ss:$8 sps:$4 sm:$0xff]   ;;  %v3002_v52 = vld [vmem:[%s3355_s17 + $0x2f4] ss:$8 sps:$4 sm:$0xff]   ;;  %v3006_v58 = vld [vmem:[%s3355_s17 + $0x2e0] ss:$8 sps:$4 sm:$0xff]  }
  0x29   : > { %2085 = vmatpush1.bf16.msra.mxu0 %v2895_v26  ;;  %v2966_v26 = vld [vmem:[%s3355_s17 + $0x254] ss:$8 sps:$4 sm:$0xff]   ;;  %v3000_v54 = vld [vmem:[%s3355_s17 + $0x2f0] ss:$8 sps:$4 sm:$0xff]   ;;  %v3020_v0 = vld [vmem:[%s3355_s17 + $0x2c4] ss:$8 sps:$4 sm:$0xff]  }
  0x2a   : > { %2126 = vmatpush1.bf16.msra.mxu1 %v2896_v27  ;;  %2086 = vmatprep.subr.bf16.mxu0 %v2897_v28  ;;  %v2969_v27 = vld [vmem:[%s3355_s17 + $0x354] ss:$8 sps:$4 sm:$0xff]   ;;  %v2964_v28 = vld [vmem:[%s3355_s17 + $0x250] ss:$8 sps:$4 sm:$0xff]   ;;  %v3023_v1 = vld [vmem:[%s3355_s17 + $0x3c4] ss:$8 sps:$4 sm:$0xff]  }
  0x2b   : > { %2127 = vmatprep.subr.bf16.mxu1 %v2899_v29  ;;  %v2967_v29 = vld [vmem:[%s3355_s17 + $0x350] ss:$8 sps:$4 sm:$0xff]   ;;  %v3014_v60 = vld [vmem:[%s3355_s17 + $0x2d4] ss:$8 sps:$4 sm:$0xff]   ;;  %v3030_v11 = vld [vmem:[%s3355_s17 + $0x2a0] ss:$8 sps:$4 sm:$0xff]  }
  0x2c   : > { %s2827_s22 = sshll.u32 %s3736_s9, 2 }
  0x2d   : > { %2087 = vmatpush1.bf16.msra.mxu0 %v2901_v30  ;;  %v2972_v30 = vld [vmem:[%s3355_s17 + $0x244] ss:$8 sps:$4 sm:$0xff]   ;;  %s3709_s25 = scalar_lea.vmem %s3726_s2, %s2827_s22 }
  0x2e   : > { %2128 = vmatpush1.bf16.msra.mxu1 %v2902_v31  ;;  %2088 = vmatprep.subr.bf16.mxu0 %v2903_v32  ;;  %v2975_v31 = vld [vmem:[%s3355_s17 + $0x344] ss:$8 sps:$4 sm:$0xff]   ;;  %v2970_v32 = vld [vmem:[%s3355_s17 + $0x240] ss:$8 sps:$4 sm:$0xff]  }
  0x2f   : > { %2129 = vmatprep.subr.bf16.mxu1 %v2905_v33  ;;  %v2973_v33 = vld [vmem:[%s3355_s17 + $0x340] ss:$8 sps:$4 sm:$0xff]  }
  0x31   : > { %2089 = vmatpush2.bf16.msra.mxu0 %v2907_v34  ;;  %v2978_v34 = vld [vmem:[%s3355_s17 + $0x234] ss:$8 sps:$4 sm:$0xff]  }
  0x32   : > { %2130 = vmatpush2.bf16.msra.mxu1 %v2908_v35  ;;  %2090 = vmatprep.subr.bf16.mxu0 %v2909_v39  ;;  %v2981_v35 = vld [vmem:[%s3355_s17 + $0x334] ss:$8 sps:$4 sm:$0xff]   ;;  %v2987_v39 = vld [vmem:[%s3355_s17 + $0x324] ss:$8 sps:$4 sm:$0xff]  }
  0x33   : > { %2131 = vmatprep.subr.bf16.mxu1 %v2911_v40  ;;  %v2982_v40 = vld [vmem:[%s3355_s17 + $0x220] ss:$8 sps:$4 sm:$0xff]  }
  0x35   : > { %2091 = vmatpush2.bf16.msra.mxu0 %v2913_v41  ;;  %v2985_v41 = vld [vmem:[%s3355_s17 + $0x320] ss:$8 sps:$4 sm:$0xff]  }
  0x36   : > { %2132 = vmatpush2.bf16.msra.mxu1 %v2914_v44  ;;  %2092 = vmatprep.subr.bf16.mxu0 %v2915_v45  ;;  %v2993_v44 = vld [vmem:[%s3355_s17 + $0x314] ss:$8 sps:$4 sm:$0xff]   ;;  %v2988_v45 = vld [vmem:[%s3355_s17 + $0x210] ss:$8 sps:$4 sm:$0xff]  }
  0x37   : > { %2133 = vmatprep.subr.bf16.mxu1 %v2917_v46  ;;  %v2991_v46 = vld [vmem:[%s3355_s17 + $0x310] ss:$8 sps:$4 sm:$0xff]  }
  0x39   : > { %2093 = vmatpush2.bf16.msra.mxu0 %v2919_v47  ;;  %v2996_v47 = vld [vmem:[%s3355_s17 + $0x204] ss:$8 sps:$4 sm:$0xff]  }
  0x3a   : > { %2134 = vmatpush2.bf16.msra.mxu1 %v2920_v48  ;;  %2094 = vmatprep.subr.bf16.mxu0 %v2921_v50  ;;  %v2999_v48 = vld [vmem:[%s3355_s17 + $0x304] ss:$8 sps:$4 sm:$0xff]   ;;  %v2994_v50 = vld [vmem:[%s3355_s17 + $0x200] ss:$8 sps:$4 sm:$0xff]  }
  0x3b   : > { %2135 = vmatprep.subr.bf16.mxu1 %v2923_v51  ;;  %v2997_v51 = vld [vmem:[%s3355_s17 + $0x300] ss:$8 sps:$4 sm:$0xff]  }
  0x3d   : > { %2095 = vmatpush2.bf16.msra.mxu0 %v2925_v53  ;;  %v3005_v53 = vld [vmem:[%s3355_s17 + $0x3f4] ss:$8 sps:$4 sm:$0xff]  }
  0x3e   : > { %2136 = vmatpush2.bf16.msra.mxu1 %v2926_v55  ;;  %2096 = vmatprep.subr.bf16.mxu0 %v2927_v56  ;;  %v3003_v55 = vld [vmem:[%s3355_s17 + $0x3f0] ss:$8 sps:$4 sm:$0xff]   ;;  %v3008_v56 = vld [vmem:[%s3355_s17 + $0x2e4] ss:$8 sps:$4 sm:$0xff]  }
  0x3f   : > { %2137 = vmatprep.subr.bf16.mxu1 %v2929_v57  ;;  %v3011_v57 = vld [vmem:[%s3355_s17 + $0x3e4] ss:$8 sps:$4 sm:$0xff]  }
  0x41   : > { %2097 = vmatpush2.bf16.msra.mxu0 %v2931_v59  ;;  %v3009_v59 = vld [vmem:[%s3355_s17 + $0x3e0] ss:$8 sps:$4 sm:$0xff]  }
  0x42   : > { %2138 = vmatpush2.bf16.msra.mxu1 %v2932_v61  ;;  %2098 = vmatprep.subr.bf16.mxu0 %v2933_v62  ;;  %v3017_v61 = vld [vmem:[%s3355_s17 + $0x3d4] ss:$8 sps:$4 sm:$0xff]   ;;  %v3012_v62 = vld [vmem:[%s3355_s17 + $0x2d0] ss:$8 sps:$4 sm:$0xff]  }
  0x43   : > { %2139 = vmatprep.subr.bf16.mxu1 %v2935_v63  ;;  %v3015_v63 = vld [vmem:[%s3355_s17 + $0x3d0] ss:$8 sps:$4 sm:$0xff]  }
  0x45   : > { %2099 = vmatpush2.bf16.msra.mxu0 %v2937_v2  ;;  %v3018_v2 = vld [vmem:[%s3355_s17 + $0x2c0] ss:$8 sps:$4 sm:$0xff]  }
  0x46   : > { %2140 = vmatpush2.bf16.msra.mxu1 %v2938_v3  ;;  %2100 = vmatprep.subr.bf16.mxu0 %v2939_v4  ;;  %v3021_v3 = vld [vmem:[%s3355_s17 + $0x3c0] ss:$8 sps:$4 sm:$0xff]   ;;  %v3026_v4 = vld [vmem:[%s3355_s17 + $0x2b4] ss:$8 sps:$4 sm:$0xff]  }
  0x47   : > { %2141 = vmatprep.subr.bf16.mxu1 %v2941_v5  ;;  %v3029_v5 = vld [vmem:[%s3355_s17 + $0x3b4] ss:$8 sps:$4 sm:$0xff]  }
  0x49   : > { %2101 = vmatpush2.bf16.msra.mxu0 %v2943_v7  ;;  %v3024_v7 = vld [vmem:[%s3355_s17 + $0x2b0] ss:$8 sps:$4 sm:$0xff]  }
  0x4a   : > { %2142 = vmatpush2.bf16.msra.mxu1 %v2944_v8  ;;  %2102 = vmatprep.subr.bf16.mxu0 %v2945_v9  ;;  %v3027_v8 = vld [vmem:[%s3355_s17 + $0x3b0] ss:$8 sps:$4 sm:$0xff]   ;;  %v3032_v9 = vld [vmem:[%s3355_s17 + $0x2a4] ss:$8 sps:$4 sm:$0xff]  }
  0x4b   : > { %2143 = vmatprep.subr.bf16.mxu1 %v2947_v10  ;;  %v3035_v10 = vld [vmem:[%s3355_s17 + $0x3a4] ss:$8 sps:$4 sm:$0xff]  }
  0x4d   : > { %2103 = vmatpush2.bf16.msra.mxu0 %v2949_v12  ;;  %v3033_v12 = vld [vmem:[%s3355_s17 + $0x3a0] ss:$8 sps:$4 sm:$0xff]  }
  0x4e   : > { %2144 = vmatpush2.bf16.msra.mxu1 %v2950_v14  ;;  %2154 = vmatprep.subr.bf16.mxu0 %v2954_v15  ;;  %v3041_v14 = vld [vmem:[%s3355_s17 + $0x394] ss:$8 sps:$4 sm:$0xff]   ;;  %v3036_v15 = vld [vmem:[%s3355_s17 + $0x290] ss:$8 sps:$4 sm:$0xff]  }
  0x4f   : > { %2195 = vmatprep.subr.bf16.mxu1 %v2957_v16  ;;  %v3039_v16 = vld [vmem:[%s3355_s17 + $0x390] ss:$8 sps:$4 sm:$0xff]  }
  0x50   : > { %2105 = vmatmul.mubr.bf16.vlgmr.msra.gmra.mxu0 %v517_v13  ;;  %v3038_v13 = vld [vmem:[%s3355_s17 + $0x294] ss:$8 sps:$4 sm:$0xff]  }
  0x51   : > { %2146 = vmatmul.mubr.bf16.vlgmr.msra.gmra.mxu1 %v539_v18  ;;  %2155 = vmatpush1.bf16.msra.mxu0 %v2952_v19  ;;  %v3047_v18 = vld [vmem:[%s3355_s17 + $0x384] ss:$8 sps:$4 sm:$0xff]   ;;  %v3042_v19 = vld [vmem:[%s3355_s17 + $0x280] ss:$8 sps:$4 sm:$0xff]  }
  0x52   : > { %2196 = vmatpush1.bf16.msra.mxu1 %v2955_v20  ;;  %2156 = vmatprep.subr.bf16.mxu0 %v2960_v21  ;;  %v524_v20 = vrot.slane %v3430_v6, %v3410_v49  ;;  %v3045_v21 = vld [vmem:[%s3355_s17 + $0x380] ss:$8 sps:$4 sm:$0xff]   ;;  %v3056_v6 = vld [vmem:[%s3355_s17 + $0x464] ss:$8 sps:$4 sm:$0xff]  }
  0x53   : > { %2197 = vmatprep.subr.bf16.mxu1 %v2963_v22  ;;  %2186 = vmatprep.mubr.bf16.mxu0 %v538_v17  ;;  %v3044_v17 = vld [vmem:[%s3355_s17 + $0x284] ss:$8 sps:$4 sm:$0xff]   ;;  %v3050_v22 = vld [vmem:[%s3355_s17 + $0x474] ss:$8 sps:$4 sm:$0xff]  }
  0x54   : > { %2227 = vmatprep.mubr.bf16.mxu1 %v542_v23  ;;  %v3053_v23 = vld [vmem:[%s3355_s17 + $0x574] ss:$8 sps:$4 sm:$0xff]  }
  0x55   : > { %2157 = vmatpush1.bf16.msra.mxu0 %v2958_v24  ;;  %v3048_v24 = vld [vmem:[%s3355_s17 + $0x470] ss:$8 sps:$4 sm:$0xff]  }
  0x56   : > { %2198 = vmatpush1.bf16.msra.mxu1 %v2961_v25  ;;  %2158 = vmatprep.subr.bf16.mxu0 %v2966_v26  ;;  %v540_v25 = vcombine.high %v524_v20, %v524_v20  ;;  %v3051_v26 = vld [vmem:[%s3355_s17 + $0x570] ss:$8 sps:$4 sm:$0xff]  }
  0x57   : > { %2199 = vmatprep.subr.bf16.mxu1 %v2969_v27  ;;  %v3513_v27 = vld [vmem:[%s3407_s21 + $0x8] sm:$0xff] }
  0x59   : > { %2159 = vmatpush1.bf16.msra.mxu0 %v2964_v28  ;;  %v3059_v28 = vld [vmem:[%s3355_s17 + $0x564] ss:$8 sps:$4 sm:$0xff]  }
  0x5a   : > { %2200 = vmatpush1.bf16.msra.mxu1 %v2967_v29  ;;  %2160 = vmatprep.subr.bf16.mxu0 %v2972_v30  ;;  %v3519_v29 = vrot.slane %v3513_v27, %v3410_v49 }
  0x5b   : > { %2201 = vmatprep.subr.bf16.mxu1 %v2975_v31  ;;  %v3054_v31 = vld [vmem:[%s3355_s17 + $0x460] ss:$8 sps:$4 sm:$0xff]  }
  0x5c   : > { %v558_v30 = vcombine.high %v3519_v29, %v3519_v29 }
  0x5d   : > { %2161 = vmatpush1.bf16.msra.mxu0 %v2970_v32  ;;  %v3057_v32 = vld [vmem:[%s3355_s17 + $0x560] ss:$8 sps:$4 sm:$0xff]  }
  0x5e   : > { %2202 = vmatpush1.bf16.msra.mxu1 %v2973_v33  ;;  %2162 = vmatprep.subr.bf16.mxu0 %v2978_v34  ;;  %v3062_v33 = vld [vmem:[%s3355_s17 + $0x454] ss:$8 sps:$4 sm:$0xff]  }
  0x5f   : > { %2203 = vmatprep.subr.bf16.mxu1 %v2981_v35  ;;  %v3065_v34 = vld [vmem:[%s3355_s17 + $0x554] ss:$8 sps:$4 sm:$0xff]   ;;  %v580_v35 = vrot.slane %v558_v30, %v3410_v49 }
  0x61   : > { %2163 = vmatpush1.bf16.msra.mxu0 %v2976_v36  ;;  %v590_v36 = vcombine.high %v580_v35, %v580_v35 }
  0x62   : > { %2204 = vmatpush1.bf16.msra.mxu1 %v2979_v37  ;;  %2164 = vmatprep.subr.bf16.mxu0 %v2984_v38  ;;  %v3060_v37 = vld [vmem:[%s3355_s17 + $0x450] ss:$8 sps:$4 sm:$0xff]  }
  0x63   : > { %2205 = vmatprep.subr.bf16.mxu1 %v2987_v39  ;;  %v3063_v38 = vld [vmem:[%s3355_s17 + $0x550] ss:$8 sps:$4 sm:$0xff]   ;;  %v3068_v39 = vld [vmem:[%s3355_s17 + $0x444] ss:$8 sps:$4 sm:$0xff]  }
  0x65   : > { %2165 = vmatpush1.bf16.msra.mxu0 %v2982_v40  ;;  %v3071_v40 = vld [vmem:[%s3355_s17 + $0x544] ss:$8 sps:$4 sm:$0xff]  }
  0x66   : > { %2206 = vmatpush1.bf16.msra.mxu1 %v2985_v41  ;;  %2166 = vmatprep.subr.bf16.mxu0 %v2990_v42  ;;  %v3066_v41 = vld [vmem:[%s3355_s17 + $0x440] ss:$8 sps:$4 sm:$0xff]  }
  0x67   : > { %2207 = vmatprep.subr.bf16.mxu1 %v2993_v44  ;;  %v3069_v42 = vld [vmem:[%s3355_s17 + $0x540] ss:$8 sps:$4 sm:$0xff]   ;;  %v3074_v44 = vld [vmem:[%s3355_s17 + $0x434] ss:$8 sps:$4 sm:$0xff]  }
  0x69   : > { %2167 = vmatpush1.bf16.msra.mxu0 %v2988_v45  ;;  %v3077_v45 = vld [vmem:[%s3355_s17 + $0x534] ss:$8 sps:$4 sm:$0xff]  }
  0x6a   : > { %2208 = vmatpush1.bf16.msra.mxu1 %v2991_v46  ;;  %2168 = vmatprep.subr.bf16.mxu0 %v2996_v47  ;;  %v3072_v46 = vld [vmem:[%s3355_s17 + $0x430] ss:$8 sps:$4 sm:$0xff]  }
  0x6b   : > { %2209 = vmatprep.subr.bf16.mxu1 %v2999_v48  ;;  %v3075_v47 = vld [vmem:[%s3355_s17 + $0x530] ss:$8 sps:$4 sm:$0xff]   ;;  %v3080_v48 = vld [vmem:[%s3355_s17 + $0x424] ss:$8 sps:$4 sm:$0xff]  }
  0x6d   : > { %2169 = vmatpush1.bf16.msra.mxu0 %v2994_v50  ;;  %v3083_v50 = vld [vmem:[%s3355_s17 + $0x524] ss:$8 sps:$4 sm:$0xff]  }
  0x6e   : > { %2210 = vmatpush1.bf16.msra.mxu1 %v2997_v51  ;;  %2170 = vmatprep.subr.bf16.mxu0 %v3002_v52  ;;  %v3078_v51 = vld [vmem:[%s3355_s17 + $0x420] ss:$8 sps:$4 sm:$0xff]  }
  0x6f   : > { %2211 = vmatprep.subr.bf16.mxu1 %v3005_v53  ;;  %v3081_v52 = vld [vmem:[%s3355_s17 + $0x520] ss:$8 sps:$4 sm:$0xff]   ;;  %v3086_v53 = vld [vmem:[%s3355_s17 + $0x414] ss:$8 sps:$4 sm:$0xff]  }
  0x71   : > { %2171 = vmatpush2.bf16.msra.mxu0 %v3000_v54  ;;  %v3089_v54 = vld [vmem:[%s3355_s17 + $0x514] ss:$8 sps:$4 sm:$0xff]  }
  0x72   : > { %2212 = vmatpush2.bf16.msra.mxu1 %v3003_v55  ;;  %2172 = vmatprep.subr.bf16.mxu0 %v3008_v56  ;;  %v3084_v55 = vld [vmem:[%s3355_s17 + $0x410] ss:$8 sps:$4 sm:$0xff]  }
  0x73   : > { %2213 = vmatprep.subr.bf16.mxu1 %v3011_v57  ;;  %v3087_v56 = vld [vmem:[%s3355_s17 + $0x510] ss:$8 sps:$4 sm:$0xff]   ;;  %v3092_v57 = vld [vmem:[%s3355_s17 + $0x404] ss:$8 sps:$4 sm:$0xff]  }
  0x75   : > { %2173 = vmatpush2.bf16.msra.mxu0 %v3006_v58  ;;  %v3095_v58 = vld [vmem:[%s3355_s17 + $0x504] ss:$8 sps:$4 sm:$0xff]  }
  0x76   : > { %2214 = vmatpush2.bf16.msra.mxu1 %v3009_v59  ;;  %2174 = vmatprep.subr.bf16.mxu0 %v3014_v60  ;;  %v3090_v59 = vld [vmem:[%s3355_s17 + $0x400] ss:$8 sps:$4 sm:$0xff]  }
  0x77   : > { %2215 = vmatprep.subr.bf16.mxu1 %v3017_v61  ;;  %v3093_v60 = vld [vmem:[%s3355_s17 + $0x500] ss:$8 sps:$4 sm:$0xff]   ;;  %v3098_v61 = vld [vmem:[%s3355_s17 + $0x4f4] ss:$8 sps:$4 sm:$0xff]  }
  0x79   : > { %2175 = vmatpush2.bf16.msra.mxu0 %v3012_v62  ;;  %v3101_v62 = vld [vmem:[%s3355_s17 + $0x5f4] ss:$8 sps:$4 sm:$0xff]  }
  0x7a   : > { %2216 = vmatpush2.bf16.msra.mxu1 %v3015_v63  ;;  %2176 = vmatprep.subr.bf16.mxu0 %v3020_v0  ;;  %v3096_v63 = vld [vmem:[%s3355_s17 + $0x4f0] ss:$8 sps:$4 sm:$0xff]  }
  0x7b   : > { %2217 = vmatprep.subr.bf16.mxu1 %v3023_v1  ;;  %v3099_v0 = vld [vmem:[%s3355_s17 + $0x5f0] ss:$8 sps:$4 sm:$0xff]   ;;  %v3104_v1 = vld [vmem:[%s3355_s17 + $0x4e4] ss:$8 sps:$4 sm:$0xff]  }
  0x7d   : > { %2177 = vmatpush2.bf16.msra.mxu0 %v3018_v2  ;;  %v3107_v2 = vld [vmem:[%s3355_s17 + $0x5e4] ss:$8 sps:$4 sm:$0xff]  }
  0x7e   : > { %2218 = vmatpush2.bf16.msra.mxu1 %v3021_v3  ;;  %2178 = vmatprep.subr.bf16.mxu0 %v3026_v4  ;;  %v3102_v3 = vld [vmem:[%s3355_s17 + $0x4e0] ss:$8 sps:$4 sm:$0xff]  }
  0x7f   : > { %2219 = vmatprep.subr.bf16.mxu1 %v3029_v5  ;;  %v3105_v4 = vld [vmem:[%s3355_s17 + $0x5e0] ss:$8 sps:$4 sm:$0xff]   ;;  %v3110_v5 = vld [vmem:[%s3355_s17 + $0x4d4] ss:$8 sps:$4 sm:$0xff]  }
  0x81   : > { %2179 = vmatpush2.bf16.msra.mxu0 %v3024_v7  ;;  %v3113_v7 = vld [vmem:[%s3355_s17 + $0x5d4] ss:$8 sps:$4 sm:$0xff]  }
  0x82   : > { %2220 = vmatpush2.bf16.msra.mxu1 %v3027_v8  ;;  %2180 = vmatprep.subr.bf16.mxu0 %v3032_v9  ;;  %v3108_v8 = vld [vmem:[%s3355_s17 + $0x4d0] ss:$8 sps:$4 sm:$0xff]  }
  0x83   : > { %2221 = vmatprep.subr.bf16.mxu1 %v3035_v10  ;;  %v3111_v9 = vld [vmem:[%s3355_s17 + $0x5d0] ss:$8 sps:$4 sm:$0xff]   ;;  %v3116_v10 = vld [vmem:[%s3355_s17 + $0x4c4] ss:$8 sps:$4 sm:$0xff]  }
  0x85   : > { %2181 = vmatpush2.bf16.msra.mxu0 %v3030_v11  ;;  %v3119_v11 = vld [vmem:[%s3355_s17 + $0x5c4] ss:$8 sps:$4 sm:$0xff]  }
  0x86   : > { %2222 = vmatpush2.bf16.msra.mxu1 %v3033_v12  ;;  %2182 = vmatprep.subr.bf16.mxu0 %v3038_v13  ;;  %v3114_v12 = vld [vmem:[%s3355_s17 + $0x4c0] ss:$8 sps:$4 sm:$0xff]  }
  0x87   : > { %2223 = vmatprep.subr.bf16.mxu1 %v3041_v14  ;;  %v3117_v13 = vld [vmem:[%s3355_s17 + $0x5c0] ss:$8 sps:$4 sm:$0xff]   ;;  %v3122_v14 = vld [vmem:[%s3355_s17 + $0x4b4] ss:$8 sps:$4 sm:$0xff]  }
  0x89   : > { %2183 = vmatpush2.bf16.msra.mxu0 %v3036_v15  ;;  %v3125_v15 = vld [vmem:[%s3355_s17 + $0x5b4] ss:$8 sps:$4 sm:$0xff]  }
  0x8a   : > { %2224 = vmatpush2.bf16.msra.mxu1 %v3039_v16  ;;  %2184 = vmatprep.subr.bf16.mxu0 %v3044_v17  ;;  %v3120_v16 = vld [vmem:[%s3355_s17 + $0x4b0] ss:$8 sps:$4 sm:$0xff]  }
  0x8b   : > { %2225 = vmatprep.subr.bf16.mxu1 %v3047_v18  ;;  %v3123_v17 = vld [vmem:[%s3355_s17 + $0x5b0] ss:$8 sps:$4 sm:$0xff]   ;;  %v3128_v18 = vld [vmem:[%s3355_s17 + $0x4a4] ss:$8 sps:$4 sm:$0xff]  }
  0x8d   : > { %2185 = vmatpush2.bf16.msra.mxu0 %v3042_v19  ;;  %v3131_v19 = vld [vmem:[%s3355_s17 + $0x5a4] ss:$8 sps:$4 sm:$0xff]  }
  0x8e   : > { %2226 = vmatpush2.bf16.msra.mxu1 %v3045_v21  ;;  %2236 = vmatprep.subr.bf16.mxu0 %v3050_v22  ;;  %v3126_v21 = vld [vmem:[%s3355_s17 + $0x4a0] ss:$8 sps:$4 sm:$0xff]  }
  0x8f   : > { %2277 = vmatprep.subr.bf16.mxu1 %v3053_v23  ;;  %v3129_v22 = vld [vmem:[%s3355_s17 + $0x5a0] ss:$8 sps:$4 sm:$0xff]   ;;  %v3134_v23 = vld [vmem:[%s3355_s17 + $0x494] ss:$8 sps:$4 sm:$0xff]  }
  0x90   : > { %2187 = vmatmul.mubr.bf16.vlgmr.msra.gmra.mxu0 %v524_v20  ;;  %v543_v20 = vcombine.high %v3513_v27, %v3513_v27  ;;  %v3135_v27 = vld [vmem:[%s3355_s17 + $0x590] ss:$8 sps:$4 sm:$0xff]  }
  0x91   : > { %2228 = vmatmul.mubr.bf16.vlgmr.msra.gmra.mxu1 %v540_v25  ;;  %2237 = vmatpush1.bf16.msra.mxu0 %v3048_v24  ;;  %v3137_v24 = vld [vmem:[%s3355_s17 + $0x594] ss:$8 sps:$4 sm:$0xff]  }
  0x92   : > { %2278 = vmatpush1.bf16.msra.mxu1 %v3051_v26  ;;  %2238 = vmatprep.subr.bf16.mxu0 %v3056_v6  ;;  %v3579_v25 = vrot.slane %v543_v20, %v3410_v49  ;;  %v3132_v26 = vld [vmem:[%s3355_s17 + $0x490] ss:$8 sps:$4 sm:$0xff]   ;;  %v3140_v6 = vld [vmem:[%s3355_s17 + $0x484] ss:$8 sps:$4 sm:$0xff]  }
  0x93   : > { %2279 = vmatprep.subr.bf16.mxu1 %v3059_v28  ;;  %2268 = vmatprep.mubr.bf16.mxu0 %v580_v35  ;;  %v3143_v28 = vld [vmem:[%s3355_s17 + $0x584] ss:$8 sps:$4 sm:$0xff]   ;;  %v3149_v35 = vld [vmem:[%s3355_s17 + $0x774] ss:$8 sps:$4 sm:$0xff]  }
  0x94   : > { %2309 = vmatprep.mubr.bf16.mxu1 %v590_v36  ;;  %v559_v30 = vcombine.high %v3579_v25, %v3579_v25  ;;  %v3215_v20 = vld [vmem:[%s3355_s17 + $0x7c4] ss:$8 sps:$4 sm:$0xff]  }
  0x95   : > { %2239 = vmatpush1.bf16.msra.mxu0 %v3054_v31  ;;  %v566_v31 = vrot.slane %v3519_v29, %v3410_v49  ;;  %v3147_v29 = vld [vmem:[%s3355_s17 + $0x770] ss:$8 sps:$4 sm:$0xff]  }
  0x96   : > { %2280 = vmatpush1.bf16.msra.mxu1 %v3057_v32  ;;  %2240 = vmatprep.subr.bf16.mxu0 %v3062_v33  ;;  %v3138_v32 = vld [vmem:[%s3355_s17 + $0x480] ss:$8 sps:$4 sm:$0xff]   ;;  %v587_v36 = vrot.slane %v559_v30, %v3410_v49 }
  0x97   : > { %2281 = vmatprep.subr.bf16.mxu1 %v3065_v34  ;;  %v3141_v33 = vld [vmem:[%s3355_s17 + $0x580] ss:$8 sps:$4 sm:$0xff]   ;;  %v3146_v34 = vld [vmem:[%s3355_s17 + $0x674] ss:$8 sps:$4 sm:$0xff]  }
  0x98   : > { %v3222_v30 = vld [vmem:[%s3355_s17 + $0x6a0] ss:$8 sps:$4 sm:$0xff]  }
  0x99   : > { %2241 = vmatpush1.bf16.msra.mxu0 %v3060_v37  ;;  %v588_v37 = vcombine.high %v566_v31, %v566_v31 }
  0x9a   : > { %2282 = vmatpush1.bf16.msra.mxu1 %v3063_v38  ;;  %2242 = vmatprep.subr.bf16.mxu0 %v3068_v39  ;;  %v3144_v38 = vld [vmem:[%s3355_s17 + $0x670] ss:$8 sps:$4 sm:$0xff]   ;;  %v3152_v39 = vld [vmem:[%s3355_s17 + $0x664] ss:$8 sps:$4 sm:$0xff]  }
  0x9b   : > { %2283 = vmatprep.subr.bf16.mxu1 %v3071_v40  ;;  %v3155_v40 = vld [vmem:[%s3355_s17 + $0x764] ss:$8 sps:$4 sm:$0xff]  }
  0x9d   : > { %2243 = vmatpush1.bf16.msra.mxu0 %v3066_v41  ;;  %v591_v41 = vcombine.high %v587_v36, %v587_v36 }
  0x9e   : > { %2284 = vmatpush1.bf16.msra.mxu1 %v3069_v42  ;;  %2244 = vmatprep.subr.bf16.mxu0 %v3074_v44  ;;  %v3150_v42 = vld [vmem:[%s3355_s17 + $0x660] ss:$8 sps:$4 sm:$0xff]  }
  0x9f   : > { %2285 = vmatprep.subr.bf16.mxu1 %v3077_v45  ;;  %v3153_v44 = vld [vmem:[%s3355_s17 + $0x760] ss:$8 sps:$4 sm:$0xff]   ;;  %v3158_v45 = vld [vmem:[%s3355_s17 + $0x654] ss:$8 sps:$4 sm:$0xff]  }
  0xa1   : > { %2245 = vmatpush1.bf16.msra.mxu0 %v3072_v46  ;;  %v3161_v46 = vld [vmem:[%s3355_s17 + $0x754] ss:$8 sps:$4 sm:$0xff]  }
  0xa2   : > { %2286 = vmatpush1.bf16.msra.mxu1 %v3075_v47  ;;  %2246 = vmatprep.subr.bf16.mxu0 %v3080_v48  ;;  %v3156_v47 = vld [vmem:[%s3355_s17 + $0x650] ss:$8 sps:$4 sm:$0xff]  }
  0xa3   : > { %2287 = vmatprep.subr.bf16.mxu1 %v3083_v50  ;;  %v3159_v48 = vld [vmem:[%s3355_s17 + $0x750] ss:$8 sps:$4 sm:$0xff]   ;;  %v3164_v50 = vld [vmem:[%s3355_s17 + $0x644] ss:$8 sps:$4 sm:$0xff]  }
  0xa5   : > { %2247 = vmatpush1.bf16.msra.mxu0 %v3078_v51  ;;  %v3167_v51 = vld [vmem:[%s3355_s17 + $0x744] ss:$8 sps:$4 sm:$0xff]  }
  0xa6   : > { %2288 = vmatpush1.bf16.msra.mxu1 %v3081_v52  ;;  %2248 = vmatprep.subr.bf16.mxu0 %v3086_v53  ;;  %v3162_v52 = vld [vmem:[%s3355_s17 + $0x640] ss:$8 sps:$4 sm:$0xff]  }
  0xa7   : > { %2289 = vmatprep.subr.bf16.mxu1 %v3089_v54  ;;  %v3165_v53 = vld [vmem:[%s3355_s17 + $0x740] ss:$8 sps:$4 sm:$0xff]   ;;  %v3170_v54 = vld [vmem:[%s3355_s17 + $0x634] ss:$8 sps:$4 sm:$0xff]  }
  0xa9   : > { %2249 = vmatpush1.bf16.msra.mxu0 %v3084_v55  ;;  %v3173_v55 = vld [vmem:[%s3355_s17 + $0x734] ss:$8 sps:$4 sm:$0xff]  }
  0xaa   : > { %2290 = vmatpush1.bf16.msra.mxu1 %v3087_v56  ;;  %2250 = vmatprep.subr.bf16.mxu0 %v3092_v57  ;;  %v3168_v56 = vld [vmem:[%s3355_s17 + $0x630] ss:$8 sps:$4 sm:$0xff]  }
  0xab   : > { %2291 = vmatprep.subr.bf16.mxu1 %v3095_v58  ;;  %v3171_v57 = vld [vmem:[%s3355_s17 + $0x730] ss:$8 sps:$4 sm:$0xff]   ;;  %v3176_v58 = vld [vmem:[%s3355_s17 + $0x624] ss:$8 sps:$4 sm:$0xff]  }
  0xad   : > { %2251 = vmatpush1.bf16.msra.mxu0 %v3090_v59  ;;  %v3179_v59 = vld [vmem:[%s3355_s17 + $0x724] ss:$8 sps:$4 sm:$0xff]  }
  0xae   : > { %2292 = vmatpush1.bf16.msra.mxu1 %v3093_v60  ;;  %2252 = vmatprep.subr.bf16.mxu0 %v3098_v61  ;;  %v3174_v60 = vld [vmem:[%s3355_s17 + $0x620] ss:$8 sps:$4 sm:$0xff]  }
  0xaf   : > { %2293 = vmatprep.subr.bf16.mxu1 %v3101_v62  ;;  %v3177_v61 = vld [vmem:[%s3355_s17 + $0x720] ss:$8 sps:$4 sm:$0xff]   ;;  %v3182_v62 = vld [vmem:[%s3355_s17 + $0x614] ss:$8 sps:$4 sm:$0xff]  }
  0xb1   : > { %2253 = vmatpush2.bf16.msra.mxu0 %v3096_v63  ;;  %v3185_v63 = vld [vmem:[%s3355_s17 + $0x714] ss:$8 sps:$4 sm:$0xff]  }
  0xb2   : > { %2294 = vmatpush2.bf16.msra.mxu1 %v3099_v0  ;;  %2254 = vmatprep.subr.bf16.mxu0 %v3104_v1  ;;  %v3180_v0 = vld [vmem:[%s3355_s17 + $0x610] ss:$8 sps:$4 sm:$0xff]  }
  0xb3   : > { %2295 = vmatprep.subr.bf16.mxu1 %v3107_v2  ;;  %v3183_v1 = vld [vmem:[%s3355_s17 + $0x710] ss:$8 sps:$4 sm:$0xff]   ;;  %v3188_v2 = vld [vmem:[%s3355_s17 + $0x604] ss:$8 sps:$4 sm:$0xff]  }
  0xb5   : > { %2255 = vmatpush2.bf16.msra.mxu0 %v3102_v3  ;;  %v3191_v3 = vld [vmem:[%s3355_s17 + $0x704] ss:$8 sps:$4 sm:$0xff]  }
  0xb6   : > { %2296 = vmatpush2.bf16.msra.mxu1 %v3105_v4  ;;  %2256 = vmatprep.subr.bf16.mxu0 %v3110_v5  ;;  %v3186_v4 = vld [vmem:[%s3355_s17 + $0x600] ss:$8 sps:$4 sm:$0xff]  }
  0xb7   : > { %2297 = vmatprep.subr.bf16.mxu1 %v3113_v7  ;;  %v3189_v5 = vld [vmem:[%s3355_s17 + $0x700] ss:$8 sps:$4 sm:$0xff]   ;;  %v3194_v7 = vld [vmem:[%s3355_s17 + $0x6f4] ss:$8 sps:$4 sm:$0xff]  }
  0xb9   : > { %2257 = vmatpush2.bf16.msra.mxu0 %v3108_v8  ;;  %v3197_v8 = vld [vmem:[%s3355_s17 + $0x7f4] ss:$8 sps:$4 sm:$0xff]  }
  0xba   : > { %2298 = vmatpush2.bf16.msra.mxu1 %v3111_v9  ;;  %2258 = vmatprep.subr.bf16.mxu0 %v3116_v10  ;;  %v3192_v9 = vld [vmem:[%s3355_s17 + $0x6f0] ss:$8 sps:$4 sm:$0xff]  }
  0xbb   : > { %2299 = vmatprep.subr.bf16.mxu1 %v3119_v11  ;;  %v3195_v10 = vld [vmem:[%s3355_s17 + $0x7f0] ss:$8 sps:$4 sm:$0xff]   ;;  %v3200_v11 = vld [vmem:[%s3355_s17 + $0x6e4] ss:$8 sps:$4 sm:$0xff]  }
  0xbd   : > { %2259 = vmatpush2.bf16.msra.mxu0 %v3114_v12  ;;  %v3203_v12 = vld [vmem:[%s3355_s17 + $0x7e4] ss:$8 sps:$4 sm:$0xff]  }
  0xbe   : > { %2300 = vmatpush2.bf16.msra.mxu1 %v3117_v13  ;;  %2260 = vmatprep.subr.bf16.mxu0 %v3122_v14  ;;  %v3198_v13 = vld [vmem:[%s3355_s17 + $0x6e0] ss:$8 sps:$4 sm:$0xff]  }
  0xbf   : > { %2301 = vmatprep.subr.bf16.mxu1 %v3125_v15  ;;  %v3201_v14 = vld [vmem:[%s3355_s17 + $0x7e0] ss:$8 sps:$4 sm:$0xff]   ;;  %v3206_v15 = vld [vmem:[%s3355_s17 + $0x6d4] ss:$8 sps:$4 sm:$0xff]  }
  0xc1   : > { %2261 = vmatpush2.bf16.msra.mxu0 %v3120_v16  ;;  %v3209_v16 = vld [vmem:[%s3355_s17 + $0x7d4] ss:$8 sps:$4 sm:$0xff]  }
  0xc2   : > { %2302 = vmatpush2.bf16.msra.mxu1 %v3123_v17  ;;  %2262 = vmatprep.subr.bf16.mxu0 %v3128_v18  ;;  %v3204_v17 = vld [vmem:[%s3355_s17 + $0x6d0] ss:$8 sps:$4 sm:$0xff]  }
  0xc3   : > { %2303 = vmatprep.subr.bf16.mxu1 %v3131_v19  ;;  %v3207_v18 = vld [vmem:[%s3355_s17 + $0x7d0] ss:$8 sps:$4 sm:$0xff]   ;;  %v3212_v19 = vld [vmem:[%s3355_s17 + $0x6c4] ss:$8 sps:$4 sm:$0xff]  }
  0xc5   : > { %2263 = vmatpush2.bf16.msra.mxu0 %v3126_v21  ;;  %v3210_v21 = vld [vmem:[%s3355_s17 + $0x6c0] ss:$8 sps:$4 sm:$0xff]  }
  0xc6   : > { %2304 = vmatpush2.bf16.msra.mxu1 %v3129_v22  ;;  %2264 = vmatprep.subr.bf16.mxu0 %v3134_v23  ;;  %v3213_v22 = vld [vmem:[%s3355_s17 + $0x7c0] ss:$8 sps:$4 sm:$0xff]   ;;  %v3218_v23 = vld [vmem:[%s3355_s17 + $0x6b4] ss:$8 sps:$4 sm:$0xff]  }
  0xc7   : > { %2305 = vmatprep.subr.bf16.mxu1 %v3137_v24  ;;  %v3221_v24 = vld [vmem:[%s3355_s17 + $0x7b4] ss:$8 sps:$4 sm:$0xff]  }
  0xc9   : > { %2265 = vmatpush2.bf16.msra.mxu0 %v3132_v26  ;;  %v3216_v26 = vld [vmem:[%s3355_s17 + $0x6b0] ss:$8 sps:$4 sm:$0xff]  }
  0xca   : > { %2306 = vmatpush2.bf16.msra.mxu1 %v3135_v27  ;;  %2266 = vmatprep.subr.bf16.mxu0 %v3140_v6  ;;  %v3219_v27 = vld [vmem:[%s3355_s17 + $0x7b0] ss:$8 sps:$4 sm:$0xff]   ;;  %v3224_v6 = vld [vmem:[%s3355_s17 + $0x6a4] ss:$8 sps:$4 sm:$0xff]  }
  0xcb   : > { %2307 = vmatprep.subr.bf16.mxu1 %v3143_v28  ;;  %v3227_v28 = vld [vmem:[%s3355_s17 + $0x7a4] ss:$8 sps:$4 sm:$0xff]  }
  0xcd   : > { %2267 = vmatpush2.bf16.msra.mxu0 %v3138_v32  ;;  %v3230_v32 = vld [vmem:[%s3355_s17 + $0x694] ss:$8 sps:$4 sm:$0xff]  }
  0xce   : > { %2308 = vmatpush2.bf16.msra.mxu1 %v3141_v33  ;;  %2318 = vmatprep.subr.bf16.mxu0 %v3146_v34  ;;  %v3233_v33 = vld [vmem:[%s3355_s17 + $0x794] ss:$8 sps:$4 sm:$0xff]   ;;  %v3228_v34 = vld [vmem:[%s3355_s17 + $0x690] ss:$8 sps:$4 sm:$0xff]  }
  0xcf   : > { %2359 = vmatprep.subr.bf16.mxu1 %v3149_v35  ;;  %v3231_v35 = vld [vmem:[%s3355_s17 + $0x790] ss:$8 sps:$4 sm:$0xff]  }
  0xd0   : > { %2269 = vmatmul.mubr.bf16.vlgmr.msra.gmra.mxu0 %v566_v31  ;;  %v3225_v31 = vld [vmem:[%s3355_s17 + $0x7a0] ss:$8 sps:$4 sm:$0xff]  }
  0xd1   : > { %2310 = vmatmul.mubr.bf16.vlgmr.msra.gmra.mxu1 %v588_v37  ;;  %2319 = vmatpush1.bf16.msra.mxu0 %v3144_v38  ;;  %v3239_v37 = vld [vmem:[%s3355_s17 + $0x784] ss:$8 sps:$4 sm:$0xff]   ;;  %v3655_v38 = vld.sshfl [vmem:[%s3407_s21 + $0x10] sm:$0x11 pattern:$0x75316420] }
  0xd2   : > { %2360 = vmatpush1.bf16.msra.mxu1 %v3147_v29  ;;  %2320 = vmatprep.subr.bf16.mxu0 %v3152_v39  ;;  %v573_v29 = vrot.slane %v3579_v25, %v3410_v49  ;;  %v3234_v39 = vld [vmem:[%s3355_s17 + $0x680] ss:$8 sps:$4 sm:$0xff]   ;;  %v3246_v25 = vld [vmem:[%s3355_s17 + $0x864] ss:$8 sps:$4 sm:$0xff]  }
  0xd3   : > { %2361 = vmatprep.subr.bf16.mxu1 %v3155_v40  ;;  %2350 = vmatprep.mubr.bf16.mxu0 %v587_v36  ;;  %v3236_v36 = vld [vmem:[%s3355_s17 + $0x684] ss:$8 sps:$4 sm:$0xff]   ;;  %v3237_v40 = vld [vmem:[%s3355_s17 + $0x780] ss:$8 sps:$4 sm:$0xff]  }
  0xd4   : > { %2391 = vmatprep.mubr.bf16.mxu1 %v591_v41  ;;  %v599_v41 = vcombine.high %v3655_v38, %v3655_v38 }
  0xd5   : > { %2321 = vmatpush1.bf16.msra.mxu0 %v3150_v42  ;;  %v3243_v42 = vld [vmem:[%s3355_s17 + $0x874] ss:$8 sps:$4 sm:$0xff]  }
  0xd6   : > { %2362 = vmatpush1.bf16.msra.mxu1 %v3153_v44  ;;  %2322 = vmatprep.subr.bf16.mxu0 %v3158_v45  ;;  %v589_v44 = vcombine.high %v573_v29, %v573_v29  ;;  %v3241_v45 = vld [vmem:[%s3355_s17 + $0x870] ss:$8 sps:$4 sm:$0xff]  }
  0xd7   : > { %2363 = vmatprep.subr.bf16.mxu1 %v3161_v46  ;;  %v613_v46 = vrot.slane %v599_v41, %v3410_v49 }
  0xd9   : > { %2323 = vmatpush1.bf16.msra.mxu0 %v3156_v47 }
  0xda   : > { %2364 = vmatpush1.bf16.msra.mxu1 %v3159_v48  ;;  %2324 = vmatprep.subr.bf16.mxu0 %v3164_v50 }
  0xdb   : > { %2365 = vmatprep.subr.bf16.mxu1 %v3167_v51  ;;  %v3244_v51 = vld [vmem:[%s3355_s17 + $0x860] ss:$8 sps:$4 sm:$0xff]  }
  0xdd   : > { %2325 = vmatpush1.bf16.msra.mxu0 %v3162_v52 }
  0xde   : > { %2366 = vmatpush1.bf16.msra.mxu1 %v3165_v53  ;;  %2326 = vmatprep.subr.bf16.mxu0 %v3170_v54  ;;  %v3249_v54 = vld [vmem:[%s3355_s17 + $0x854] ss:$8 sps:$4 sm:$0xff]  }
  0xdf   : > { %2367 = vmatprep.subr.bf16.mxu1 %v3173_v55 }
  0xe1   : > { %2327 = vmatpush1.bf16.msra.mxu0 %v3168_v56 }
  0xe2   : > { %2368 = vmatpush1.bf16.msra.mxu1 %v3171_v57  ;;  %2328 = vmatprep.subr.bf16.mxu0 %v3176_v58  ;;  %v3247_v58 = vld [vmem:[%s3355_s17 + $0x850] ss:$8 sps:$4 sm:$0xff]  }
  0xe3   : > { %2369 = vmatprep.subr.bf16.mxu1 %v3179_v59 }
  0xe5   : > { %2329 = vmatpush1.bf16.msra.mxu0 %v3174_v60  ;;  %v3252_v60 = vld [vmem:[%s3355_s17 + $0x844] ss:$8 sps:$4 sm:$0xff]  }
  0xe6   : > { %2370 = vmatpush1.bf16.msra.mxu1 %v3177_v61  ;;  %2330 = vmatprep.subr.bf16.mxu0 %v3182_v62  ;;  %v3250_v62 = vld [vmem:[%s3355_s17 + $0x840] ss:$8 sps:$4 sm:$0xff]  }
  0xe7   : > { %2371 = vmatprep.subr.bf16.mxu1 %v3185_v63  ;;  %v3255_v63 = vld [vmem:[%s3355_s17 + $0x834] ss:$8 sps:$4 sm:$0xff]  }
  0xe9   : > { %2331 = vmatpush1.bf16.msra.mxu0 %v3180_v0  ;;  %v3253_v0 = vld [vmem:[%s3355_s17 + $0x830] ss:$8 sps:$4 sm:$0xff]  }
  0xea   : > { %2372 = vmatpush1.bf16.msra.mxu1 %v3183_v1  ;;  %2332 = vmatprep.subr.bf16.mxu0 %v3188_v2  ;;  %v3258_v1 = vld [vmem:[%s3355_s17 + $0x824] ss:$8 sps:$4 sm:$0xff]   ;;  %v3256_v2 = vld [vmem:[%s3355_s17 + $0x820] ss:$8 sps:$4 sm:$0xff]  }
  0xeb   : > { %2373 = vmatprep.subr.bf16.mxu1 %v3191_v3  ;;  %v3261_v3 = vld [vmem:[%s3355_s17 + $0x814] ss:$8 sps:$4 sm:$0xff]  }
  0xed   : > { %2333 = vmatpush1.bf16.msra.mxu0 %v3186_v4  ;;  %v3259_v4 = vld [vmem:[%s3355_s17 + $0x810] ss:$8 sps:$4 sm:$0xff]  }
  0xee   : > { %2374 = vmatpush1.bf16.msra.mxu1 %v3189_v5  ;;  %2334 = vmatprep.subr.bf16.mxu0 %v3194_v7  ;;  %v3264_v5 = vld [vmem:[%s3355_s17 + $0x804] ss:$8 sps:$4 sm:$0xff]   ;;  %v3262_v7 = vld [vmem:[%s3355_s17 + $0x800] ss:$8 sps:$4 sm:$0xff]  }
  0xef   : > { %2375 = vmatprep.subr.bf16.mxu1 %v3197_v8  ;;  %v3267_v8 = vld [vmem:[%s3355_s17 + $0x8f4] ss:$8 sps:$4 sm:$0xff]  }
  0xf1   : > { %2335 = vmatpush2.bf16.msra.mxu0 %v3192_v9  ;;  %v3265_v9 = vld [vmem:[%s3355_s17 + $0x8f0] ss:$8 sps:$4 sm:$0xff]  }
  0xf2   : > { %2376 = vmatpush2.bf16.msra.mxu1 %v3195_v10  ;;  %2336 = vmatprep.subr.bf16.mxu0 %v3200_v11  ;;  %v3270_v10 = vld [vmem:[%s3355_s17 + $0x8e4] ss:$8 sps:$4 sm:$0xff]   ;;  %v3268_v11 = vld [vmem:[%s3355_s17 + $0x8e0] ss:$8 sps:$4 sm:$0xff]  }
  0xf3   : > { %2377 = vmatprep.subr.bf16.mxu1 %v3203_v12  ;;  %v3273_v12 = vld [vmem:[%s3355_s17 + $0x8d4] ss:$8 sps:$4 sm:$0xff]  }
  0xf5   : > { %2337 = vmatpush2.bf16.msra.mxu0 %v3198_v13  ;;  %v3271_v13 = vld [vmem:[%s3355_s17 + $0x8d0] ss:$8 sps:$4 sm:$0xff]  }
  0xf6   : > { %2378 = vmatpush2.bf16.msra.mxu1 %v3201_v14  ;;  %2338 = vmatprep.subr.bf16.mxu0 %v3206_v15  ;;  %v3276_v14 = vld [vmem:[%s3355_s17 + $0x8c4] ss:$8 sps:$4 sm:$0xff]   ;;  %v3274_v15 = vld [vmem:[%s3355_s17 + $0x8c0] ss:$8 sps:$4 sm:$0xff]  }
  0xf7   : > { %2379 = vmatprep.subr.bf16.mxu1 %v3209_v16  ;;  %v3279_v16 = vld [vmem:[%s3355_s17 + $0x8b4] ss:$8 sps:$4 sm:$0xff]  }
  0xf9   : > { %2339 = vmatpush2.bf16.msra.mxu0 %v3204_v17  ;;  %v3277_v17 = vld [vmem:[%s3355_s17 + $0x8b0] ss:$8 sps:$4 sm:$0xff]  }
  0xfa   : > { %2380 = vmatpush2.bf16.msra.mxu1 %v3207_v18  ;;  %2340 = vmatprep.subr.bf16.mxu0 %v3212_v19  ;;  %v3282_v18 = vld [vmem:[%s3355_s17 + $0x8a4] ss:$8 sps:$4 sm:$0xff]   ;;  %v3280_v19 = vld [vmem:[%s3355_s17 + $0x8a0] ss:$8 sps:$4 sm:$0xff]  }
  0xfb   : > { %2381 = vmatprep.subr.bf16.mxu1 %v3215_v20  ;;  %v3285_v20 = vld [vmem:[%s3355_s17 + $0x894] ss:$8 sps:$4 sm:$0xff]  }
  0xfd   : > { %2341 = vmatpush2.bf16.msra.mxu0 %v3210_v21  ;;  %v3283_v21 = vld [vmem:[%s3355_s17 + $0x890] ss:$8 sps:$4 sm:$0xff]  }
  0xfe   : > { %2382 = vmatpush2.bf16.msra.mxu1 %v3213_v22  ;;  %2342 = vmatprep.subr.bf16.mxu0 %v3218_v23  ;;  %v3288_v22 = vld [vmem:[%s3355_s17 + $0x884] ss:$8 sps:$4 sm:$0xff]   ;;  %v3286_v23 = vld [vmem:[%s3355_s17 + $0x880] ss:$8 sps:$4 sm:$0xff]  }
  0xff   : > { %2383 = vmatprep.subr.bf16.mxu1 %v3221_v24  ;;  %v606_v24 = vrot.slane %v3655_v38, %v3410_v49 }
 0x101   : > { %2343 = vmatpush2.bf16.msra.mxu0 %v3216_v26 }
 0x102   : > { %2384 = vmatpush2.bf16.msra.mxu1 %v3219_v27  ;;  %2344 = vmatprep.subr.bf16.mxu0 %v3224_v6 }
 0x103   : > { %2385 = vmatprep.subr.bf16.mxu1 %v3227_v28 }
 0x105   : > { %2345 = vmatpush2.bf16.msra.mxu0 %v3222_v30 }
 0x106   : > { %2386 = vmatpush2.bf16.msra.mxu1 %v3225_v31  ;;  %2346 = vmatprep.subr.bf16.mxu0 %v3230_v32 }
 0x107   : > { %2387 = vmatprep.subr.bf16.mxu1 %v3233_v33 }
 0x109   : > { %2347 = vmatpush2.bf16.msra.mxu0 %v3228_v34 }
 0x10a   : > { %2388 = vmatpush2.bf16.msra.mxu1 %v3231_v35  ;;  %2348 = vmatprep.subr.bf16.mxu0 %v3236_v36 }
 0x10b   : > { %2389 = vmatprep.subr.bf16.mxu1 %v3239_v37 }
 0x10d   : > { %2349 = vmatpush2.bf16.msra.mxu0 %v3234_v39  ;;  %v3314_v39 = vmov 0.0  }
 0x10e   : > { %2390 = vmatpush2.bf16.msra.mxu1 %v3237_v40  ;;  %2400 = vmatprep.subr.bf16.mxu0 %v3243_v42  ;;  %198 = vst [vmem:[%s3709_s25] sm:$0xf] %v3314_v39 }
 0x110   : > { %v2106_v47 = vpop.f32.mrf.mxu0  ;;  %2351 = vmatmul.mubr.bf16.vlgmr.msra.gmra.mxu0 %v573_v29 }
 0x111   : > { %v2147_v48 = vpop.f32.mrf.mxu1  ;;  %2392 = vmatmul.mubr.bf16.vlgmr.msra.gmra.mxu1 %v589_v44  ;;  %2401 = vmatpush1.bf16.msra.mxu0 %v3241_v45 }
 0x112   : > { %v3667_v50 = vadd.f32 %v2147_v48, %v2106_v47  ;;  %2432 = vmatprep.mubr.bf16.mxu0 %v613_v46  ;;  %v2108_v52 = vpop.f32.mrf.mxu0  ;;  %2402 = vmatprep.subr.bf16.mxu0 %v3246_v25 }
 0x113   : > { %v2149_v53 = vpop.f32.mrf.mxu1 }
 0x114   : > { %v3671_v55 = vadd.f32 %v2149_v53, %v2108_v52  ;;  %v2110_v56 = vpop.f32.mrf.mxu0 }
 0x115   : > { %v2151_v57 = vpop.f32.mrf.mxu1  ;;  %2403 = vmatpush1.bf16.msra.mxu0 %v3244_v51 }
 0x116   : > { %v2111_v59 = vpop.f32.mrf.mxu0  ;;  %2404 = vmatprep.subr.bf16.mxu0 %v3249_v54 }
 0x117   : > { %v2152_v61 = vpop.f32.mrf.mxu1 }
 0x119   : > { %2405 = vmatpush1.bf16.msra.mxu0 %v3247_v58 }
 0x11a   : > { %2406 = vmatprep.subr.bf16.mxu0 %v3252_v60  ;;  %v3315_v60 = vmov 1983009808  }
 0x11b   : > { %v2445_v61 = vunpack.c.l.s4 %v3315_v60 }
 0x11d   : > { %2407 = vmatpush1.bf16.msra.mxu0 %v3250_v62 }
 0x11e   : > { %2408 = vmatprep.subr.bf16.mxu0 %v3255_v63  ;;  %v2446_v63 = vunpack.c.0.s8 %v2445_v61 }
 0x121   : > { %2409 = vmatpush1.bf16.msra.mxu0 %v3253_v0 }
 0x122   : > { %2410 = vmatprep.subr.bf16.mxu0 %v3258_v1 }
 0x125   : > { %2411 = vmatpush1.bf16.msra.mxu0 %v3256_v2 }
 0x126   : > { %2412 = vmatprep.subr.bf16.mxu0 %v3261_v3 }
 0x129   : > { %2413 = vmatpush1.bf16.msra.mxu0 %v3259_v4 }
 0x12a   : > { %2414 = vmatprep.subr.bf16.mxu0 %v3264_v5  ;;  %v2449_v5 = vsub.s32 %v2446_v63, %v3397_v43 }
 0x12d   : > { %2415 = vmatpush1.bf16.msra.mxu0 %v3262_v7 }
 0x12e   : > { %2416 = vmatprep.subr.bf16.mxu0 %v3267_v8 }
 0x131   : > { %2417 = vmatpush2.bf16.msra.mxu0 %v3265_v9  ;;  %v199_v9 = vld [vmem:[%s3709_s25] sm:$0xf] }
 0x132   : > { %2418 = vmatprep.subr.bf16.mxu0 %v3270_v10 }
 0x135   : > { %2419 = vmatpush2.bf16.msra.mxu0 %v3268_v11 }
 0x136   : > { %2420 = vmatprep.subr.bf16.mxu0 %v3273_v12 }
 0x139   : > { %2421 = vmatpush2.bf16.msra.mxu0 %v3271_v13 }
 0x13a   : > { %2422 = vmatprep.subr.bf16.mxu0 %v3276_v14 }
 0x13d   : > { %2423 = vmatpush2.bf16.msra.mxu0 %v3274_v15 }
 0x13e   : > { %2424 = vmatprep.subr.bf16.mxu0 %v3279_v16 }
 0x141   : > { %2425 = vmatpush2.bf16.msra.mxu0 %v3277_v17 }
 0x142   : > { %2426 = vmatprep.subr.bf16.mxu0 %v3282_v18 }
 0x145   : > { %2427 = vmatpush2.bf16.msra.mxu0 %v3280_v19 }
 0x146   : > { %2428 = vmatprep.subr.bf16.mxu0 %v3285_v20 }
 0x149   : > { %2429 = vmatpush2.bf16.msra.mxu0 %v3283_v21 }
 0x14a   : > { %2430 = vmatprep.subr.bf16.mxu0 %v3288_v22 }
 0x14d   : > { %2431 = vmatpush2.bf16.msra.mxu0 %v3286_v23 }
 0x150   : > { %v2188_v26 = vpop.f32.mrf.mxu0  ;;  %2433 = vmatmul.mubr.bf16.vlgmr.msra.gmra.mxu0 %v606_v24 }
 0x151   : > { %v2229_v27 = vpop.f32.mrf.mxu1  ;;  %v2189_v6 = vadd.f32 %v2188_v26, %v3667_v50 }
 0x152   : > { %v2190_v28 = vpop.f32.mrf.mxu0 }
 0x153   : > { %v2231_v30 = vpop.f32.mrf.mxu1  ;;  %v2191_v31 = vadd.f32 %v2190_v28, %v3671_v55  ;;  %v2230_v32 = vadd.f32 %v2229_v27, %v2189_v6 }
 0x154   : > { %v2192_v33 = vpop.f32.mrf.mxu0 }
 0x155   : > { %v2233_v34 = vpop.f32.mrf.mxu1  ;;  %v2232_v35 = vadd.f32 %v2231_v30, %v2191_v31 }
 0x156   : > { %v2193_v36 = vpop.f32.mrf.mxu0 }
 0x157   : > { %v2234_v37 = vpop.f32.mrf.mxu1 }
 0x190   : > { %v2270_v49 = vpop.f32.mrf.mxu0 }
 0x191   : > { %v2311_v38 = vpop.f32.mrf.mxu1  ;;  %v2271_v29 = vadd.f32 %v2270_v49, %v2230_v32 }
 0x192   : > { %v2272_v40 = vpop.f32.mrf.mxu0 }
 0x193   : > { %v2313_v41 = vpop.f32.mrf.mxu1  ;;  %v2273_v42 = vadd.f32 %v2272_v40, %v2232_v35  ;;  %v2312_v44 = vadd.f32 %v2311_v38, %v2271_v29 }
 0x194   : > { %v2274_v45 = vpop.f32.mrf.mxu0 }
 0x195   : > { %v2315_v46 = vpop.f32.mrf.mxu1  ;;  %v2314_v25 = vadd.f32 %v2313_v41, %v2273_v42 }
 0x196   : > { %v2275_v47 = vpop.f32.mrf.mxu0 }
 0x197   : > { %v2316_v48 = vpop.f32.mrf.mxu1 }
 0x1d0   : > { %v2352_v50 = vpop.f32.mrf.mxu0 }
 0x1d1   : > { %v2393_v51 = vpop.f32.mrf.mxu1  ;;  %v2353_v52 = vadd.f32 %v2352_v50, %v2312_v44 }
 0x1d2   : > { %v2354_v53 = vpop.f32.mrf.mxu0 }
 0x1d3   : > { %v2395_v54 = vpop.f32.mrf.mxu1  ;;  %v2394_v55 = vadd.f32 %v2393_v51, %v2353_v52  ;;  %v2355_v62 = vadd.f32 %v2354_v53, %v2314_v25 }
 0x1d4   : > { %v2356_v56 = vpop.f32.mrf.mxu0 }
 0x1d5   : > { %v2397_v57 = vpop.f32.mrf.mxu1  ;;  %v2396_v1 = vadd.f32 %v2395_v54, %v2355_v62 }
 0x1d6   : > { %v2357_v58 = vpop.f32.mrf.mxu0 }
 0x1d7   : > { %v2398_v59 = vpop.f32.mrf.mxu1 }
 0x210   : > { %v2434_v0 = vpop.f32.mrf.mxu0 }
 0x211   : > { %v2435_v3 = vadd.f32 %v2434_v0, %v2394_v55 }
 0x212   : > { %v2436_v2 = vpop.f32.mrf.mxu0 }
 0x213   : > { %v2437_v4 = vadd.f32 %v2436_v2, %v2396_v1 }
 0x214   : > { %v2438_v7 = vpop.f32.mrf.mxu0 }
 0x215   : > { %v2443_v8 = vcombine.low %v2435_v3, %v2437_v4 }
 0x216   : > { %v2439_v10 = vpop.f32.mrf.mxu0 }
 0x217   : > { %v2450_v11 = vrot.slane %v2443_v8, %v2449_v5 }
 0x219   : > { %v2452_v12 = vadd.f32 %v2450_v11, %v199_v9 }
 0x21b   : > { %2453 = vst [vmem:[%s3709_s25] sm:$0xf] %v2452_v12 }
 0x21c PF: > { %s12_s11 = sadd.s32 1, %s3311_s11   ;;  %s3727_s9 = smov %s3307_s10 }
 0x21d   : > { %p9_p7 = scmp.ge.s32.totalorder %s12_s11, 4   ;;  %s3728_s10 = smov %s3730_s12 }
 0x21f   :  { %11 = sbr.rel (!%p9_p7) target bundleno = 2 (0x2), region = 65 }

</bundles_post_ra>
